<compile_context>
chip_gen: v6e
topology: v6e:2x2x1
jax: 0.10.0
libtpu: 0.0.40
codegen_flags: <defaults>
</compile_context>

<pallas_src>
import functools

import jax
import jax.numpy as jnp
from jax import lax
from jax.experimental import pallas as pl
from jax.experimental.pallas import tpu as pltpu

_VMEM_LIMIT = 32 * 1024 * 1024


# ----------------------------------------------------------------------------
# In-kernel helpers
# ----------------------------------------------------------------------------

def _sep_conv_taps(pad_ref, wc_ref, Ho, Wo, Cin, stride):
    """Nine accumulating MXU matmuls (depthwise taps folded into pointwise)."""
    acc = None
    for kh in range(3):
        for kw in range(3):
            if stride == 1:
                patch = pad_ref[kh:kh + Ho, kw:kw + Wo, :]
            else:
                patch = pad_ref[pl.ds(kh, Ho, stride), pl.ds(kw, Wo, stride), :]
            c = jnp.dot(patch.reshape(Ho * Wo, Cin), wc_ref[kh * 3 + kw],
                        preferred_element_type=jnp.float32)
            acc = c if acc is None else acc + c
    return acc


def _accum_stats(sum_ref, sq_ref, y):
    """Per-channel sum / sum-of-squares accumulated across the batch grid axis."""
    @pl.when(pl.program_id(0) == 0)
    def _():
        sum_ref[...] = jnp.zeros_like(sum_ref)
        sq_ref[...] = jnp.zeros_like(sq_ref)

    sum_ref[...] += y.sum(axis=0)[None, :]
    sq_ref[...] += (y * y).sum(axis=0)[None, :]


# ----------------------------------------------------------------------------
# Pallas kernels
# ----------------------------------------------------------------------------

def _conv1_kernel(x_ref, wc_ref, bc_ref, out_ref, sum_ref, sq_ref,
                  pad_ref, *, stride):
    """conv1 (fused depthwise 3x3 + pointwise 1x1) + BN-stat accumulation."""
    _, H, W, Cin = x_ref.shape
    _, Ho, Wo, Cout = out_ref.shape

    # Zero the halo once; interior is fully overwritten every grid step.
    @pl.when(pl.program_id(0) == 0)
    def _():
        pad_ref[...] = jnp.zeros_like(pad_ref)

    pad_ref[1:1 + H, 1:1 + W, :] = x_ref[0]

    y = _sep_conv_taps(pad_ref, wc_ref, Ho, Wo, Cin, stride) + bc_ref[...]
    out_ref[0] = y.reshape(Ho, Wo, Cout)
    _accum_stats(sum_ref, sq_ref, y)


def _conv1_ds_kernel(x_ref, wc_ref, bc_ref, wd_ref, bd_ref,
                     out_ref, sum_ref, sq_ref, id_ref, dsum_ref, dsq_ref,
                     pad_ref, *, stride):
    """conv1 + fused downsample 1x1 projection (shared input load) + BN stats."""
    _, H, W, Cin = x_ref.shape
    _, Ho, Wo, Cout = out_ref.shape

    @pl.when(pl.program_id(0) == 0)
    def _():
        pad_ref[...] = jnp.zeros_like(pad_ref)

    pad_ref[1:1 + H, 1:1 + W, :] = x_ref[0]

    y = _sep_conv_taps(pad_ref, wc_ref, Ho, Wo, Cin, stride) + bc_ref[...]
    out_ref[0] = y.reshape(Ho, Wo, Cout)
    _accum_stats(sum_ref, sq_ref, y)

    # Downsample path: 1x1 conv; stride folded into the load.
    if stride == 1:
        xs = x_ref[0]
    else:
        xs = x_ref[0, pl.ds(0, Ho, stride), pl.ds(0, Wo, stride), :]
    yd = jnp.dot(xs.reshape(Ho * Wo, Cin), wd_ref[...],
                 preferred_element_type=jnp.float32) + bd_ref[...]
    id_ref[0] = yd.reshape(Ho, Wo, Cout)
    _accum_stats(dsum_ref, dsq_ref, yd)


def _bn_relu_conv2_kernel(y1_ref, sc_ref, sh_ref, wc_ref, bc_ref,
                          out_ref, sum_ref, sq_ref, pad_ref):
    """bn1 + ReLU fused into the padded-scratch fill, then conv2 + BN stats."""
    _, H, W, Cin = y1_ref.shape
    _, Ho, Wo, Cout = out_ref.shape

    @pl.when(pl.program_id(0) == 0)
    def _():
        pad_ref[...] = jnp.zeros_like(pad_ref)

    sc = sc_ref[...].reshape(1, 1, Cin)
    sh = sh_ref[...].reshape(1, 1, Cin)
    pad_ref[1:1 + H, 1:1 + W, :] = jnp.maximum(y1_ref[0] * sc + sh, 0.0)

    y = _sep_conv_taps(pad_ref, wc_ref, Ho, Wo, Cin, 1) + bc_ref[...]
    out_ref[0] = y.reshape(Ho, Wo, Cout)
    _accum_stats(sum_ref, sq_ref, y)


# Elementwise epilogues on the lane-dense (N, H*W*C) 2-D view.
def _bn_add_relu_kernel(y_ref, sc_ref, sh_ref, id_ref, out_ref):
    out_ref[...] = jnp.maximum(
        y_ref[...] * sc_ref[...] + sh_ref[...] + id_ref[...], 0.0)


def _bn2_add_bn_relu_kernel(y_ref, sc_ref, sh_ref, id_ref, si_ref, bi_ref,
                            out_ref):
    o = y_ref[...] * sc_ref[...] + sh_ref[...]
    o = o + id_ref[...] * si_ref[...] + bi_ref[...]
    out_ref[...] = jnp.maximum(o, 0.0)


# ----------------------------------------------------------------------------
# pallas_call wrappers
# ----------------------------------------------------------------------------

def _fold_dw_pw(p):
    """Fold depthwise taps into the pointwise weights -> pure MXU work."""
    cin, cout = p["w_pw"].shape
    wc = (p["w_dw"][:, :, :, None] * p["w_pw"][None, None, :, :]
          ).reshape(9, cin, cout)
    bc = p["b_dw"] @ p["w_pw"] + p["b_pw"]                  # (1, Cout)
    return wc, bc


def conv1_bn_stats(x, p, stride):
    N, H, W, Cin = x.shape
    Cout = p["w_pw"].shape[1]
    Ho = (H + 2 - 3) // stride + 1
    Wo = (W + 2 - 3) // stride + 1
    wc, bc = _fold_dw_pw(p)
    stat = jax.ShapeDtypeStruct((1, Cout), jnp.float32)
    stat_spec = pl.BlockSpec((1, Cout), lambda n: (0, 0))
    return pl.pallas_call(
        functools.partial(_conv1_kernel, stride=stride),
        out_shape=(jax.ShapeDtypeStruct((N, Ho, Wo, Cout), jnp.float32),
                   stat, stat),
        grid=(N,),
        in_specs=[
            pl.BlockSpec((1, H, W, Cin), lambda n: (n, 0, 0, 0)),
            pl.BlockSpec((9, Cin, Cout), lambda n: (0, 0, 0)),
            stat_spec,
        ],
        out_specs=(pl.BlockSpec((1, Ho, Wo, Cout), lambda n: (n, 0, 0, 0)),
                   stat_spec, stat_spec),
        scratch_shapes=[pltpu.VMEM((H + 2, W + 2, Cin), jnp.float32)],
        compiler_params=pltpu.CompilerParams(
            dimension_semantics=("arbitrary",),     # stats accumulate over batch
            vmem_limit_bytes=_VMEM_LIMIT),
    )(x, wc, bc)


def conv1_ds_bn_stats(x, p, wd, bd, stride):
    N, H, W, Cin = x.shape
    Cout = p["w_pw"].shape[1]
    Ho = (H + 2 - 3) // stride + 1
    Wo = (W + 2 - 3) // stride + 1
    wc, bc = _fold_dw_pw(p)
    stat = jax.ShapeDtypeStruct((1, Cout), jnp.float32)
    stat_spec = pl.BlockSpec((1, Cout), lambda n: (0, 0))
    act = jax.ShapeDtypeStruct((N, Ho, Wo, Cout), jnp.float32)
    act_spec = pl.BlockSpec((1, Ho, Wo, Cout), lambda n: (n, 0, 0, 0))
    return pl.pallas_call(
        functools.partial(_conv1_ds_kernel, stride=stride),
        out_shape=(act, stat, stat, act, stat, stat),
        grid=(N,),
        in_specs=[
            pl.BlockSpec((1, H, W, Cin), lambda n: (n, 0, 0, 0)),
            pl.BlockSpec((9, Cin, Cout), lambda n: (0, 0, 0)),
            stat_spec,
            pl.BlockSpec((Cin, Cout), lambda n: (0, 0)),
            stat_spec,
        ],
        out_specs=(act_spec, stat_spec, stat_spec,
                   act_spec, stat_spec, stat_spec),
        scratch_shapes=[pltpu.VMEM((H + 2, W + 2, Cin), jnp.float32)],
        compiler_params=pltpu.CompilerParams(
            dimension_semantics=("arbitrary",),
            vmem_limit_bytes=_VMEM_LIMIT),
    )(x, wc, bc, wd, bd)


def bn_relu_conv2_bn_stats(y1, scale, shift, p):
    N, H, W, Cin = y1.shape
    Cout = p["w_pw"].shape[1]
    wc, bc = _fold_dw_pw(p)
    stat = jax.ShapeDtypeStruct((1, Cout), jnp.float32)
    stat_spec = pl.BlockSpec((1, Cout), lambda n: (0, 0))
    cin_spec = pl.BlockSpec((1, Cin), lambda n: (0, 0))
    return pl.pallas_call(
        _bn_relu_conv2_kernel,
        out_shape=(jax.ShapeDtypeStruct((N, H, W, Cout), jnp.float32),
                   stat, stat),
        grid=(N,),
        in_specs=[
            pl.BlockSpec((1, H, W, Cin), lambda n: (n, 0, 0, 0)),
            cin_spec, cin_spec,
            pl.BlockSpec((9, Cin, Cout), lambda n: (0, 0, 0)),
            stat_spec,
        ],
        out_specs=(pl.BlockSpec((1, H, W, Cout), lambda n: (n, 0, 0, 0)),
                   stat_spec, stat_spec),
        scratch_shapes=[pltpu.VMEM((H + 2, W + 2, Cin), jnp.float32)],
        compiler_params=pltpu.CompilerParams(
            dimension_semantics=("arbitrary",),
            vmem_limit_bytes=_VMEM_LIMIT),
    )(y1, scale, shift, wc, bc)


def fold_bn(s, sq, count, bn, eps=1e-5):
    """Fold training-mode BN (batch mean / biased var) into scale & shift."""
    mean = s[0] / count
    var = jnp.maximum(sq[0] / count - mean * mean, 0.0)   # clamp cancellation
    scale = bn["gamma"][0] / jnp.sqrt(var + eps)
    shift = bn["beta"][0] - mean * scale
    return scale[None, :], shift[None, :]                 # (1, C) each


def _row_block(rows, cols, budget_bytes=2 << 20):
    """Largest divisor of `rows` keeping one (tr, cols) f32 block under budget
    while respecting the sublane-of-8 constraint (or covering all rows)."""
    max_rows = max(1, budget_bytes // max(1, cols * 4))
    for d in range(min(rows, max_rows), 0, -1):
        if rows % d == 0 and (d % 8 == 0 or d == rows):
            return d
    return rows


def _ew_pallas_call(kernel, inputs, rows, cols):
    """Elementwise kernel on a (rows, cols) 2-D view.

    inputs: ordered list of (array, is_tile); is_tile=True -> (rows, cols)
    tensor tiled over the row grid, False -> (1, cols) broadcast row.
    """
    tr = _row_block(rows, cols)
    in_specs = [pl.BlockSpec((tr, cols), lambda i: (i, 0)) if full
                else pl.BlockSpec((1, cols), lambda i: (0, 0))
                for _, full in inputs]
    return pl.pallas_call(
        kernel,
        out_shape=jax.ShapeDtypeStruct((rows, cols), jnp.float32),
        grid=(rows // tr,),
        in_specs=in_specs,
        out_specs=pl.BlockSpec((tr, cols), lambda i: (i, 0)),
        compiler_params=pltpu.CompilerParams(
            dimension_semantics=("parallel",),
            vmem_limit_bytes=_VMEM_LIMIT),
    )(*[a for a, _ in inputs])


def bn_add_relu(y, scale, shift, ident):
    """relu(bn(y) + ident) — plain residual path (no identity BN)."""
    N, H, W, C = y.shape
    rows, cols, reps = N, H * W * C, H * W
    out = _ew_pallas_call(
        _bn_add_relu_kernel,
        [(y.reshape(rows, cols), True),
         (jnp.tile(scale, (1, reps)), False),
         (jnp.tile(shift, (1, reps)), False),
         (ident.reshape(rows, cols), True)],
        rows, cols)
    return out.reshape(N, H, W, C)


def bn2_add_bn_relu(y, scale, shift, ident, iscale, ishift):
    """relu(bn(y) + bn_ds(ident)) — downsample residual path."""
    N, H, W, C = y.shape
    rows, cols, reps = N, H * W * C, H * W
    out = _ew_pallas_call(
        _bn2_add_bn_relu_kernel,
        [(y.reshape(rows, cols), True),
         (jnp.tile(scale, (1, reps)), False),
         (jnp.tile(shift, (1, reps)), False),
         (ident.reshape(rows, cols), True),
         (jnp.tile(iscale, (1, reps)), False),
         (jnp.tile(ishift, (1, reps)), False)],
        rows, cols)
    return out.reshape(N, H, W, C)


# ----------------------------------------------------------------------------
# ResNetBlock forward
# ----------------------------------------------------------------------------

def resnet_block_forward(x_nchw, p, stride=1, downsample=False):
    if stride != 1 and not downsample:
        raise ValueError("stride != 1 requires downsample=True "
                         "(residual shapes would not match)")
    x = jnp.transpose(x_nchw, (0, 2, 3, 1))               # NCHW -> NHWC

    # conv1 (+ optional fused downsample projection) with fused BN statistics
    if downsample:
        y1, s1, q1, idc, sd, qd = conv1_ds_bn_stats(
            x, p["conv1"], p["ds_w"], p["ds_b"], stride)
    else:
        y1, s1, q1 = conv1_bn_stats(x, p["conv1"], stride)

    N, Ho, Wo, _ = y1.shape
    cnt = float(N * Ho * Wo)
    sc1, sh1 = fold_bn(s1, q1, cnt, p["bn1"])

    # bn1 + relu fused into conv2's input; conv2 emits BN stats
    y2, s2, q2 = bn_relu_conv2_bn_stats(y1, sc1, sh1, p["conv2"])
    sc2, sh2 = fold_bn(s2, q2, cnt, p["bn2"])

    if downsample:
        scd, shd = fold_bn(sd, qd, cnt, p["bn_ds"])
        out = bn2_add_bn_relu(y2, sc2, sh2, idc, scd, shd)
    else:
        out = bn_add_relu(y2, sc2, sh2, x)
    return jnp.transpose(out, (0, 3, 1, 2))               # NHWC -> NCHW


# ----------------------------------------------------------------------------
# deterministic parameter construction (matches module __init__ shapes)
# ----------------------------------------------------------------------------

def _xavier(key, shape, fan_in, fan_out):
    bound = (6.0 / (fan_in + fan_out)) ** 0.5
    return jax.random.uniform(key, shape, jnp.float32, -bound, bound)


def make_sep_params(key, cin, cout):
    k1, k2 = jax.random.split(key)
    return {
        "w_dw": _xavier(k1, (3, 3, cin), 9, 9),             # depthwise 3x3
        "b_dw": jnp.full((1, cin), 0.2, jnp.float32),
        "w_pw": _xavier(k2, (cin, cout), cin, cout),         # pointwise 1x1
        "b_pw": jnp.full((1, cout), 0.2, jnp.float32),
    }


def make_block_params(key, cin, cout, downsample):
    keys = jax.random.split(key, 3)
    p = {
        "conv1": make_sep_params(keys[0], cin, cout),
        "conv2": make_sep_params(keys[1], cout, cout),
        "bn1": {"gamma": jnp.ones((1, cout), jnp.float32),
                "beta": jnp.zeros((1, cout), jnp.float32)},
        "bn2": {"gamma": jnp.ones((1, cout), jnp.float32),
                "beta": jnp.zeros((1, cout), jnp.float32)},
    }
    if downsample:
        p["ds_w"] = _xavier(keys[2], (cin, cout), cin, cout)
        p["ds_b"] = jnp.zeros((1, cout), jnp.float32)
        p["bn_ds"] = {"gamma": jnp.ones((1, cout), jnp.float32),
                      "beta": jnp.zeros((1, cout), jnp.float32)}
    return p


# ----------------------------------------------------------------------------
# pure-JAX reference (for correctness check)
# ----------------------------------------------------------------------------

def _ref_bn_train(y, bn, eps=1e-5):
    mean = y.mean(axis=(0, 1, 2))
    var = y.var(axis=(0, 1, 2))
    return (y - mean) / jnp.sqrt(var + eps) * bn["gamma"][0] + bn["beta"][0]


def _ref_sep_conv(x, p, stride):
    cin = x.shape[-1]
    dw_kernel = p["w_dw"][:, :, None, :]                   # HWIO, I=1, O=Cin
    y = lax.conv_general_dilated(
        x, dw_kernel, (stride, stride), ((1, 1), (1, 1)),
        dimension_numbers=("NHWC", "HWIO", "NHWC"),
        feature_group_count=cin)
    y = y + p["b_dw"][0]
    return jnp.einsum("nhwc,co->nhwo", y, p["w_pw"]) + p["b_pw"][0]


def resnet_block_reference(x_nchw, p, stride=1, downsample=False):
    x = jnp.transpose(x_nchw, (0, 2, 3, 1))
    out = _ref_sep_conv(x, p["conv1"], stride)
    out = jax.nn.relu(_ref_bn_train(out, p["bn1"]))
    out = _ref_sep_conv(out, p["conv2"], 1)
    out = _ref_bn_train(out, p["bn2"])
    if downsample:
        ident = x[:, ::stride, ::stride, :]
        ident = jnp.einsum("nhwc,co->nhwo", ident, p["ds_w"]) + p["ds_b"][0]
        ident = _ref_bn_train(ident, p["bn_ds"])
    else:
        ident = x
    out = jax.nn.relu(out + ident)
    return jnp.transpose(out, (0, 3, 1, 2))


# ----------------------------------------------------------------------------

if __name__ == "__main__":
    key = jax.random.PRNGKey(0)
    kx, kpa, kpb = jax.random.split(key, 3)

    N, Cin, H, W = 2, 4, 16, 16
    x = jax.random.normal(kx, (N, Cin, H, W), jnp.float32)

    # Config A: in == out, stride 1, no downsample (plain residual add)
    params_a = make_block_params(kpa, Cin, Cin, downsample=False)
    out_a = resnet_block_forward(x, params_a, stride=1, downsample=False)
    ref_a = resnet_block_reference(x, params_a, stride=1, downsample=False)

    # Config B: channel expansion with downsample projection (1x1 conv + BN)
    Cout = 8
    params_b = make_block_params(kpb, Cin, Cout, downsample=True)
    out_b = resnet_block_forward(x, params_b, stride=1, downsample=True)
    ref_b = resnet_block_reference(x, params_b, stride=1, downsample=True)

    jax.block_until_ready((out_a, out_b))

    assert out_a.shape == (N, Cin, H, W)
    assert out_b.shape == (N, Cout, H, W)
    assert bool(jnp.allclose(out_a, ref_a, rtol=2e-3, atol=2e-3))
    assert bool(jnp.allclose(out_b, ref_b, rtol=2e-3, atol=2e-3))

    print("KERNEL_OK")
</pallas_src>

<mosaic_0001>
module attributes {stable_mosaic.version = 11 : i64} {
  func.func @_conv1_kernel(%arg0: i32, %arg1: memref<1x16x16x4xf32, #tpu.memory_space<vmem>>, %arg2: memref<9x4x4xf32, #tpu.memory_space<vmem>>, %arg3: memref<1x4xf32, #tpu.memory_space<vmem>>, %arg4: memref<1x16x16x4xf32, #tpu.memory_space<vmem>>, %arg5: memref<1x4xf32, #tpu.memory_space<vmem>>, %arg6: memref<1x4xf32, #tpu.memory_space<vmem>>, %arg7: memref<18x18x4xf32, #tpu.memory_space<vmem>>) attributes {dimension_semantics = [#tpu.dimension_semantics<arbitrary>], iteration_bounds = array<i64: 2>, scalar_prefetch = 0 : i64, scratch_operands = 1 : i64, tpu.core_type = #tpu.core_type<tc>, window_params = [{transform_indices = @transform_0, window_bounds = array<i64: 1, 16, 16, 4>}, {pipeline_mode = #tpu.pipeline_mode<synchronous>, transform_indices = @transform_1, window_bounds = array<i64: 9, 4, 4>}, {pipeline_mode = #tpu.pipeline_mode<synchronous>, transform_indices = @transform_2, window_bounds = array<i64: 1, 4>}, {transform_indices = @transform_3, window_bounds = array<i64: 1, 16, 16, 4>}, {pipeline_mode = #tpu.pipeline_mode<synchronous>, transform_indices = @transform_4, window_bounds = array<i64: 1, 4>}, {pipeline_mode = #tpu.pipeline_mode<synchronous>, transform_indices = @transform_5, window_bounds = array<i64: 1, 4>}]} {
    %c0_i32 = arith.constant 0 : i32
    %0 = arith.cmpi eq, %arg0, %c0_i32 : i32
    %1 = arith.extui %0 : i1 to i32
    %c0_i32_0 = arith.constant 0 : i32
    %2 = arith.cmpi ne, %1, %c0_i32_0 : i32
    scf.if %2 {
      %cst_79 = arith.constant 0.000000e+00 : f32
      %80 = vector.broadcast %cst_79 : f32 to vector<18x18x4xf32>
      %c0_80 = arith.constant 0 : index
      %c0_81 = arith.constant 0 : index
      %c0_82 = arith.constant 0 : index
      %81 = vector.load %arg7[%c0_80, %c0_81, %c0_82] : memref<18x18x4xf32, #tpu.memory_space<vmem>>, vector<18x18x4xf32>
      tpu.vector_store %arg7[%c0_80, %c0_81, %c0_82], %80 {strides = array<i32>} : memref<18x18x4xf32, #tpu.memory_space<vmem>>, vector<18x18x4xf32>,
    } else {
    }
    %c0 = arith.constant 0 : index
    %c0_1 = arith.constant 0 : index
    %c0_2 = arith.constant 0 : index
    %c0_3 = arith.constant 0 : index
    %3 = vector.load %arg1[%c0, %c0_1, %c0_2, %c0_3] : memref<1x16x16x4xf32, #tpu.memory_space<vmem>>, vector<1x16x16x4xf32>
    %4 = vector.shape_cast %3 : vector<1x16x16x4xf32> to vector<16x16x4xf32>
    %c1 = arith.constant 1 : index
    %c1_4 = arith.constant 1 : index
    %c0_5 = arith.constant 0 : index
    %5 = vector.load %arg7[%c1, %c1_4, %c0_5] : memref<18x18x4xf32, #tpu.memory_space<vmem>>, vector<16x16x4xf32>
    tpu.vector_store %arg7[%c1, %c1_4, %c0_5], %4 {strides = array<i32>} : memref<18x18x4xf32, #tpu.memory_space<vmem>>, vector<16x16x4xf32>,
    %c0_6 = arith.constant 0 : index
    %c0_7 = arith.constant 0 : index
    %c0_8 = arith.constant 0 : index
    %6 = vector.load %arg7[%c0_6, %c0_7, %c0_8] : memref<18x18x4xf32, #tpu.memory_space<vmem>>, vector<16x16x4xf32>
    %7 = vector.shape_cast %6 : vector<16x16x4xf32> to vector<256x4xf32>
    %c0_9 = arith.constant 0 : index
    %c0_10 = arith.constant 0 : index
    %c0_11 = arith.constant 0 : index
    %8 = vector.load %arg2[%c0_9, %c0_10, %c0_11] : memref<9x4x4xf32, #tpu.memory_space<vmem>>, vector<1x4x4xf32>
    %9 = vector.shape_cast %8 : vector<1x4x4xf32> to vector<4x4xf32>
    %cst = arith.constant dense<0.000000e+00> : vector<256x4xf32>
    %10 = tpu.matmul %7, %9, %cst {dimension_numbers = #tpu.dot_dimension_numbers<[1], [0], [0], [1], [0, 0, 1, 1], [], []>} : vector<256x4xf32>, vector<4x4xf32>, vector<256x4xf32> -> vector<256x4xf32>
    %c0_12 = arith.constant 0 : index
    %c1_13 = arith.constant 1 : index
    %c0_14 = arith.constant 0 : index
    %11 = vector.load %arg7[%c0_12, %c1_13, %c0_14] : memref<18x18x4xf32, #tpu.memory_space<vmem>>, vector<16x16x4xf32>
    %12 = vector.shape_cast %11 : vector<16x16x4xf32> to vector<256x4xf32>
    %c1_15 = arith.constant 1 : index
    %c0_16 = arith.constant 0 : index
    %c0_17 = arith.constant 0 : index
    %13 = vector.load %arg2[%c1_15, %c0_16, %c0_17] : memref<9x4x4xf32, #tpu.memory_space<vmem>>, vector<1x4x4xf32>
    %14 = vector.shape_cast %13 : vector<1x4x4xf32> to vector<4x4xf32>
    %cst_18 = arith.constant dense<0.000000e+00> : vector<256x4xf32>
    %15 = tpu.matmul %12, %14, %cst_18 {dimension_numbers = #tpu.dot_dimension_numbers<[1], [0], [0], [1], [0, 0, 1, 1], [], []>} : vector<256x4xf32>, vector<4x4xf32>, vector<256x4xf32> -> vector<256x4xf32>
    %16 = arith.addf %10, %15 : vector<256x4xf32>
    %c0_19 = arith.constant 0 : index
    %c2 = arith.constant 2 : index
    %c0_20 = arith.constant 0 : index
    %17 = vector.load %arg7[%c0_19, %c2, %c0_20] : memref<18x18x4xf32, #tpu.memory_space<vmem>>, vector<16x16x4xf32>
    %18 = vector.shape_cast %17 : vector<16x16x4xf32> to vector<256x4xf32>
    %c2_21 = arith.constant 2 : index
    %c0_22 = arith.constant 0 : index
    %c0_23 = arith.constant 0 : index
    %19 = vector.load %arg2[%c2_21, %c0_22, %c0_23] : memref<9x4x4xf32, #tpu.memory_space<vmem>>, vector<1x4x4xf32>
    %20 = vector.shape_cast %19 : vector<1x4x4xf32> to vector<4x4xf32>
    %cst_24 = arith.constant dense<0.000000e+00> : vector<256x4xf32>
    %21 = tpu.matmul %18, %20, %cst_24 {dimension_numbers = #tpu.dot_dimension_numbers<[1], [0], [0], [1], [0, 0, 1, 1], [], []>} : vector<256x4xf32>, vector<4x4xf32>, vector<256x4xf32> -> vector<256x4xf32>
    %22 = arith.addf %16, %21 : vector<256x4xf32>
    %c1_25 = arith.constant 1 : index
    %c0_26 = arith.constant 0 : index
    %c0_27 = arith.constant 0 : index
    %23 = vector.load %arg7[%c1_25, %c0_26, %c0_27] : memref<18x18x4xf32, #tpu.memory_space<vmem>>, vector<16x16x4xf32>
    %24 = vector.shape_cast %23 : vector<16x16x4xf32> to vector<256x4xf32>
    %c3 = arith.constant 3 : index
    %c0_28 = arith.constant 0 : index
    %c0_29 = arith.constant 0 : index
    %25 = vector.load %arg2[%c3, %c0_28, %c0_29] : memref<9x4x4xf32, #tpu.memory_space<vmem>>, vector<1x4x4xf32>
    %26 = vector.shape_cast %25 : vector<1x4x4xf32> to vector<4x4xf32>
    %cst_30 = arith.constant dense<0.000000e+00> : vector<256x4xf32>
    %27 = tpu.matmul %24, %26, %cst_30 {dimension_numbers = #tpu.dot_dimension_numbers<[1], [0], [0], [1], [0, 0, 1, 1], [], []>} : vector<256x4xf32>, vector<4x4xf32>, vector<256x4xf32> -> vector<256x4xf32>
    %28 = arith.addf %22, %27 : vector<256x4xf32>
    %c1_31 = arith.constant 1 : index
    %c1_32 = arith.constant 1 : index
    %c0_33 = arith.constant 0 : index
    %29 = vector.load %arg7[%c1_31, %c1_32, %c0_33] : memref<18x18x4xf32, #tpu.memory_space<vmem>>, vector<16x16x4xf32>
    %30 = vector.shape_cast %29 : vector<16x16x4xf32> to vector<256x4xf32>
    %c4 = arith.constant 4 : index
    %c0_34 = arith.constant 0 : index
    %c0_35 = arith.constant 0 : index
    %31 = vector.load %arg2[%c4, %c0_34, %c0_35] : memref<9x4x4xf32, #tpu.memory_space<vmem>>, vector<1x4x4xf32>
    %32 = vector.shape_cast %31 : vector<1x4x4xf32> to vector<4x4xf32>
    %cst_36 = arith.constant dense<0.000000e+00> : vector<256x4xf32>
    %33 = tpu.matmul %30, %32, %cst_36 {dimension_numbers = #tpu.dot_dimension_numbers<[1], [0], [0], [1], [0, 0, 1, 1], [], []>} : vector<256x4xf32>, vector<4x4xf32>, vector<256x4xf32> -> vector<256x4xf32>
    %34 = arith.addf %28, %33 : vector<256x4xf32>
    %c1_37 = arith.constant 1 : index
    %c2_38 = arith.constant 2 : index
    %c0_39 = arith.constant 0 : index
    %35 = vector.load %arg7[%c1_37, %c2_38, %c0_39] : memref<18x18x4xf32, #tpu.memory_space<vmem>>, vector<16x16x4xf32>
    %36 = vector.shape_cast %35 : vector<16x16x4xf32> to vector<256x4xf32>
    %c5 = arith.constant 5 : index
    %c0_40 = arith.constant 0 : index
    %c0_41 = arith.constant 0 : index
    %37 = vector.load %arg2[%c5, %c0_40, %c0_41] : memref<9x4x4xf32, #tpu.memory_space<vmem>>, vector<1x4x4xf32>
    %38 = vector.shape_cast %37 : vector<1x4x4xf32> to vector<4x4xf32>
    %cst_42 = arith.constant dense<0.000000e+00> : vector<256x4xf32>
    %39 = tpu.matmul %36, %38, %cst_42 {dimension_numbers = #tpu.dot_dimension_numbers<[1], [0], [0], [1], [0, 0, 1, 1], [], []>} : vector<256x4xf32>, vector<4x4xf32>, vector<256x4xf32> -> vector<256x4xf32>
    %40 = arith.addf %34, %39 : vector<256x4xf32>
    %c2_43 = arith.constant 2 : index
    %c0_44 = arith.constant 0 : index
    %c0_45 = arith.constant 0 : index
    %41 = vector.load %arg7[%c2_43, %c0_44, %c0_45] : memref<18x18x4xf32, #tpu.memory_space<vmem>>, vector<16x16x4xf32>
    %42 = vector.shape_cast %41 : vector<16x16x4xf32> to vector<256x4xf32>
    %c6 = arith.constant 6 : index
    %c0_46 = arith.constant 0 : index
    %c0_47 = arith.constant 0 : index
    %43 = vector.load %arg2[%c6, %c0_46, %c0_47] : memref<9x4x4xf32, #tpu.memory_space<vmem>>, vector<1x4x4xf32>
    %44 = vector.shape_cast %43 : vector<1x4x4xf32> to vector<4x4xf32>
    %cst_48 = arith.constant dense<0.000000e+00> : vector<256x4xf32>
    %45 = tpu.matmul %42, %44, %cst_48 {dimension_numbers = #tpu.dot_dimension_numbers<[1], [0], [0], [1], [0, 0, 1, 1], [], []>} : vector<256x4xf32>, vector<4x4xf32>, vector<256x4xf32> -> vector<256x4xf32>
    %46 = arith.addf %40, %45 : vector<256x4xf32>
    %c2_49 = arith.constant 2 : index
    %c1_50 = arith.constant 1 : index
    %c0_51 = arith.constant 0 : index
    %47 = vector.load %arg7[%c2_49, %c1_50, %c0_51] : memref<18x18x4xf32, #tpu.memory_space<vmem>>, vector<16x16x4xf32>
    %48 = vector.shape_cast %47 : vector<16x16x4xf32> to vector<256x4xf32>
    %c7 = arith.constant 7 : index
    %c0_52 = arith.constant 0 : index
    %c0_53 = arith.constant 0 : index
    %49 = vector.load %arg2[%c7, %c0_52, %c0_53] : memref<9x4x4xf32, #tpu.memory_space<vmem>>, vector<1x4x4xf32>
    %50 = vector.shape_cast %49 : vector<1x4x4xf32> to vector<4x4xf32>
    %cst_54 = arith.constant dense<0.000000e+00> : vector<256x4xf32>
    %51 = tpu.matmul %48, %50, %cst_54 {dimension_numbers = #tpu.dot_dimension_numbers<[1], [0], [0], [1], [0, 0, 1, 1], [], []>} : vector<256x4xf32>, vector<4x4xf32>, vector<256x4xf32> -> vector<256x4xf32>
    %52 = arith.addf %46, %51 : vector<256x4xf32>
    %c2_55 = arith.constant 2 : index
    %c2_56 = arith.constant 2 : index
    %c0_57 = arith.constant 0 : index
    %53 = vector.load %arg7[%c2_55, %c2_56, %c0_57] : memref<18x18x4xf32, #tpu.memory_space<vmem>>, vector<16x16x4xf32>
    %54 = vector.shape_cast %53 : vector<16x16x4xf32> to vector<256x4xf32>
    %c8 = arith.constant 8 : index
    %c0_58 = arith.constant 0 : index
    %c0_59 = arith.constant 0 : index
    %55 = vector.load %arg2[%c8, %c0_58, %c0_59] : memref<9x4x4xf32, #tpu.memory_space<vmem>>, vector<1x4x4xf32>
    %56 = vector.shape_cast %55 : vector<1x4x4xf32> to vector<4x4xf32>
    %cst_60 = arith.constant dense<0.000000e+00> : vector<256x4xf32>
    %57 = tpu.matmul %54, %56, %cst_60 {dimension_numbers = #tpu.dot_dimension_numbers<[1], [0], [0], [1], [0, 0, 1, 1], [], []>} : vector<256x4xf32>, vector<4x4xf32>, vector<256x4xf32> -> vector<256x4xf32>
    %58 = arith.addf %52, %57 : vector<256x4xf32>
    %c0_61 = arith.constant 0 : index
    %c0_62 = arith.constant 0 : index
    %59 = vector.load %arg3[%c0_61, %c0_62] : memref<1x4xf32, #tpu.memory_space<vmem>>, vector<1x4xf32>
    %60 = vector.broadcast %59 : vector<1x4xf32> to vector<256x4xf32>
    %61 = arith.addf %58, %60 : vector<256x4xf32>
    %62 = vector.shape_cast %61 : vector<256x4xf32> to vector<16x16x4xf32>
    %c0_63 = arith.constant 0 : index
    %c0_64 = arith.constant 0 : index
    %c0_65 = arith.constant 0 : index
    %c0_66 = arith.constant 0 : index
    %63 = vector.load %arg4[%c0_63, %c0_64, %c0_65, %c0_66] : memref<1x16x16x4xf32, #tpu.memory_space<vmem>>, vector<1x16x16x4xf32>
    %64 = vector.shape_cast %63 : vector<1x16x16x4xf32> to vector<16x16x4xf32>
    %65 = vector.shape_cast %62 : vector<16x16x4xf32> to vector<1x16x16x4xf32>
    tpu.vector_store %arg4[%c0_63, %c0_64, %c0_65, %c0_66], %65 {strides = array<i32>} : memref<1x16x16x4xf32, #tpu.memory_space<vmem>>, vector<1x16x16x4xf32>,
    %c0_i32_67 = arith.constant 0 : i32
    %66 = arith.cmpi eq, %arg0, %c0_i32_67 : i32
    %67 = arith.extui %66 : i1 to i32
    %c0_i32_68 = arith.constant 0 : i32
    %68 = arith.cmpi ne, %67, %c0_i32_68 : i32
    scf.if %68 {
      %cst_79 = arith.constant 0.000000e+00 : f32
      %80 = vector.broadcast %cst_79 : f32 to vector<1x4xf32>
      %c0_80 = arith.constant 0 : index
      %c0_81 = arith.constant 0 : index
      %81 = vector.load %arg5[%c0_80, %c0_81] : memref<1x4xf32, #tpu.memory_space<vmem>>, vector<1x4xf32>
      tpu.vector_store %arg5[%c0_80, %c0_81], %80 {strides = array<i32>} : memref<1x4xf32, #tpu.memory_space<vmem>>, vector<1x4xf32>,
      %cst_82 = arith.constant 0.000000e+00 : f32
      %82 = vector.broadcast %cst_82 : f32 to vector<1x4xf32>
      %c0_83 = arith.constant 0 : index
      %c0_84 = arith.constant 0 : index
      %83 = vector.load %arg6[%c0_83, %c0_84] : memref<1x4xf32, #tpu.memory_space<vmem>>, vector<1x4xf32>
      tpu.vector_store %arg6[%c0_83, %c0_84], %82 {strides = array<i32>} : memref<1x4xf32, #tpu.memory_space<vmem>>, vector<1x4xf32>,
    } else {
    }
    %c0_69 = arith.constant 0 : index
    %c0_70 = arith.constant 0 : index
    %69 = vector.load %arg5[%c0_69, %c0_70] : memref<1x4xf32, #tpu.memory_space<vmem>>, vector<1x4xf32>
    %cst_71 = arith.constant dense<0.000000e+00> : vector<4xf32>
    %70 = vector.multi_reduction <add>, %61, %cst_71 [0] : vector<256x4xf32> to vector<4xf32>
    %71 = vector.shape_cast %70 : vector<4xf32> to vector<1x4xf32>
    %72 = arith.addf %69, %71 : vector<1x4xf32>
    %c0_72 = arith.constant 0 : index
    %c0_73 = arith.constant 0 : index
    %73 = vector.load %arg5[%c0_72, %c0_73] : memref<1x4xf32, #tpu.memory_space<vmem>>, vector<1x4xf32>
    tpu.vector_store %arg5[%c0_72, %c0_73], %72 {strides = array<i32>} : memref<1x4xf32, #tpu.memory_space<vmem>>, vector<1x4xf32>,
    %c0_74 = arith.constant 0 : index
    %c0_75 = arith.constant 0 : index
    %74 = vector.load %arg6[%c0_74, %c0_75] : memref<1x4xf32, #tpu.memory_space<vmem>>, vector<1x4xf32>
    %75 = arith.mulf %61, %61 : vector<256x4xf32>
    %cst_76 = arith.constant dense<0.000000e+00> : vector<4xf32>
    %76 = vector.multi_reduction <add>, %75, %cst_76 [0] : vector<256x4xf32> to vector<4xf32>
    %77 = vector.shape_cast %76 : vector<4xf32> to vector<1x4xf32>
    %78 = arith.addf %74, %77 : vector<1x4xf32>
    %c0_77 = arith.constant 0 : index
    %c0_78 = arith.constant 0 : index
    %79 = vector.load %arg6[%c0_77, %c0_78] : memref<1x4xf32, #tpu.memory_space<vmem>>, vector<1x4xf32>
    tpu.vector_store %arg6[%c0_77, %c0_78], %78 {strides = array<i32>} : memref<1x4xf32, #tpu.memory_space<vmem>>, vector<1x4xf32>,
    return
  }
  func.func @transform_0(%arg0: i32) -> (i32, i32, i32, i32) {
    %c0_i32 = arith.constant 0 : i32
    %c0_i32_0 = arith.constant 0 : i32
    %c0_i32_1 = arith.constant 0 : i32
    %c0_i32_2 = arith.constant 0 : i32
    return %arg0, %c0_i32, %c0_i32_0, %c0_i32_1 : i32, i32, i32, i32
  }
  func.func @transform_1(%arg0: i32) -> (i32, i32, i32) {
    %c0_i32 = arith.constant 0 : i32
    %c0_i32_0 = arith.constant 0 : i32
    %c0_i32_1 = arith.constant 0 : i32
    %c0_i32_2 = arith.constant 0 : i32
    return %c0_i32, %c0_i32_0, %c0_i32_1 : i32, i32, i32
  }
  func.func @transform_2(%arg0: i32) -> (i32, i32) {
    %c0_i32 = arith.constant 0 : i32
    %c0_i32_0 = arith.constant 0 : i32
    %c0_i32_1 = arith.constant 0 : i32
    return %c0_i32, %c0_i32_0 : i32, i32
  }
  func.func @transform_3(%arg0: i32) -> (i32, i32, i32, i32) {
    %c0_i32 = arith.constant 0 : i32
    %c0_i32_0 = arith.constant 0 : i32
    %c0_i32_1 = arith.constant 0 : i32
    %c0_i32_2 = arith.constant 0 : i32
    return %arg0, %c0_i32, %c0_i32_0, %c0_i32_1 : i32, i32, i32, i32
  }
  func.func @transform_4(%arg0: i32) -> (i32, i32) {
    %c0_i32 = arith.constant 0 : i32
    %c0_i32_0 = arith.constant 0 : i32
    %c0_i32_1 = arith.constant 0 : i32
    return %c0_i32, %c0_i32_0 : i32, i32
  }
  func.func @transform_5(%arg0: i32) -> (i32, i32) {
    %c0_i32 = arith.constant 0 : i32
    %c0_i32_0 = arith.constant 0 : i32
    %c0_i32_1 = arith.constant 0 : i32
    return %c0_i32, %c0_i32_0 : i32, i32
  }
}

</mosaic_0001>

<bundles_post_ra>
// kernel: tpu_custom_call.1
= control target key start
LH: loop header
LB: loop body
LE: loop exit
PB: predicated region body
PF: predicated region fallthrough
CT: control target
= control target key end

     0   :  { %11 = vsyncpa [#allocation4], 0  ;;  %s7138_s0 = inlined_call_operand.vmem [shape: f32[2,16,16,4], index: 0, kind: input, shape index: {}]   ;;  %s7139_s1 = inlined_call_operand.vmem [shape: f32[9,4,4], index: 1, kind: input, shape index: {}]   ;;  %s7140_s2 = inlined_call_operand.vmem [shape: f32[1,4], index: 2, kind: input, shape index: {}]   ;;  %s7141_s3 = inlined_call_operand.vmem [shape: f32[2,16,16,4], index: 3, kind: output, shape index: {0}]   ;;  %s7142_s4 = inlined_call_operand.hbm [shape: f32[1,4], index: 4, kind: output, shape index: {1}]   ;;  %s7143_s5 = inlined_call_operand.hbm [shape: f32[1,4], index: 5, kind: output, shape index: {2}]  }
   0x1   :  { %12 = vsyncpa [#allocation6], 0  ;;  %s5346_s18 = smov 0  }
   0x2 LB: > { %s5352_s19 = sadd.s32 4294967295, %s5310_s18   ;;  %p4154_p0 = scmp.ge.s32.totalorder %s5310_s18, 1  ;;  %s5310_s18 = sphi %s5346_s18, %s18_s18  }
   0x3   : > { %p184_p1 = scmp.lt.s32.totalorder %s5310_s18, 3 }
   0x5   : > { %p185_p2 = pnand %p4154_p0, %p184_p1 }
   0x7   : > { %188 = sbr.rel (%p185_p2) target bundleno = 651 (0x28b), region = 32 }
   0xc   : > { %p212_p3 = scmp.lt.s32.totalorder %s5352_s19, 1  ;;  %p4159_p4 = scmp.ne.s32.totalorder %s5352_s19, 0 }
   0xe   : > { %s213_s20 = scalar_select %p212_p3, %s5352_s19, 1 }
   0xf   : > { %225 = sbr.rel (%p4159_p4) target bundleno = 48 (0x30), region = 36 }
  0x10   : > { %s4473_s21 = sshll.u32 %s213_s20, 8 }
  0x11   : > { %s5361_s24 = scalar_lea.vmem %s7138_s0, %s4473_s21  ;;  %s5366_s27 = scalar_lea.vmem %s7141_s3, %s4473_s21 }
  0x14   : > { %vm226_vm0 = vcmask 31744   ;;  %vm229_vm1 = vcmask 25600   ;;  %v5312_v0 = vmov 0.0  }
  0x15   : > { %227 = vst.msk [vmem:[#allocation2] sm:$0xff] %vm226_vm0, %v5312_v0  ;;  %228 = vst.msk [vmem:[#allocation2 + $0x8] sm:$0xff] %vm226_vm0, %v5312_v0 }
  0x16   : > { %231 = vst.msk [vmem:[#allocation2 + $0x18] sm:$0xff] %vm226_vm0, %v5312_v0  ;;  %232 = vst.msk [vmem:[#allocation2 + $0x20] sm:$0xff] %vm226_vm0, %v5312_v0 }
  0x17   : > { %234 = vst.msk [vmem:[#allocation2 + $0x30] sm:$0xff] %vm226_vm0, %v5312_v0  ;;  %235 = vst.msk [vmem:[#allocation2 + $0x38] sm:$0xff] %vm226_vm0, %v5312_v0 }
  0x18   : > { %237 = vst.msk [vmem:[#allocation2 + $0x48] sm:$0xff] %vm226_vm0, %v5312_v0  ;;  %238 = vst.msk [vmem:[#allocation2 + $0x50] sm:$0xff] %vm226_vm0, %v5312_v0 }
  0x19   : > { %240 = vst.msk [vmem:[#allocation2 + $0x60] sm:$0xff] %vm226_vm0, %v5312_v0  ;;  %241 = vst.msk [vmem:[#allocation2 + $0x68] sm:$0xff] %vm226_vm0, %v5312_v0 }
  0x1a   : > { %243 = vst.msk [vmem:[#allocation2 + $0x78] sm:$0xff] %vm226_vm0, %v5312_v0  ;;  %244 = vst.msk [vmem:[#allocation2 + $0x80] sm:$0xff] %vm226_vm0, %v5312_v0 }
  0x1b   : > { %246 = vst.msk [vmem:[#allocation2 + $0x90] sm:$0xff] %vm226_vm0, %v5312_v0  ;;  %247 = vst.msk [vmem:[#allocation2 + $0x98] sm:$0xff] %vm226_vm0, %v5312_v0 }
  0x1c   : > { %249 = vst.msk [vmem:[#allocation2 + $0xa8] sm:$0xff] %vm226_vm0, %v5312_v0  ;;  %250 = vst.msk [vmem:[#allocation2 + $0xb0] sm:$0xff] %vm226_vm0, %v5312_v0 }
  0x1d   : > { %252 = vst.msk [vmem:[#allocation2 + $0xc0] sm:$0xff] %vm226_vm0, %v5312_v0  ;;  %253 = vst.msk [vmem:[#allocation2 + $0xc8] sm:$0xff] %vm226_vm0, %v5312_v0 }
  0x1e   : > { %255 = vst.msk [vmem:[#allocation2 + $0xd8] sm:$0xff] %vm226_vm0, %v5312_v0  ;;  %256 = vst.msk [vmem:[#allocation2 + $0xe0] sm:$0xff] %vm226_vm0, %v5312_v0 }
  0x1f   : > { %258 = vst.msk [vmem:[#allocation2 + $0xf0] sm:$0xff] %vm226_vm0, %v5312_v0  ;;  %259 = vst.msk [vmem:[#allocation2 + $0xf8] sm:$0xff] %vm226_vm0, %v5312_v0 }
  0x20   : > { %261 = vst.msk [vmem:[#allocation2 + $0x108] sm:$0xff] %vm226_vm0, %v5312_v0  ;;  %262 = vst.msk [vmem:[#allocation2 + $0x110] sm:$0xff] %vm226_vm0, %v5312_v0 }
  0x21   : > { %264 = vst.msk [vmem:[#allocation2 + $0x120] sm:$0xff] %vm226_vm0, %v5312_v0  ;;  %265 = vst.msk [vmem:[#allocation2 + $0x128] sm:$0xff] %vm226_vm0, %v5312_v0 }
  0x22   : > { %267 = vst.msk [vmem:[#allocation2 + $0x138] sm:$0xff] %vm226_vm0, %v5312_v0  ;;  %268 = vst.msk [vmem:[#allocation2 + $0x140] sm:$0xff] %vm226_vm0, %v5312_v0 }
  0x23   : > { %270 = vst.msk [vmem:[#allocation2 + $0x150] sm:$0xff] %vm226_vm0, %v5312_v0  ;;  %271 = vst.msk [vmem:[#allocation2 + $0x158] sm:$0xff] %vm226_vm0, %v5312_v0 }
  0x24   : > { %273 = vst.msk [vmem:[#allocation2 + $0x168] sm:$0xff] %vm226_vm0, %v5312_v0  ;;  %274 = vst.msk [vmem:[#allocation2 + $0x170] sm:$0xff] %vm226_vm0, %v5312_v0 }
  0x25   : > { %276 = vst.msk [vmem:[#allocation2 + $0x180] sm:$0xff] %vm226_vm0, %v5312_v0  ;;  %277 = vst.msk [vmem:[#allocation2 + $0x188] sm:$0xff] %vm226_vm0, %v5312_v0 }
  0x26   : > { %279 = vst.msk [vmem:[#allocation2 + $0x198] sm:$0xff] %vm226_vm0, %v5312_v0  ;;  %280 = vst.msk [vmem:[#allocation2 + $0x1a0] sm:$0xff] %vm226_vm0, %v5312_v0 }
  0x27   : > { %230 = vst.msk [vmem:[#allocation2 + $0x10] sm:$0x3] %vm229_vm1, %v5312_v0  ;;  %233 = vst.msk [vmem:[#allocation2 + $0x28] sm:$0x3] %vm229_vm1, %v5312_v0 }
  0x28   : > { %236 = vst.msk [vmem:[#allocation2 + $0x40] sm:$0x3] %vm229_vm1, %v5312_v0  ;;  %239 = vst.msk [vmem:[#allocation2 + $0x58] sm:$0x3] %vm229_vm1, %v5312_v0 }
  0x29   : > { %242 = vst.msk [vmem:[#allocation2 + $0x70] sm:$0x3] %vm229_vm1, %v5312_v0  ;;  %245 = vst.msk [vmem:[#allocation2 + $0x88] sm:$0x3] %vm229_vm1, %v5312_v0 }
  0x2a   : > { %248 = vst.msk [vmem:[#allocation2 + $0xa0] sm:$0x3] %vm229_vm1, %v5312_v0  ;;  %251 = vst.msk [vmem:[#allocation2 + $0xb8] sm:$0x3] %vm229_vm1, %v5312_v0 }
  0x2b   : > { %254 = vst.msk [vmem:[#allocation2 + $0xd0] sm:$0x3] %vm229_vm1, %v5312_v0  ;;  %257 = vst.msk [vmem:[#allocation2 + $0xe8] sm:$0x3] %vm229_vm1, %v5312_v0 }
  0x2c   : > { %260 = vst.msk [vmem:[#allocation2 + $0x100] sm:$0x3] %vm229_vm1, %v5312_v0  ;;  %263 = vst.msk [vmem:[#allocation2 + $0x118] sm:$0x3] %vm229_vm1, %v5312_v0 }
  0x2d   : > { %266 = vst.msk [vmem:[#allocation2 + $0x130] sm:$0x3] %vm229_vm1, %v5312_v0  ;;  %269 = vst.msk [vmem:[#allocation2 + $0x148] sm:$0x3] %vm229_vm1, %v5312_v0 }
  0x2e   : > { %272 = vst.msk [vmem:[#allocation2 + $0x160] sm:$0x3] %vm229_vm1, %v5312_v0  ;;  %275 = vst.msk [vmem:[#allocation2 + $0x178] sm:$0x3] %vm229_vm1, %v5312_v0 }
  0x2f   : > { %278 = vst.msk [vmem:[#allocation2 + $0x190] sm:$0x3] %vm229_vm1, %v5312_v0  ;;  %281 = vst.msk [vmem:[#allocation2 + $0x1a8] sm:$0x3] %vm229_vm1, %v5312_v0 }
  0x30 PF: > { %v4160_v1 = vld [vmem:[%s7139_s1 + $0x4] sm:$0xf]  ;;  %vm511_vm2 = vcmask 1043456   ;;  %vm315_vm3 = vcmask 31744   ;;  %v296_v3 = vld [vmem:[%s5361_s24 + $0x70] sm:$0xff]  ;;  %v297_v6 = vld [vmem:[%s5361_s24 + $0x78] sm:$0xff] }
  0x31   : > { %v381_v2 = vld [vmem:[#allocation2 + $0x1] sm:$0xff]  ;;  %5222 = vmatprep.subr.msk.mxu1 %vm511_vm2, %v4160_v1  ;;  %4772 = vmatprep.subr.msk.mxu0 %vm511_vm2, %v4160_v1  ;;  %330 = vst.msk [vmem:[#allocation2 + $0xc1] sm:$0xff] %vm315_vm3, %v296_v3  ;;  %v382_v5 = vld [vmem:[#allocation2 + $0x9] sm:$0xff]  ;;  %331 = vst.msk [vmem:[#allocation2 + $0xc9] sm:$0xff] %vm315_vm3, %v297_v6 }
  0x32   : > { %v380_v4 = vld [vmem:[%s7139_s1] sm:$0xf]  ;;  %5223 = vmatpush3.msk.msra.mxu1 %vm511_vm2, %v4160_v1  ;;  %4773 = vmatpush3.msk.msra.mxu0 %vm511_vm2, %v4160_v1  ;;  %v4227_v7 = vld [vmem:[%s7139_s1 + $0x8] sm:$0xf]  ;;  %v284_v12 = vld [vmem:[%s5361_s24 + $0x10] sm:$0xff] }
  0x33   : > { %v282_v8 = vld [vmem:[%s5361_s24] sm:$0xff]  ;;  %4774 = vmatprep.mubr.msk.f32.mxu0 %vm315_vm3, %v381_v2  ;;  %4822 = vmatprep.subr.msk.mxu1 %vm511_vm2, %v380_v4  ;;  %v283_v10 = vld [vmem:[%s5361_s24 + $0x8] sm:$0xff]  ;;  %318 = vst.msk [vmem:[#allocation2 + $0x31] sm:$0xff] %vm315_vm3, %v284_v12  ;;  %v300_v13 = vld [vmem:[%s5361_s24 + $0x90] sm:$0xff] }
  0x34   : > { %v298_v9 = vld [vmem:[%s5361_s24 + $0x80] sm:$0xff]  ;;  %316 = vst.msk [vmem:[#allocation2 + $0x19] sm:$0xff] %vm315_vm3, %v282_v8  ;;  %v299_v11 = vld [vmem:[%s5361_s24 + $0x88] sm:$0xff]  ;;  %4775 = vmatmul.mubr.msk.f32.vlgmr.msra.gmra.mxu0 %vm315_vm3, %v382_v5  ;;  %4872 = vmatprep.subr.msk.mxu0 %vm511_vm2, %v4227_v7  ;;  %317 = vst.msk [vmem:[#allocation2 + $0x21] sm:$0xff] %vm315_vm3, %v283_v10 }
  0x35   : > { %332 = vst.msk [vmem:[#allocation2 + $0xd9] sm:$0xff] %vm315_vm3, %v298_v9  ;;  %333 = vst.msk [vmem:[#allocation2 + $0xe1] sm:$0xff] %vm315_vm3, %v299_v11  ;;  %v285_v14 = vld [vmem:[%s5361_s24 + $0x18] sm:$0xff]  ;;  %4873 = vmatpush3.msk.msra.mxu0 %vm511_vm2, %v4227_v7  ;;  %v286_v16 = vld [vmem:[%s5361_s24 + $0x20] sm:$0xff] }
  0x36   : > { %v301_v15 = vld [vmem:[%s5361_s24 + $0x98] sm:$0xff]  ;;  %334 = vst.msk [vmem:[#allocation2 + $0xf1] sm:$0xff] %vm315_vm3, %v300_v13  ;;  %319 = vst.msk [vmem:[#allocation2 + $0x39] sm:$0xff] %vm315_vm3, %v285_v14  ;;  %v302_v17 = vld [vmem:[%s5361_s24 + $0xa0] sm:$0xff] }
  0x37   : > { %335 = vst.msk [vmem:[#allocation2 + $0xf9] sm:$0xff] %vm315_vm3, %v301_v15  ;;  %v287_v18 = vld [vmem:[%s5361_s24 + $0x28] sm:$0xff]  ;;  %320 = vst.msk [vmem:[#allocation2 + $0x49] sm:$0xff] %vm315_vm3, %v286_v16  ;;  %v288_v20 = vld [vmem:[%s5361_s24 + $0x30] sm:$0xff] }
  0x38   : > { %336 = vst.msk [vmem:[#allocation2 + $0x109] sm:$0xff] %vm315_vm3, %v302_v17  ;;  %321 = vst.msk [vmem:[#allocation2 + $0x51] sm:$0xff] %vm315_vm3, %v287_v18  ;;  %v303_v19 = vld [vmem:[%s5361_s24 + $0xa8] sm:$0xff]  ;;  %v304_v21 = vld [vmem:[%s5361_s24 + $0xb0] sm:$0xff] }
  0x39   : > { %337 = vst.msk [vmem:[#allocation2 + $0x111] sm:$0xff] %vm315_vm3, %v303_v19  ;;  %322 = vst.msk [vmem:[#allocation2 + $0x61] sm:$0xff] %vm315_vm3, %v288_v20  ;;  %v289_v22 = vld [vmem:[%s5361_s24 + $0x38] sm:$0xff]  ;;  %v290_v24 = vld [vmem:[%s5361_s24 + $0x40] sm:$0xff] }
  0x3a   : > { %338 = vst.msk [vmem:[#allocation2 + $0x121] sm:$0xff] %vm315_vm3, %v304_v21  ;;  %v305_v23 = vld [vmem:[%s5361_s24 + $0xb8] sm:$0xff]  ;;  %v5478_v25 = vld [vmem:[#allocation2 + $0xc1] sm:$0xff]  ;;  %323 = vst.msk [vmem:[#allocation2 + $0x69] sm:$0xff] %vm315_vm3, %v289_v22 }
  0x3b   : > { %339 = vst.msk [vmem:[#allocation2 + $0x129] sm:$0xff] %vm315_vm3, %v305_v23  ;;  %324 = vst.msk [vmem:[#allocation2 + $0x79] sm:$0xff] %vm315_vm3, %v290_v24  ;;  %v306_v26 = vld [vmem:[%s5361_s24 + $0xc0] sm:$0xff]  ;;  %v291_v27 = vld [vmem:[%s5361_s24 + $0x48] sm:$0xff]  ;;  %4798 = vmatprep.mubr.msk.f32.mxu1 %vm315_vm3, %v5478_v25 }
  0x3c   : > { %v5487_v28 = vld [vmem:[#allocation2 + $0xc9] sm:$0xff]  ;;  %340 = vst.msk [vmem:[#allocation2 + $0x139] sm:$0xff] %vm315_vm3, %v306_v26  ;;  %325 = vst.msk [vmem:[#allocation2 + $0x81] sm:$0xff] %vm315_vm3, %v291_v27  ;;  %v5495_v31 = vld [vmem:[#allocation2 + $0x19] sm:$0xff] }
  0x3d   : > { %v307_v29 = vld [vmem:[%s5361_s24 + $0xc8] sm:$0xff]  ;;  %v292_v30 = vld [vmem:[%s5361_s24 + $0x50] sm:$0xff]  ;;  %4799 = vmatmul.mubr.msk.f32.vlgmr.msra.gmra.mxu1 %vm315_vm3, %v5487_v28  ;;  %v5497_v32 = vld [vmem:[#allocation2 + $0xd9] sm:$0xff]  ;;  %4777 = vmatprep.mubr.msk.f32.mxu0 %vm315_vm3, %v5495_v31 }
  0x3e   : > { %341 = vst.msk [vmem:[#allocation2 + $0x141] sm:$0xff] %vm315_vm3, %v307_v29  ;;  %326 = vst.msk [vmem:[#allocation2 + $0x91] sm:$0xff] %vm315_vm3, %v292_v30  ;;  %v308_v33 = vld [vmem:[%s5361_s24 + $0xd0] sm:$0xff]  ;;  %4823 = vmatpush3.msk.msra.mxu1 %vm511_vm2, %v380_v4  ;;  %v5505_v34 = vld [vmem:[#allocation2 + $0x21] sm:$0xff]  ;;  %4801 = vmatprep.mubr.msk.f32.mxu1 %vm315_vm3, %v5497_v32 }
  0x3f   : > { %v5507_v35 = vld [vmem:[#allocation2 + $0xe1] sm:$0xff]  ;;  %v5509_v36 = vld [vmem:[#allocation2 + $0x31] sm:$0xff]  ;;  %342 = vst.msk [vmem:[#allocation2 + $0x151] sm:$0xff] %vm315_vm3, %v308_v33  ;;  %4778 = vmatmul.mubr.msk.f32.gmra.mxu0 %vm315_vm3, %v5505_v34  ;;  %v5520_v38 = vld [vmem:[#allocation2 + $0x39] sm:$0xff] }
  0x40   : > { %v5516_v37 = vld [vmem:[#allocation2 + $0xf1] sm:$0xff]  ;;  %4780 = vmatprep.mubr.msk.f32.mxu0 %vm315_vm3, %v5509_v36  ;;  %v5524_v39 = vld [vmem:[#allocation2 + $0x49] sm:$0xff]  ;;  %v5528_v40 = vld [vmem:[#allocation2 + $0xf9] sm:$0xff] }
  0x41   : > { %4802 = vmatmul.mubr.msk.f32.gmra.mxu1 %vm315_vm3, %v5507_v35  ;;  %v5532_v41 = vld [vmem:[#allocation2 + $0x109] sm:$0xff]  ;;  %v293_v42 = vld [vmem:[%s5361_s24 + $0x58] sm:$0xff]  ;;  %v5543_v45 = vld [vmem:[#allocation2 + $0x61] sm:$0xff] }
  0x42   : > { %4804 = vmatprep.mubr.msk.f32.mxu1 %vm315_vm3, %v5516_v37  ;;  %v5537_v43 = vld [vmem:[#allocation2 + $0x51] sm:$0xff]  ;;  %327 = vst.msk [vmem:[#allocation2 + $0x99] sm:$0xff] %vm315_vm3, %v293_v42  ;;  %v294_v46 = vld [vmem:[%s5361_s24 + $0x60] sm:$0xff]  ;;  %v295_v49 = vld [vmem:[%s5361_s24 + $0x68] sm:$0xff] }
  0x43   : > { %4781 = vmatmul.mubr.msk.f32.gmra.mxu0 %vm315_vm3, %v5520_v38  ;;  %v309_v44 = vld [vmem:[%s5361_s24 + $0xd8] sm:$0xff]  ;;  %v310_v47 = vld [vmem:[%s5361_s24 + $0xe0] sm:$0xff]  ;;  %328 = vst.msk [vmem:[#allocation2 + $0xa9] sm:$0xff] %vm315_vm3, %v294_v46  ;;  %v311_v50 = vld [vmem:[%s5361_s24 + $0xe8] sm:$0xff] }
  0x44   : > { %4783 = vmatprep.mubr.msk.f32.mxu0 %vm315_vm3, %v5524_v39  ;;  %343 = vst.msk [vmem:[#allocation2 + $0x159] sm:$0xff] %vm315_vm3, %v309_v44  ;;  %v5550_v48 = vld [vmem:[#allocation2 + $0x111] sm:$0xff]  ;;  %344 = vst.msk [vmem:[#allocation2 + $0x169] sm:$0xff] %vm315_vm3, %v310_v47  ;;  %v5558_v51 = vld [vmem:[#allocation2 + $0x121] sm:$0xff] }
  0x45   : > { %4805 = vmatmul.mubr.msk.f32.gmra.mxu1 %vm315_vm3, %v5528_v40  ;;  %329 = vst.msk [vmem:[#allocation2 + $0xb1] sm:$0xff] %vm315_vm3, %v295_v49  ;;  %345 = vst.msk [vmem:[#allocation2 + $0x171] sm:$0xff] %vm315_vm3, %v311_v50  ;;  %v4261_v52 = vld [vmem:[%s7139_s1 + $0xc] sm:$0xf]  ;;  %v4295_v54 = vld [vmem:[%s7139_s1 + $0x10] sm:$0xf] }
  0x46   : > { %4807 = vmatprep.mubr.msk.f32.mxu1 %vm315_vm3, %v5532_v41  ;;  %v5567_v53 = vld [vmem:[#allocation2 + $0x69] sm:$0xff]  ;;  %4922 = vmatprep.subr.msk.mxu1 %vm511_vm2, %v4261_v52  ;;  %v5575_v55 = vld [vmem:[#allocation2 + $0x79] sm:$0xff]  ;;  %v5588_v58 = vld [vmem:[#allocation2 + $0x81] sm:$0xff] }
  0x47   : > { %4784 = vmatmul.mubr.msk.f32.gmra.mxu0 %vm315_vm3, %v5537_v43  ;;  %4972 = vmatprep.subr.msk.mxu0 %vm511_vm2, %v4295_v54  ;;  %v5580_v56 = vld [vmem:[#allocation2 + $0x129] sm:$0xff]  ;;  %v5584_v57 = vld [vmem:[#allocation2 + $0x139] sm:$0xff]  ;;  %v5592_v59 = vld [vmem:[#allocation2 + $0x91] sm:$0xff] }
  0x48   : > { %4786 = vmatprep.mubr.msk.f32.mxu0 %vm315_vm3, %v5543_v45  ;;  %v5596_v60 = vld [vmem:[#allocation2 + $0x141] sm:$0xff]  ;;  %v5600_v61 = vld [vmem:[#allocation2 + $0x151] sm:$0xff] }
  0x49   : > { %4808 = vmatmul.mubr.msk.f32.gmra.mxu1 %vm315_vm3, %v5550_v48  ;;  %v5604_v62 = vld [vmem:[#allocation2 + $0x99] sm:$0xff]  ;;  %v1064_v3 = vld [vmem:[#allocation2 + $0x2] sm:$0xff]  ;;  %v1065_v6 = vld [vmem:[#allocation2 + $0xa] sm:$0xff] }
  0x4a   : > { %4810 = vmatprep.mubr.msk.f32.mxu1 %vm315_vm3, %v5558_v51  ;;  %v5608_v63 = vld [vmem:[#allocation2 + $0xa9] sm:$0xff]  ;;  %v348_v5 = vld [vmem:[#allocation2] sm:$0xff]  ;;  %v5637_v9 = vld [vmem:[#allocation2 + $0x18] sm:$0xff] }
  0x4b   : > { %4787 = vmatmul.mubr.msk.f32.gmra.mxu0 %vm315_vm3, %v5567_v53  ;;  %v5612_v0 = vld [vmem:[#allocation2 + $0x159] sm:$0xff]  ;;  %v5616_v1 = vld [vmem:[#allocation2 + $0x169] sm:$0xff]  ;;  %v5657_v14 = vld [vmem:[%s7139_s1 + $0x14] sm:$0xf] }
  0x4c   : > { %4789 = vmatprep.mubr.msk.f32.mxu0 %vm315_vm3, %v5575_v55  ;;  %v5620_v2 = vld [vmem:[#allocation2 + $0xb1] sm:$0xff]  ;;  %v5633_v7 = vld [vmem:[#allocation2 + $0x1a] sm:$0xff]  ;;  %v349_v8 = vld [vmem:[#allocation2 + $0x8] sm:$0xff] }
  0x4d   : > { %4811 = vmatmul.mubr.msk.f32.gmra.mxu1 %vm315_vm3, %v5580_v56  ;;  %v5626_v4 = vld [vmem:[#allocation2 + $0x171] sm:$0xff]  ;;  %7202 = vst [vmem:[#allocation10_spill] sm:$0xff] %v5633_v7  ;;  %v5642_v10 = vld [vmem:[#allocation2 + $0x22] sm:$0xff]  ;;  %v5672_v18 = vld [vmem:[#allocation2 + $0x3a] sm:$0xff] }
  0x4e   : > { %4813 = vmatprep.mubr.msk.f32.mxu1 %vm315_vm3, %v5584_v57  ;;  %7201 = vst [vmem:[#allocation9_spill] sm:$0xff] %v5626_v4  ;;  %7203 = vst [vmem:[#allocation11_spill] sm:$0xff] %v5642_v10  ;;  %v5645_v11 = vld [vmem:[#allocation2 + $0x32] sm:$0xff]  ;;  %v5650_v12 = vld [vmem:[#allocation2 + $0x20] sm:$0xff] }
  0x4f   : > { %4790 = vmatmul.mubr.msk.f32.gmra.mxu0 %vm315_vm3, %v5588_v58  ;;  %7204 = vst [vmem:[#allocation12_spill] sm:$0xff] %v5645_v11  ;;  %v5652_v13 = vld [vmem:[#allocation2 + $0x30] sm:$0xff]  ;;  %v5666_v15 = vld [vmem:[%s7139_s1 + $0x18] sm:$0xf]  ;;  %7205 = vst [vmem:[#allocation13_spill] sm:$0xff] %v5672_v18 }
  0x50   : > { %4792 = vmatprep.mubr.msk.f32.mxu0 %vm315_vm3, %v5592_v59  ;;  %v312_v16 = vld [vmem:[%s5361_s24 + $0xf0] sm:$0xff]  ;;  %v313_v17 = vld [vmem:[%s5361_s24 + $0xf8] sm:$0xff]  ;;  %v5688_v21 = vld [vmem:[#allocation2 + $0x48] sm:$0xff] }
  0x51   : > { %4814 = vmatmul.mubr.msk.f32.gmra.mxu1 %vm315_vm3, %v5596_v60  ;;  %346 = vst.msk [vmem:[#allocation2 + $0x181] sm:$0xff] %vm315_vm3, %v312_v16  ;;  %347 = vst.msk [vmem:[#allocation2 + $0x189] sm:$0xff] %vm315_vm3, %v313_v17  ;;  %v5680_v19 = vld [vmem:[#allocation2 + $0x4a] sm:$0xff]  ;;  %v5684_v20 = vld [vmem:[#allocation2 + $0x38] sm:$0xff] }
  0x52   : > { %4816 = vmatprep.mubr.msk.f32.mxu1 %vm315_vm3, %v5600_v61  ;;  %7206 = vst [vmem:[#allocation14_spill] sm:$0xff] %v5680_v19  ;;  %v5692_v22 = vld [vmem:[#allocation2 + $0x52] sm:$0xff]  ;;  %v5696_v23 = vld [vmem:[#allocation2 + $0x62] sm:$0xff]  ;;  %v5708_v27 = vld [vmem:[#allocation2 + $0x6a] sm:$0xff] }
  0x53   : > { %4793 = vmatmul.mubr.msk.f32.gmra.mxu0 %vm315_vm3, %v5604_v62  ;;  %7207 = vst [vmem:[#allocation15_spill] sm:$0xff] %v5692_v22  ;;  %7208 = vst [vmem:[#allocation16_spill] sm:$0xff] %v5696_v23  ;;  %v5700_v24 = vld [vmem:[#allocation2 + $0x50] sm:$0xff]  ;;  %v5704_v26 = vld [vmem:[#allocation2 + $0x60] sm:$0xff] }
  0x54   : > { %4795 = vmatprep.mubr.msk.f32.mxu0 %vm315_vm3, %v5608_v63  ;;  %7209 = vst [vmem:[#allocation17_spill] sm:$0xff] %v5708_v27  ;;  %v5712_v29 = vld [vmem:[#allocation2 + $0x7a] sm:$0xff]  ;;  %v5716_v30 = vld [vmem:[#allocation2 + $0x68] sm:$0xff]  ;;  %v5728_v44 = vld [vmem:[#allocation2 + $0x92] sm:$0xff] }
  0x55   : > { %4817 = vmatmul.mubr.msk.f32.gmra.mxu1 %vm315_vm3, %v5612_v0  ;;  %7210 = vst [vmem:[#allocation18_spill] sm:$0xff] %v5712_v29  ;;  %v5720_v33 = vld [vmem:[#allocation2 + $0x78] sm:$0xff]  ;;  %v5724_v42 = vld [vmem:[#allocation2 + $0x82] sm:$0xff]  ;;  %7212 = vst [vmem:[#allocation20_spill] sm:$0xff] %v5728_v44 }
  0x56   : > { %4819 = vmatprep.mubr.msk.f32.mxu1 %vm315_vm3, %v5616_v1  ;;  %7211 = vst [vmem:[#allocation19_spill] sm:$0xff] %v5724_v42  ;;  %v5732_v46 = vld [vmem:[#allocation2 + $0x80] sm:$0xff]  ;;  %v5736_v47 = vld [vmem:[#allocation2 + $0x90] sm:$0xff] }
  0x57   : > { %4796 = vmatmul.mubr.msk.f32.gmra.mxu0 %vm315_vm3, %v5620_v2  ;;  %v5740_v49 = vld [vmem:[#allocation2 + $0x9a] sm:$0xff]  ;;  %v5744_v50 = vld [vmem:[#allocation2 + $0xaa] sm:$0xff] }
  0x58   : > { %4874 = vmatprep.mubr.msk.f32.mxu0 %vm315_vm3, %v1064_v3  ;;  %7213 = vst [vmem:[#allocation21_spill] sm:$0xff] %v5740_v49  ;;  %7214 = vst [vmem:[#allocation22_spill] sm:$0xff] %v5744_v50  ;;  %v5756_v3 = vld [vmem:[#allocation2 + $0xb2] sm:$0xff]  ;;  %v5772_v16 = vld [vmem:[#allocation2 + $0xca] sm:$0xff] }
  0x59   : > { %4820 = vmatmul.mubr.msk.f32.gmra.mxu1 %vm315_vm3, %v5626_v4  ;;  %7215 = vst [vmem:[#allocation23_spill] sm:$0xff] %v5756_v3  ;;  %7217 = vst [vmem:[#allocation25_spill] sm:$0xff] %v5772_v16  ;;  %v5776_v17 = vld [vmem:[#allocation2 + $0xda] sm:$0xff]  ;;  %v5890_v4 = vld [vmem:[#allocation2 + $0x170] sm:$0xff] }
  0x5a   : > { %4824 = vmatprep.mubr.msk.f32.mxu1 %vm315_vm3, %v348_v5  ;;  %v5760_v5 = vld [vmem:[#allocation2 + $0xc2] sm:$0xff]  ;;  %7218 = vst [vmem:[#allocation26_spill] sm:$0xff] %v5776_v17 }
  0x5b   : > { %4875 = vmatmul.mubr.msk.f32.vlgmr.msra.gmra.mxu0 %vm315_vm3, %v1065_v6  ;;  %7216 = vst [vmem:[#allocation24_spill] sm:$0xff] %v5760_v5  ;;  %v5764_v6 = vld [vmem:[#allocation2 + $0xb0] sm:$0xff] }
  0x5c   : > { %4973 = vmatpush3.msk.msra.mxu0 %vm511_vm2, %v4295_v54  ;;  %4877 = vmatprep.mubr.msk.f32.mxu0 %vm315_vm3, %v5633_v7  ;;  %v5752_v54 = vld [vmem:[#allocation2 + $0xa8] sm:$0xff]  ;;  %v5876_v7 = vld [vmem:[#allocation2 + $0x158] sm:$0xff] }
  0x5d   : > { %4825 = vmatmul.mubr.msk.f32.vlgmr.msra.gmra.mxu1 %vm315_vm3, %v349_v8  ;;  %5072 = vmatprep.subr.msk.mxu0 %vm511_vm2, %v5666_v15  ;;  %v5768_v8 = vld [vmem:[#allocation2 + $0xc0] sm:$0xff] }
  0x5e   : > { %4923 = vmatpush3.msk.msra.mxu1 %vm511_vm2, %v4261_v52  ;;  %4827 = vmatprep.mubr.msk.f32.mxu1 %vm315_vm3, %v5637_v9  ;;  %v5748_v52 = vld [vmem:[#allocation2 + $0x98] sm:$0xff] }
  0x5f   : > { %4878 = vmatmul.mubr.msk.f32.gmra.mxu0 %vm315_vm3, %v5642_v10  ;;  %5022 = vmatprep.subr.msk.mxu1 %vm511_vm2, %v5657_v14  ;;  %v5872_v10 = vld [vmem:[#allocation2 + $0x16a] sm:$0xff] }
  0x60   : > { %4880 = vmatprep.mubr.msk.f32.mxu0 %vm315_vm3, %v5645_v11  ;;  %v5860_v11 = vld [vmem:[#allocation2 + $0x140] sm:$0xff]  ;;  %7229 = vst [vmem:[#allocation37_spill] sm:$0xff] %v5872_v10 }
  0x61   : > { %4828 = vmatmul.mubr.msk.f32.gmra.mxu1 %vm315_vm3, %v5650_v12 }
  0x62   : > { %4830 = vmatprep.mubr.msk.f32.mxu1 %vm315_vm3, %v5652_v13 }
  0x63   : > { %4881 = vmatmul.mubr.msk.f32.gmra.mxu0 %vm315_vm3, %v5672_v18  ;;  %v5856_v18 = vld [vmem:[#allocation2 + $0x152] sm:$0xff] }
  0x64   : > { %4883 = vmatprep.mubr.msk.f32.mxu0 %vm315_vm3, %v5680_v19  ;;  %v5844_v19 = vld [vmem:[#allocation2 + $0x128] sm:$0xff]  ;;  %7228 = vst [vmem:[#allocation36_spill] sm:$0xff] %v5856_v18 }
  0x65   : > { %4831 = vmatmul.mubr.msk.f32.gmra.mxu1 %vm315_vm3, %v5684_v20 }
  0x66   : > { %4833 = vmatprep.mubr.msk.f32.mxu1 %vm315_vm3, %v5688_v21 }
  0x67   : > { %4884 = vmatmul.mubr.msk.f32.gmra.mxu0 %vm315_vm3, %v5692_v22  ;;  %v5840_v22 = vld [vmem:[#allocation2 + $0x13a] sm:$0xff] }
  0x68   : > { %4886 = vmatprep.mubr.msk.f32.mxu0 %vm315_vm3, %v5696_v23  ;;  %v5828_v23 = vld [vmem:[#allocation2 + $0x110] sm:$0xff]  ;;  %7226 = vst [vmem:[#allocation34_spill] sm:$0xff] %v5840_v22 }
  0x69   : > { %4834 = vmatmul.mubr.msk.f32.gmra.mxu1 %vm315_vm3, %v5700_v24 }
  0x6a   : > { %4836 = vmatprep.mubr.msk.f32.mxu1 %vm315_vm3, %v5704_v26 }
  0x6b   : > { %4887 = vmatmul.mubr.msk.f32.gmra.mxu0 %vm315_vm3, %v5708_v27  ;;  %v5824_v27 = vld [vmem:[#allocation2 + $0x122] sm:$0xff] }
  0x6c   : > { %4889 = vmatprep.mubr.msk.f32.mxu0 %vm315_vm3, %v5712_v29  ;;  %v5812_v29 = vld [vmem:[#allocation2 + $0xf8] sm:$0xff]  ;;  %7224 = vst [vmem:[#allocation32_spill] sm:$0xff] %v5824_v27 }
  0x6d   : > { %4837 = vmatmul.mubr.msk.f32.gmra.mxu1 %vm315_vm3, %v5716_v30 }
  0x6e   : > { %4839 = vmatprep.mubr.msk.f32.mxu1 %vm315_vm3, %v5720_v33 }
  0x6f   : > { %4890 = vmatmul.mubr.msk.f32.gmra.mxu0 %vm315_vm3, %v5724_v42  ;;  %v5808_v42 = vld [vmem:[#allocation2 + $0x10a] sm:$0xff] }
  0x70   : > { %4892 = vmatprep.mubr.msk.f32.mxu0 %vm315_vm3, %v5728_v44  ;;  %v5796_v44 = vld [vmem:[#allocation2 + $0xe0] sm:$0xff]  ;;  %7222 = vst [vmem:[#allocation30_spill] sm:$0xff] %v5808_v42 }
  0x71   : > { %4840 = vmatmul.mubr.msk.f32.gmra.mxu1 %vm315_vm3, %v5732_v46 }
  0x72   : > { %4842 = vmatprep.mubr.msk.f32.mxu1 %vm315_vm3, %v5736_v47 }
  0x73   : > { %4893 = vmatmul.mubr.msk.f32.gmra.mxu0 %vm315_vm3, %v5740_v49  ;;  %v5792_v49 = vld [vmem:[#allocation2 + $0xf2] sm:$0xff] }
  0x74   : > { %4895 = vmatprep.mubr.msk.f32.mxu0 %vm315_vm3, %v5744_v50  ;;  %v5780_v50 = vld [vmem:[#allocation2 + $0xc8] sm:$0xff]  ;;  %7220 = vst [vmem:[#allocation28_spill] sm:$0xff] %v5792_v49 }
  0x75   : > { %4843 = vmatmul.mubr.msk.f32.gmra.mxu1 %vm315_vm3, %v5748_v52 }
  0x76   : > { %4845 = vmatprep.mubr.msk.f32.mxu1 %vm315_vm3, %v5752_v54 }
  0x77   : > { %4896 = vmatmul.mubr.msk.f32.gmra.mxu0 %vm315_vm3, %v5756_v3  ;;  %v5784_v3 = vld [vmem:[#allocation2 + $0xd8] sm:$0xff] }
  0x78   : > { %4898 = vmatprep.mubr.msk.f32.mxu0 %vm315_vm3, %v5760_v5  ;;  %v5788_v5 = vld [vmem:[#allocation2 + $0xe2] sm:$0xff] }
  0x79   : > { %4846 = vmatmul.mubr.msk.f32.gmra.mxu1 %vm315_vm3, %v5764_v6  ;;  %7219 = vst [vmem:[#allocation27_spill] sm:$0xff] %v5788_v5 }
  0x7a   : > { %4848 = vmatprep.mubr.msk.f32.mxu1 %vm315_vm3, %v5768_v8 }
  0x7b   : > { %4899 = vmatmul.mubr.msk.f32.gmra.mxu0 %vm315_vm3, %v5772_v16  ;;  %v5800_v16 = vld [vmem:[#allocation2 + $0xf0] sm:$0xff] }
  0x7c   : > { %4901 = vmatprep.mubr.msk.f32.mxu0 %vm315_vm3, %v5776_v17  ;;  %v5804_v17 = vld [vmem:[#allocation2 + $0xfa] sm:$0xff] }
  0x7d   : > { %4849 = vmatmul.mubr.msk.f32.gmra.mxu1 %vm315_vm3, %v5780_v50  ;;  %7221 = vst [vmem:[#allocation29_spill] sm:$0xff] %v5804_v17 }
  0x7e   : > { %4851 = vmatprep.mubr.msk.f32.mxu1 %vm315_vm3, %v5784_v3 }
  0x7f   : > { %4902 = vmatmul.mubr.msk.f32.gmra.mxu0 %vm315_vm3, %v5788_v5  ;;  %v5816_v5 = vld [vmem:[#allocation2 + $0x108] sm:$0xff] }
  0x80   : > { %4904 = vmatprep.mubr.msk.f32.mxu0 %vm315_vm3, %v5792_v49  ;;  %v5820_v49 = vld [vmem:[#allocation2 + $0x112] sm:$0xff] }
  0x81   : > { %4852 = vmatmul.mubr.msk.f32.gmra.mxu1 %vm315_vm3, %v5796_v44  ;;  %7223 = vst [vmem:[#allocation31_spill] sm:$0xff] %v5820_v49 }
  0x82   : > { %4854 = vmatprep.mubr.msk.f32.mxu1 %vm315_vm3, %v5800_v16 }
  0x83   : > { %4905 = vmatmul.mubr.msk.f32.gmra.mxu0 %vm315_vm3, %v5804_v17  ;;  %v5832_v17 = vld [vmem:[#allocation2 + $0x120] sm:$0xff] }
  0x84   : > { %4907 = vmatprep.mubr.msk.f32.mxu0 %vm315_vm3, %v5808_v42  ;;  %v5836_v42 = vld [vmem:[#allocation2 + $0x12a] sm:$0xff] }
  0x85   : > { %4855 = vmatmul.mubr.msk.f32.gmra.mxu1 %vm315_vm3, %v5812_v29  ;;  %7225 = vst [vmem:[#allocation33_spill] sm:$0xff] %v5836_v42 }
  0x86   : > { %4857 = vmatprep.mubr.msk.f32.mxu1 %vm315_vm3, %v5816_v5 }
  0x87   : > { %4908 = vmatmul.mubr.msk.f32.gmra.mxu0 %vm315_vm3, %v5820_v49  ;;  %v5848_v49 = vld [vmem:[#allocation2 + $0x138] sm:$0xff] }
  0x88   : > { %4910 = vmatprep.mubr.msk.f32.mxu0 %vm315_vm3, %v5824_v27  ;;  %v5852_v27 = vld [vmem:[#allocation2 + $0x142] sm:$0xff] }
  0x89   : > { %4858 = vmatmul.mubr.msk.f32.gmra.mxu1 %vm315_vm3, %v5828_v23  ;;  %7227 = vst [vmem:[#allocation35_spill] sm:$0xff] %v5852_v27 }
  0x8a   : > { %4860 = vmatprep.mubr.msk.f32.mxu1 %vm315_vm3, %v5832_v17 }
  0x8b   : > { %4911 = vmatmul.mubr.msk.f32.gmra.mxu0 %vm315_vm3, %v5836_v42  ;;  %v5864_v42 = vld [vmem:[#allocation2 + $0x150] sm:$0xff] }
  0x8c   : > { %4913 = vmatprep.mubr.msk.f32.mxu0 %vm315_vm3, %v5840_v22  ;;  %v5868_v22 = vld [vmem:[#allocation2 + $0x15a] sm:$0xff] }
  0x8d   : > { %4861 = vmatmul.mubr.msk.f32.gmra.mxu1 %vm315_vm3, %v5844_v19 }
  0x8e   : > { %4863 = vmatprep.mubr.msk.f32.mxu1 %vm315_vm3, %v5848_v49 }
  0x8f   : > { %4914 = vmatmul.mubr.msk.f32.gmra.mxu0 %vm315_vm3, %v5852_v27  ;;  %v5880_v27 = vld [vmem:[#allocation2 + $0x168] sm:$0xff] }
  0x90   : > { %4916 = vmatprep.mubr.msk.f32.mxu0 %vm315_vm3, %v5856_v18  ;;  %v5884_v18 = vld [vmem:[#allocation2 + $0x172] sm:$0xff] }
  0x91   : > { %4864 = vmatmul.mubr.msk.f32.gmra.mxu1 %vm315_vm3, %v5860_v11 }
  0x92   : > { %4866 = vmatprep.mubr.msk.f32.mxu1 %vm315_vm3, %v5864_v42 }
  0x93   : > { %4917 = vmatmul.mubr.msk.f32.gmra.mxu0 %vm315_vm3, %v5868_v22 }
  0x94   : > { %4919 = vmatprep.mubr.msk.f32.mxu0 %vm315_vm3, %v5872_v10  ;;  %v5903_v10 = vld [vmem:[%s7139_s1 + $0x20] sm:$0xf] }
  0x95   : > { %4867 = vmatmul.mubr.msk.f32.gmra.mxu1 %vm315_vm3, %v5876_v7 }
  0x96   : > { %4869 = vmatprep.mubr.msk.f32.mxu1 %vm315_vm3, %v5880_v27 }
  0x97   : > { %4920 = vmatmul.mubr.msk.f32.gmra.mxu0 %vm315_vm3, %v5884_v18 }
  0x98   : > { %4974 = vmatprep.mubr.msk.f32.mxu0 %vm315_vm3, %v5495_v31  ;;  %v5914_v31 = vld [vmem:[%s7139_s1 + $0x1c] sm:$0xf] }
  0x99   : > { %4870 = vmatmul.mubr.msk.f32.gmra.mxu1 %vm315_vm3, %v5890_v4 }
  0x9a   : > { %4924 = vmatprep.mubr.msk.f32.mxu1 %vm315_vm3, %v5637_v9 }
  0x9b   : > { %4975 = vmatmul.mubr.msk.f32.vlgmr.msra.gmra.mxu0 %vm315_vm3, %v5505_v34  ;;  %v6038_v34 = vld [vmem:[#allocation2 + $0x189] sm:$0xff] }
  0x9c   : > { %5073 = vmatpush3.msk.msra.mxu0 %vm511_vm2, %v5666_v15  ;;  %4977 = vmatprep.mubr.msk.f32.mxu0 %vm315_vm3, %v5509_v36  ;;  %v7233_v36 = vld [vmem:[#allocation10_spill] sm:$0xff] }
  0x9d   : > { %4925 = vmatmul.mubr.msk.f32.vlgmr.msra.gmra.mxu1 %vm315_vm3, %v5650_v12  ;;  %5172 = vmatprep.subr.msk.mxu0 %vm511_vm2, %v5903_v10  ;;  %v7252_v12 = vld [vmem:[#allocation29_spill] sm:$0xff] }
  0x9e   : > { %5023 = vmatpush3.msk.msra.mxu1 %vm511_vm2, %v5657_v14  ;;  %4927 = vmatprep.mubr.msk.f32.mxu1 %vm315_vm3, %v5652_v13  ;;  %v7253_v14 = vld [vmem:[#allocation30_spill] sm:$0xff] }
  0x9f   : > { %4978 = vmatmul.mubr.msk.f32.gmra.mxu0 %vm315_vm3, %v5520_v38  ;;  %5122 = vmatprep.subr.msk.mxu1 %vm511_vm2, %v5914_v31  ;;  %v7235_v38 = vld [vmem:[#allocation12_spill] sm:$0xff] }
  0xa0   : > { %4980 = vmatprep.mubr.msk.f32.mxu0 %vm315_vm3, %v5524_v39  ;;  %v7236_v39 = vld [vmem:[#allocation13_spill] sm:$0xff] }
  0xa1   : > { %4928 = vmatmul.mubr.msk.f32.gmra.mxu1 %vm315_vm3, %v5684_v20 }
  0xa2   : > { %4930 = vmatprep.mubr.msk.f32.mxu1 %vm315_vm3, %v5688_v21 }
  0xa3   : > { %4981 = vmatmul.mubr.msk.f32.gmra.mxu0 %vm315_vm3, %v5537_v43  ;;  %v7239_v43 = vld [vmem:[#allocation16_spill] sm:$0xff] }
  0xa4   : > { %4983 = vmatprep.mubr.msk.f32.mxu0 %vm315_vm3, %v5543_v45  ;;  %v7240_v45 = vld [vmem:[#allocation17_spill] sm:$0xff] }
  0xa5   : > { %4931 = vmatmul.mubr.msk.f32.gmra.mxu1 %vm315_vm3, %v5700_v24 }
  0xa6   : > { %4933 = vmatprep.mubr.msk.f32.mxu1 %vm315_vm3, %v5704_v26 }
  0xa7   : > { %4984 = vmatmul.mubr.msk.f32.gmra.mxu0 %vm315_vm3, %v5567_v53  ;;  %v7243_v53 = vld [vmem:[#allocation20_spill] sm:$0xff] }
  0xa8   : > { %4986 = vmatprep.mubr.msk.f32.mxu0 %vm315_vm3, %v5575_v55  ;;  %v7244_v55 = vld [vmem:[#allocation21_spill] sm:$0xff] }
  0xa9   : > { %4934 = vmatmul.mubr.msk.f32.gmra.mxu1 %vm315_vm3, %v5716_v30 }
  0xaa   : > { %4936 = vmatprep.mubr.msk.f32.mxu1 %vm315_vm3, %v5720_v33 }
  0xab   : > { %4987 = vmatmul.mubr.msk.f32.gmra.mxu0 %vm315_vm3, %v5588_v58  ;;  %v7247_v58 = vld [vmem:[#allocation24_spill] sm:$0xff] }
  0xac   : > { %4989 = vmatprep.mubr.msk.f32.mxu0 %vm315_vm3, %v5592_v59 }
  0xad   : > { %4937 = vmatmul.mubr.msk.f32.gmra.mxu1 %vm315_vm3, %v5732_v46 }
  0xae   : > { %4939 = vmatprep.mubr.msk.f32.mxu1 %vm315_vm3, %v5736_v47 }
  0xaf   : > { %4990 = vmatmul.mubr.msk.f32.gmra.mxu0 %vm315_vm3, %v5604_v62 }
  0xb0   : > { %4992 = vmatprep.mubr.msk.f32.mxu0 %vm315_vm3, %v5608_v63 }
  0xb1   : > { %4940 = vmatmul.mubr.msk.f32.gmra.mxu1 %vm315_vm3, %v5748_v52 }
  0xb2   : > { %4942 = vmatprep.mubr.msk.f32.mxu1 %vm315_vm3, %v5752_v54 }
  0xb3   : > { %4993 = vmatmul.mubr.msk.f32.gmra.mxu0 %vm315_vm3, %v5620_v2 }
  0xb4   : > { %4995 = vmatprep.mubr.msk.f32.mxu0 %vm315_vm3, %v5478_v25  ;;  %v6028_v25 = vld [vmem:[#allocation2 + $0x181] sm:$0xff] }
  0xb5   : > { %4943 = vmatmul.mubr.msk.f32.gmra.mxu1 %vm315_vm3, %v5764_v6  ;;  %7230 = vst [vmem:[#allocation38_spill] sm:$0xff] %v6028_v25 }
  0xb6   : > { %4945 = vmatprep.mubr.msk.f32.mxu1 %vm315_vm3, %v5768_v8 }
  0xb7   : > { %4996 = vmatmul.mubr.msk.f32.gmra.mxu0 %vm315_vm3, %v5487_v28  ;;  %v7231_v28 = vld [vmem:[#allocation9_spill] sm:$0xff] }
  0xb8   : > { %4998 = vmatprep.mubr.msk.f32.mxu0 %vm315_vm3, %v5497_v32  ;;  %v6034_v32 = vld [vmem:[#allocation2 + $0x180] sm:$0xff]  ;;  %7232 = vst [vmem:[#allocation9_spill] sm:$0xff] %v6038_v34 }
  0xb9   : > { %4946 = vmatmul.mubr.msk.f32.gmra.mxu1 %vm315_vm3, %v5780_v50 }
  0xba   : > { %4948 = vmatprep.mubr.msk.f32.mxu1 %vm315_vm3, %v5784_v3 }
  0xbb   : > { %4999 = vmatmul.mubr.msk.f32.gmra.mxu0 %vm315_vm3, %v5507_v35  ;;  %v6044_v35 = vld [vmem:[#allocation2 + $0x188] sm:$0xff] }
  0xbc   : > { %5001 = vmatprep.mubr.msk.f32.mxu0 %vm315_vm3, %v5516_v37  ;;  %v7234_v37 = vld [vmem:[#allocation11_spill] sm:$0xff] }
  0xbd   : > { %4949 = vmatmul.mubr.msk.f32.gmra.mxu1 %vm315_vm3, %v5796_v44 }
  0xbe   : > { %4951 = vmatprep.mubr.msk.f32.mxu1 %vm315_vm3, %v5800_v16 }
  0xbf   : > { %5002 = vmatmul.mubr.msk.f32.gmra.mxu0 %vm315_vm3, %v5528_v40  ;;  %v7237_v40 = vld [vmem:[#allocation14_spill] sm:$0xff] }
  0xc0   : > { %5004 = vmatprep.mubr.msk.f32.mxu0 %vm315_vm3, %v5532_v41  ;;  %v7238_v41 = vld [vmem:[#allocation15_spill] sm:$0xff] }
  0xc1   : > { %4952 = vmatmul.mubr.msk.f32.gmra.mxu1 %vm315_vm3, %v5812_v29 }
  0xc2   : > { %4954 = vmatprep.mubr.msk.f32.mxu1 %vm315_vm3, %v5816_v5 }
  0xc3   : > { %5005 = vmatmul.mubr.msk.f32.gmra.mxu0 %vm315_vm3, %v5550_v48  ;;  %v7241_v48 = vld [vmem:[#allocation18_spill] sm:$0xff] }
  0xc4   : > { %5007 = vmatprep.mubr.msk.f32.mxu0 %vm315_vm3, %v5558_v51  ;;  %v7242_v51 = vld [vmem:[#allocation19_spill] sm:$0xff] }
  0xc5   : > { %4955 = vmatmul.mubr.msk.f32.gmra.mxu1 %vm315_vm3, %v5828_v23 }
  0xc6   : > { %4957 = vmatprep.mubr.msk.f32.mxu1 %vm315_vm3, %v5832_v17 }
  0xc7   : > { %5008 = vmatmul.mubr.msk.f32.gmra.mxu0 %vm315_vm3, %v5580_v56  ;;  %v7245_v56 = vld [vmem:[#allocation22_spill] sm:$0xff] }
  0xc8   : > { %5010 = vmatprep.mubr.msk.f32.mxu0 %vm315_vm3, %v5584_v57  ;;  %v7246_v57 = vld [vmem:[#allocation23_spill] sm:$0xff] }
  0xc9   : > { %4958 = vmatmul.mubr.msk.f32.gmra.mxu1 %vm315_vm3, %v5844_v19 }
  0xca   : > { %4960 = vmatprep.mubr.msk.f32.mxu1 %vm315_vm3, %v5848_v49 }
  0xcb   : > { %5011 = vmatmul.mubr.msk.f32.gmra.mxu0 %vm315_vm3, %v5596_v60  ;;  %v7248_v60 = vld [vmem:[#allocation25_spill] sm:$0xff] }
  0xcc   : > { %5013 = vmatprep.mubr.msk.f32.mxu0 %vm315_vm3, %v5600_v61  ;;  %v7249_v61 = vld [vmem:[#allocation26_spill] sm:$0xff] }
  0xcd   : > { %4961 = vmatmul.mubr.msk.f32.gmra.mxu1 %vm315_vm3, %v5860_v11 }
  0xce   : > { %4963 = vmatprep.mubr.msk.f32.mxu1 %vm315_vm3, %v5864_v42 }
  0xcf   : > { %5014 = vmatmul.mubr.msk.f32.gmra.mxu0 %vm315_vm3, %v5612_v0  ;;  %v7250_v0 = vld [vmem:[#allocation27_spill] sm:$0xff] }
  0xd0   : > { %5016 = vmatprep.mubr.msk.f32.mxu0 %vm315_vm3, %v5616_v1  ;;  %v7251_v1 = vld [vmem:[#allocation28_spill] sm:$0xff] }
  0xd1   : > { %4964 = vmatmul.mubr.msk.f32.gmra.mxu1 %vm315_vm3, %v5876_v7 }
  0xd2   : > { %4966 = vmatprep.mubr.msk.f32.mxu1 %vm315_vm3, %v5880_v27 }
  0xd3   : > { %5017 = vmatmul.mubr.msk.f32.gmra.mxu0 %vm315_vm3, %v7231_v28  ;;  %v6233_v28 = vld [vmem:[#allocation2 + $0x18a] sm:$0xff] }
  0xd4   : > { %5019 = vmatprep.mubr.msk.f32.mxu0 %vm315_vm3, %v6028_v25  ;;  %7263 = vst [vmem:[#allocation12_spill] sm:$0xff] %v6233_v28 }
  0xd5   : > { %4967 = vmatmul.mubr.msk.f32.gmra.mxu1 %vm315_vm3, %v5890_v4 }
  0xd6   : > { %4969 = vmatprep.mubr.msk.f32.mxu1 %vm315_vm3, %v6034_v32 }
  0xd7   : > { %5020 = vmatmul.mubr.msk.f32.gmra.mxu0 %vm315_vm3, %v6038_v34 }
  0xd8   : > { %5074 = vmatprep.mubr.msk.f32.mxu0 %vm315_vm3, %v5652_v13 }
  0xd9   : > { %4970 = vmatmul.mubr.msk.f32.gmra.mxu1 %vm315_vm3, %v6044_v35 }
  0xda   : > { %5024 = vmatprep.mubr.msk.f32.mxu1 %vm315_vm3, %v7233_v36  ;;  %v3015_v36 = vld [vmem:[#allocation2 + $0x31] sm:$0xff] }
  0xdb   : > { %5075 = vmatmul.mubr.msk.f32.vlgmr.msra.gmra.mxu0 %vm315_vm3, %v5684_v20 }
  0xdc   : > { %5173 = vmatpush3.msk.msra.mxu0 %vm511_vm2, %v5903_v10  ;;  %5077 = vmatprep.mubr.msk.f32.mxu0 %vm315_vm3, %v5688_v21 }
  0xdd   : > { %5025 = vmatmul.mubr.msk.f32.vlgmr.msra.gmra.mxu1 %vm315_vm3, %v7234_v37 }
  0xde   : > { %5123 = vmatpush3.msk.msra.mxu1 %vm511_vm2, %v5914_v31  ;;  %5027 = vmatprep.mubr.msk.f32.mxu1 %vm315_vm3, %v7235_v38 }
  0xdf   : > { %5078 = vmatmul.mubr.msk.f32.gmra.mxu0 %vm315_vm3, %v5700_v24 }
  0xe0   : > { %5080 = vmatprep.mubr.msk.f32.mxu0 %vm315_vm3, %v5704_v26  ;;  %v7255_v26 = vld [vmem:[#allocation32_spill] sm:$0xff] }
  0xe1   : > { %5028 = vmatmul.mubr.msk.f32.gmra.mxu1 %vm315_vm3, %v7236_v39 }
  0xe2   : > { %5030 = vmatprep.mubr.msk.f32.mxu1 %vm315_vm3, %v7237_v40 }
  0xe3   : > { %5081 = vmatmul.mubr.msk.f32.gmra.mxu0 %vm315_vm3, %v5716_v30 }
  0xe4   : > { %5083 = vmatprep.mubr.msk.f32.mxu0 %vm315_vm3, %v5720_v33  ;;  %v7256_v33 = vld [vmem:[#allocation33_spill] sm:$0xff] }
  0xe5   : > { %5031 = vmatmul.mubr.msk.f32.gmra.mxu1 %vm315_vm3, %v7238_v41 }
  0xe6   : > { %5033 = vmatprep.mubr.msk.f32.mxu1 %vm315_vm3, %v7239_v43 }
  0xe7   : > { %5084 = vmatmul.mubr.msk.f32.gmra.mxu0 %vm315_vm3, %v5732_v46  ;;  %v7257_v46 = vld [vmem:[#allocation34_spill] sm:$0xff] }
  0xe8   : > { %5086 = vmatprep.mubr.msk.f32.mxu0 %vm315_vm3, %v5736_v47 }
  0xe9   : > { %5034 = vmatmul.mubr.msk.f32.gmra.mxu1 %vm315_vm3, %v7240_v45 }
  0xea   : > { %5036 = vmatprep.mubr.msk.f32.mxu1 %vm315_vm3, %v7241_v48 }
  0xeb   : > { %5087 = vmatmul.mubr.msk.f32.gmra.mxu0 %vm315_vm3, %v5748_v52  ;;  %v7259_v52 = vld [vmem:[#allocation36_spill] sm:$0xff] }
  0xec   : > { %5089 = vmatprep.mubr.msk.f32.mxu0 %vm315_vm3, %v5752_v54 }
  0xed   : > { %5037 = vmatmul.mubr.msk.f32.gmra.mxu1 %vm315_vm3, %v7242_v51 }
  0xee   : > { %5039 = vmatprep.mubr.msk.f32.mxu1 %vm315_vm3, %v7243_v53 }
  0xef   : > { %5090 = vmatmul.mubr.msk.f32.gmra.mxu0 %vm315_vm3, %v5764_v6  ;;  %v7260_v6 = vld [vmem:[#allocation37_spill] sm:$0xff] }
  0xf0   : > { %5092 = vmatprep.mubr.msk.f32.mxu0 %vm315_vm3, %v5768_v8 }
  0xf1   : > { %5040 = vmatmul.mubr.msk.f32.gmra.mxu1 %vm315_vm3, %v7244_v55 }
  0xf2   : > { %5042 = vmatprep.mubr.msk.f32.mxu1 %vm315_vm3, %v7245_v56 }
  0xf3   : > { %5093 = vmatmul.mubr.msk.f32.gmra.mxu0 %vm315_vm3, %v5780_v50 }
  0xf4   : > { %5095 = vmatprep.mubr.msk.f32.mxu0 %vm315_vm3, %v5784_v3  ;;  %v6116_v59 = vpop.f32.mrf.mxu0 }
  0xf5   : > { %5043 = vmatmul.mubr.msk.f32.gmra.mxu1 %vm315_vm3, %v7246_v57 }
  0xf6   : > { %5045 = vmatprep.mubr.msk.f32.mxu1 %vm315_vm3, %v7247_v58  ;;  %v6126_v62 = vpop.f32.mrf.mxu0 }
  0xf7   : > { %5096 = vmatmul.mubr.msk.f32.gmra.mxu0 %vm315_vm3, %v5796_v44 }
  0xf8   : > { %5098 = vmatprep.mubr.msk.f32.mxu0 %vm315_vm3, %v5800_v16 }
  0xf9   : > { %5046 = vmatmul.mubr.msk.f32.gmra.mxu1 %vm315_vm3, %v7248_v60 }
  0xfa   : > { %5048 = vmatprep.mubr.msk.f32.mxu1 %vm315_vm3, %v7249_v61 }
  0xfb   : > { %5099 = vmatmul.mubr.msk.f32.gmra.mxu0 %vm315_vm3, %v5812_v29 }
  0xfc   : > { %5101 = vmatprep.mubr.msk.f32.mxu0 %vm315_vm3, %v5816_v5  ;;  %v2655_v5 = vld [vmem:[#allocation2 + $0x198] sm:$0xff] }
  0xfd   : > { %v6130_v63 = vpop.f32.mrf.mxu1  ;;  %5049 = vmatmul.mubr.msk.f32.gmra.mxu1 %vm315_vm3, %v7250_v0 }
  0xfe   : > { %5051 = vmatprep.mubr.msk.f32.mxu1 %vm315_vm3, %v7251_v1 }
  0xff   : > { %v6136_v2 = vpop.f32.mrf.mxu1  ;;  %v6138_v9 = vpop.f32.mrf.mxu0  ;;  %5102 = vmatmul.mubr.msk.f32.gmra.mxu0 %vm315_vm3, %v5828_v23  ;;  %v7254_v23 = vld [vmem:[#allocation31_spill] sm:$0xff] }
 0x100   : > { %5104 = vmatprep.mubr.msk.f32.mxu0 %vm315_vm3, %v5832_v17  ;;  %v2656_v17 = vld [vmem:[#allocation2 + $0x1a0] sm:$0xff] }
 0x101   : > { %v6144_v10 = vpop.f32.mrf.mxu1  ;;  %5052 = vmatmul.mubr.msk.f32.gmra.mxu1 %vm315_vm3, %v7252_v12  ;;  %v6148_v13 = vpop.f32.mrf.mxu0 }
 0x102   : > { %5054 = vmatprep.mubr.msk.f32.mxu1 %vm315_vm3, %v7253_v14 }
 0x103   : > { %v6152_v15 = vpop.f32.mrf.mxu1  ;;  %v6154_v20 = vpop.f32.mrf.mxu0  ;;  %5105 = vmatmul.mubr.msk.f32.gmra.mxu0 %vm315_vm3, %v5844_v19 }
 0x104   : > { %5107 = vmatprep.mubr.msk.f32.mxu0 %vm315_vm3, %v5848_v49 }
 0x105   : > { %v6160_v21 = vpop.f32.mrf.mxu1  ;;  %5055 = vmatmul.mubr.msk.f32.gmra.mxu1 %vm315_vm3, %v7254_v23  ;;  %v6164_v24 = vpop.f32.mrf.mxu0 }
 0x106   : > { %5057 = vmatprep.mubr.msk.f32.mxu1 %vm315_vm3, %v7255_v26 }
 0x107   : > { %v6168_v29 = vpop.f32.mrf.mxu1  ;;  %v6170_v30 = vpop.f32.mrf.mxu0  ;;  %5108 = vmatmul.mubr.msk.f32.gmra.mxu0 %vm315_vm3, %v5860_v11 }
 0x108   : > { %5110 = vmatprep.mubr.msk.f32.mxu0 %vm315_vm3, %v5864_v42  ;;  %v7258_v42 = vld [vmem:[#allocation35_spill] sm:$0xff] }
 0x109   : > { %v6176_v19 = vpop.f32.mrf.mxu1  ;;  %5058 = vmatmul.mubr.msk.f32.gmra.mxu1 %vm315_vm3, %v7256_v33  ;;  %v6180_v44 = vpop.f32.mrf.mxu0 }
 0x10a   : > { %5060 = vmatprep.mubr.msk.f32.mxu1 %vm315_vm3, %v7257_v46 }
 0x10b   : > { %v6184_v47 = vpop.f32.mrf.mxu1  ;;  %v6186_v49 = vpop.f32.mrf.mxu0  ;;  %5111 = vmatmul.mubr.msk.f32.gmra.mxu0 %vm315_vm3, %v5876_v7 }
 0x10c   : > { %5113 = vmatprep.mubr.msk.f32.mxu0 %vm315_vm3, %v5880_v27 }
 0x10d   : > { %v6192_v11 = vpop.f32.mrf.mxu1  ;;  %5061 = vmatmul.mubr.msk.f32.gmra.mxu1 %vm315_vm3, %v7258_v42  ;;  %v6196_v50 = vpop.f32.mrf.mxu0 }
 0x10e   : > { %5063 = vmatprep.mubr.msk.f32.mxu1 %vm315_vm3, %v7259_v52 }
 0x10f   : > { %v6200_v54 = vpop.f32.mrf.mxu1  ;;  %v6202_v3 = vpop.f32.mrf.mxu0  ;;  %5114 = vmatmul.mubr.msk.f32.gmra.mxu0 %vm315_vm3, %v5890_v4  ;;  %v6222_v4 = vld [vmem:[#allocation2 + $0x182] sm:$0xff] }
 0x110   : > { %5116 = vmatprep.mubr.msk.f32.mxu0 %vm315_vm3, %v6034_v32 }
 0x111   : > { %v6208_v7 = vpop.f32.mrf.mxu1  ;;  %5064 = vmatmul.mubr.msk.f32.gmra.mxu1 %vm315_vm3, %v5868_v22  ;;  %v6212_v27 = vpop.f32.mrf.mxu0 }
 0x112   : > { %5066 = vmatprep.mubr.msk.f32.mxu1 %vm315_vm3, %v7260_v6 }
 0x113   : > { %v6216_v8 = vpop.f32.mrf.mxu1  ;;  %v6218_v16 = vpop.f32.mrf.mxu0  ;;  %5117 = vmatmul.mubr.msk.f32.gmra.mxu0 %vm315_vm3, %v6044_v35 }
 0x114   : > { %7261 = vst [vmem:[#allocation10_spill] sm:$0xff] %v6216_v8  ;;  %5119 = vmatprep.mubr.msk.f32.mxu0 %vm315_vm3, %v2655_v5  ;;  %v3016_v5 = vld [vmem:[#allocation2 + $0x39] sm:$0xff] }
 0x115   : > { %v6225_v31 = vpop.f32.mrf.mxu1  ;;  %5067 = vmatmul.mubr.msk.f32.gmra.mxu1 %vm315_vm3, %v5884_v18  ;;  %v6229_v22 = vpop.f32.mrf.mxu0 }
 0x116   : > { %7262 = vst [vmem:[#allocation11_spill] sm:$0xff] %v6225_v31  ;;  %5069 = vmatprep.mubr.msk.f32.mxu1 %vm315_vm3, %v6222_v4 }
 0x117   : > { %v6235_v32 = vpop.f32.mrf.mxu1  ;;  %v6237_v35 = vpop.f32.mrf.mxu0  ;;  %5120 = vmatmul.mubr.msk.f32.gmra.mxu0 %vm315_vm3, %v2656_v17  ;;  %v3017_v17 = vld [vmem:[#allocation2 + $0x49] sm:$0xff] }
 0x118   : > { %7264 = vst [vmem:[#allocation13_spill] sm:$0xff] %v6235_v32  ;;  %5174 = vmatprep.mubr.msk.f32.mxu0 %vm315_vm3, %v7235_v38 }
 0x119   : > { %v6242_v37 = vpop.f32.mrf.mxu1  ;;  %5070 = vmatmul.mubr.msk.f32.gmra.mxu1 %vm315_vm3, %v6233_v28  ;;  %v6246_v18 = vpop.f32.mrf.mxu0 }
 0x11a   : > { %7265 = vst [vmem:[#allocation14_spill] sm:$0xff] %v6242_v37  ;;  %5124 = vmatprep.mubr.msk.f32.mxu1 %vm315_vm3, %v3015_v36  ;;  %v3018_v36 = vld [vmem:[#allocation2 + $0x51] sm:$0xff] }
 0x11b   : > { %v6249_v6 = vpop.f32.mrf.mxu1  ;;  %v4876_v32 = vpop.f32.mrf.mxu0  ;;  %5175 = vmatmul.mubr.msk.f32.vlgmr.msra.gmra.mxu0 %vm315_vm3, %v7236_v39 }
 0x11c   : > { %7266 = vst [vmem:[#allocation15_spill] sm:$0xff] %v6249_v6  ;;  %5177 = vmatprep.mubr.msk.f32.mxu0 %vm315_vm3, %v7237_v40  ;;  %v3019_v6 = vld [vmem:[#allocation2 + $0x61] sm:$0xff] }
 0x11d   : > { %v4826_v38 = vpop.f32.mrf.mxu1  ;;  %5125 = vmatmul.mubr.msk.f32.vlgmr.msra.gmra.mxu1 %vm315_vm3, %v3016_v5  ;;  %v1263_v37 = vpop.f32.mrf.mxu0 }
 0x11e   : > { %v911_v31 = vadd.f32 %v4826_v38, %v6116_v59  ;;  %5127 = vmatprep.mubr.msk.f32.mxu1 %vm315_vm3, %v3017_v17  ;;  %v3020_v38 = vld [vmem:[#allocation2 + $0x69] sm:$0xff] }
 0x11f   : > { %v905_v34 = vpop.f32.mrf.mxu1  ;;  %v4879_v8 = vpop.f32.mrf.mxu0  ;;  %5178 = vmatmul.mubr.msk.f32.gmra.mxu0 %vm315_vm3, %v7238_v41 }
 0x120   : > { %v6260_v39 = vadd.f32 %v4876_v32, %v911_v31  ;;  %v906_v28 = vadd.f32 %v905_v34, %v6126_v62  ;;  %5180 = vmatprep.mubr.msk.f32.mxu0 %vm315_vm3, %v7239_v43  ;;  %v3021_v34 = vld [vmem:[#allocation2 + $0x79] sm:$0xff] }
 0x121   : > { %v4829_v40 = vpop.f32.mrf.mxu1  ;;  %5128 = vmatmul.mubr.msk.f32.gmra.mxu1 %vm315_vm3, %v3018_v36  ;;  %v1273_v59 = vpop.f32.mrf.mxu0 }
 0x122   : > { %v6266_v5 = vadd.f32 %v1263_v37, %v906_v28  ;;  %v921_v17 = vadd.f32 %v4829_v40, %v6138_v9  ;;  %5130 = vmatprep.mubr.msk.f32.mxu1 %vm315_vm3, %v3019_v6  ;;  %v3022_v37 = vld [vmem:[#allocation2 + $0x81] sm:$0xff] }
 0x123   : > { %v915_v41 = vpop.f32.mrf.mxu1  ;;  %v4882_v25 = vpop.f32.mrf.mxu0  ;;  %5181 = vmatmul.mubr.msk.f32.gmra.mxu0 %vm315_vm3, %v7240_v45 }
 0x124   : > { %v6272_v62 = vadd.f32 %v4879_v8, %v921_v17  ;;  %v916_v43 = vadd.f32 %v915_v41, %v6148_v13  ;;  %5183 = vmatprep.mubr.msk.f32.mxu0 %vm315_vm3, %v7241_v48  ;;  %v3023_v13 = vld [vmem:[#allocation2 + $0x91] sm:$0xff]  ;;  %v3024_v17 = vld [vmem:[#allocation2 + $0x99] sm:$0xff] }
 0x125   : > { %v4832_v31 = vpop.f32.mrf.mxu1  ;;  %5131 = vmatmul.mubr.msk.f32.gmra.mxu1 %vm315_vm3, %v3020_v38  ;;  %v1283_v9 = vpop.f32.mrf.mxu0 }
 0x126   : > { %v6278_v28 = vadd.f32 %v1273_v59, %v916_v43  ;;  %v931_v32 = vadd.f32 %v4832_v31, %v6154_v20  ;;  %5133 = vmatprep.mubr.msk.f32.mxu1 %vm315_vm3, %v3021_v34  ;;  %v3026_v31 = vld [vmem:[#allocation2 + $0xb1] sm:$0xff] }
 0x127   : > { %v925_v45 = vpop.f32.mrf.mxu1  ;;  %v4885_v6 = vpop.f32.mrf.mxu0  ;;  %5184 = vmatmul.mubr.msk.f32.gmra.mxu0 %vm315_vm3, %v7242_v51 }
 0x128   : > { %v6284_v8 = vadd.f32 %v4882_v25, %v931_v32  ;;  %v926_v48 = vadd.f32 %v925_v45, %v6164_v24  ;;  %5186 = vmatprep.mubr.msk.f32.mxu0 %vm315_vm3, %v7243_v53  ;;  %v3025_v25 = vld [vmem:[#allocation2 + $0xa9] sm:$0xff] }
 0x129   : > { %v4835_v36 = vpop.f32.mrf.mxu1  ;;  %5134 = vmatmul.mubr.msk.f32.gmra.mxu1 %vm315_vm3, %v3022_v37  ;;  %v1293_v20 = vpop.f32.mrf.mxu0 }
 0x12a   : > { %v6290_v40 = vadd.f32 %v1283_v9, %v926_v48  ;;  %v941_v59 = vadd.f32 %v4835_v36, %v6170_v30  ;;  %5136 = vmatprep.mubr.msk.f32.mxu1 %vm315_vm3, %v3023_v13  ;;  %v3028_v13 = vld [vmem:[#allocation2 + $0xc9] sm:$0xff] }
 0x12b   : > { %v935_v51 = vpop.f32.mrf.mxu1  ;;  %v4888_v38 = vpop.f32.mrf.mxu0  ;;  %5187 = vmatmul.mubr.msk.f32.gmra.mxu0 %vm315_vm3, %v7244_v55 }
 0x12c   : > { %v6296_v24 = vadd.f32 %v4885_v6, %v941_v59  ;;  %v936_v53 = vadd.f32 %v935_v51, %v6180_v44  ;;  %5189 = vmatprep.mubr.msk.f32.mxu0 %vm315_vm3, %v7245_v56  ;;  %v3027_v44 = vld [vmem:[#allocation2 + $0xc1] sm:$0xff] }
 0x12d   : > { %v4838_v41 = vpop.f32.mrf.mxu1  ;;  %5137 = vmatmul.mubr.msk.f32.gmra.mxu1 %vm315_vm3, %v3024_v17  ;;  %v1303_v30 = vpop.f32.mrf.mxu0  ;;  %v3030_v51 = vld [vmem:[#allocation2 + $0xe1] sm:$0xff] }
 0x12e   : > { %v6302_v34 = vadd.f32 %v1293_v20, %v936_v53  ;;  %v951_v43 = vadd.f32 %v4838_v41, %v6186_v49  ;;  %5139 = vmatprep.mubr.msk.f32.mxu1 %vm315_vm3, %v3025_v25 }
 0x12f   : > { %v945_v55 = vpop.f32.mrf.mxu1  ;;  %v4891_v9 = vpop.f32.mrf.mxu0  ;;  %5190 = vmatmul.mubr.msk.f32.gmra.mxu0 %vm315_vm3, %v7246_v57 }
 0x130   : > { %v6308_v32 = vadd.f32 %v4888_v38, %v951_v43  ;;  %v946_v56 = vadd.f32 %v945_v55, %v6196_v50  ;;  %5192 = vmatprep.mubr.msk.f32.mxu0 %vm315_vm3, %v7247_v58  ;;  %v3029_v50 = vld [vmem:[#allocation2 + $0xd9] sm:$0xff] }
 0x131   : > { %v4841_v37 = vpop.f32.mrf.mxu1  ;;  %5140 = vmatmul.mubr.msk.f32.gmra.mxu1 %vm315_vm3, %v3026_v31  ;;  %v1313_v49 = vpop.f32.mrf.mxu0  ;;  %v3032_v43 = vld [vmem:[#allocation2 + $0xf9] sm:$0xff] }
 0x132   : > { %v6314_v45 = vadd.f32 %v1303_v30, %v946_v56  ;;  %v961_v6 = vadd.f32 %v4841_v37, %v6202_v3  ;;  %5142 = vmatprep.mubr.msk.f32.mxu1 %vm315_vm3, %v3027_v44  ;;  %v3034_v37 = vld [vmem:[#allocation2 + $0x111] sm:$0xff] }
 0x133   : > { %v955_v57 = vpop.f32.mrf.mxu1  ;;  %v4894_v48 = vpop.f32.mrf.mxu0  ;;  %5193 = vmatmul.mubr.msk.f32.gmra.mxu0 %vm315_vm3, %v7248_v60 }
 0x134   : > { %v6320_v36 = vadd.f32 %v4891_v9, %v961_v6  ;;  %v956_v58 = vadd.f32 %v955_v57, %v6212_v27  ;;  %5195 = vmatprep.mubr.msk.f32.mxu0 %vm315_vm3, %v7249_v61  ;;  %v3031_v27 = vld [vmem:[#allocation2 + $0xf1] sm:$0xff] }
 0x135   : > { %v4844_v20 = vpop.f32.mrf.mxu1  ;;  %5143 = vmatmul.mubr.msk.f32.gmra.mxu1 %vm315_vm3, %v3028_v13  ;;  %v1323_v3 = vpop.f32.mrf.mxu0 }
 0x136   : > { %v6326_v59 = vadd.f32 %v1313_v49, %v956_v58  ;;  %v971_v17 = vadd.f32 %v4844_v20, %v6218_v16  ;;  %5145 = vmatprep.mubr.msk.f32.mxu1 %vm315_vm3, %v3029_v50  ;;  %v3036_v50 = vld [vmem:[#allocation2 + $0x129] sm:$0xff] }
 0x137   : > { %v965_v60 = vpop.f32.mrf.mxu1  ;;  %v4897_v38 = vpop.f32.mrf.mxu0  ;;  %5196 = vmatmul.mubr.msk.f32.gmra.mxu0 %vm315_vm3, %v7250_v0 }
 0x138   : > { %v6332_v25 = vadd.f32 %v4894_v48, %v971_v17  ;;  %v966_v61 = vadd.f32 %v965_v60, %v6229_v22  ;;  %5198 = vmatprep.mubr.msk.f32.mxu0 %vm315_vm3, %v7251_v1  ;;  %v3033_v22 = vld [vmem:[#allocation2 + $0x109] sm:$0xff]  ;;  %v3038_v60 = vld [vmem:[#allocation2 + $0x141] sm:$0xff] }
 0x139   : > { %v4847_v53 = vpop.f32.mrf.mxu1  ;;  %5146 = vmatmul.mubr.msk.f32.gmra.mxu1 %vm315_vm3, %v3030_v51  ;;  %v1333_v16 = vpop.f32.mrf.mxu0 }
 0x13a   : > { %v6338_v41 = vadd.f32 %v1323_v3, %v966_v61  ;;  %v981_v30 = vadd.f32 %v4847_v53, %v6237_v35  ;;  %5148 = vmatprep.mubr.msk.f32.mxu1 %vm315_vm3, %v3031_v27  ;;  %v3430_v61 = vld [vmem:[#allocation2 + $0x15a] sm:$0xff] }
 0x13b   : > { %v975_v0 = vpop.f32.mrf.mxu1  ;;  %v4900_v31 = vpop.f32.mrf.mxu0  ;;  %5199 = vmatmul.mubr.msk.f32.gmra.mxu0 %vm315_vm3, %v7252_v12 }
 0x13c   : > { %v6344_v55 = vadd.f32 %v4897_v38, %v981_v30  ;;  %v976_v1 = vadd.f32 %v975_v0, %v6246_v18  ;;  %5201 = vmatprep.mubr.msk.f32.mxu0 %vm315_vm3, %v7253_v14  ;;  %v3035_v18 = vld [vmem:[#allocation2 + $0x121] sm:$0xff] }
 0x13d   : > { %v4850_v9 = vpop.f32.mrf.mxu1  ;;  %5149 = vmatmul.mubr.msk.f32.gmra.mxu1 %vm315_vm3, %v3032_v43  ;;  %v1343_v35 = vpop.f32.mrf.mxu0 }
 0x13e   : > { %v6350_v44 = vadd.f32 %v1333_v16, %v976_v1  ;;  %v991_v56 = vadd.f32 %v4850_v9, %v6130_v63  ;;  %5151 = vmatprep.mubr.msk.f32.mxu1 %vm315_vm3, %v3033_v22  ;;  %v3431_v16 = vld [vmem:[#allocation2 + $0x16a] sm:$0xff]  ;;  %v3432_v1 = vld [vmem:[#allocation2 + $0x172] sm:$0xff] }
 0x13f   : > { %v985_v12 = vpop.f32.mrf.mxu1  ;;  %v4903_v49 = vpop.f32.mrf.mxu0  ;;  %5202 = vmatmul.mubr.msk.f32.gmra.mxu0 %vm315_vm3, %v7254_v23 }
 0x140   : > { %v6356_v6 = vadd.f32 %v4900_v31, %v991_v56  ;;  %v986_v14 = vadd.f32 %v985_v12, %v6136_v2  ;;  %5204 = vmatprep.mubr.msk.f32.mxu0 %vm315_vm3, %v7255_v26  ;;  %v3037_v2 = vld [vmem:[#allocation2 + $0x139] sm:$0xff] }
 0x141   : > { %v4853_v13 = vpop.f32.mrf.mxu1  ;;  %5152 = vmatmul.mubr.msk.f32.gmra.mxu1 %vm315_vm3, %v3034_v37  ;;  %v1353_v63 = vpop.f32.mrf.mxu0  ;;  %v3042_v37 = vld [vmem:[#allocation2 + $0x171] sm:$0xff] }
 0x142   : > { %v6362_v57 = vadd.f32 %v1343_v35, %v986_v14  ;;  %v1001_v48 = vadd.f32 %v4853_v13, %v6144_v10  ;;  %5154 = vmatprep.mubr.msk.f32.mxu1 %vm315_vm3, %v3035_v18 }
 0x143   : > { %v995_v23 = vpop.f32.mrf.mxu1  ;;  %v4906_v58 = vpop.f32.mrf.mxu0  ;;  %5205 = vmatmul.mubr.msk.f32.gmra.mxu0 %vm315_vm3, %v7256_v33 }
 0x144   : > { %v6368_v20 = vadd.f32 %v4903_v49, %v1001_v48  ;;  %v996_v26 = vadd.f32 %v995_v23, %v6152_v15  ;;  %5207 = vmatprep.mubr.msk.f32.mxu0 %vm315_vm3, %v7257_v46  ;;  %v3039_v15 = vld [vmem:[#allocation2 + $0x151] sm:$0xff] }
 0x145   : > { %v4856_v3 = vpop.f32.mrf.mxu1  ;;  %5155 = vmatmul.mubr.msk.f32.gmra.mxu1 %vm315_vm3, %v3036_v50  ;;  %v1363_v10 = vpop.f32.mrf.mxu0  ;;  %v7267_v50 = vld [vmem:[#allocation38_spill] sm:$0xff] }
 0x146   : > { %v6374_v17 = vadd.f32 %v1353_v63, %v996_v26  ;;  %v1011_v51 = vadd.f32 %v4856_v3, %v6160_v21  ;;  %5157 = vmatprep.mubr.msk.f32.mxu1 %vm315_vm3, %v3037_v2  ;;  %v3435_v63 = vld [vmem:[#allocation2 + $0x19a] sm:$0xff]  ;;  %v7268_v2 = vld [vmem:[#allocation12_spill] sm:$0xff] }
 0x147   : > { %v1005_v33 = vpop.f32.mrf.mxu1  ;;  %v4909_v38 = vpop.f32.mrf.mxu0  ;;  %5208 = vmatmul.mubr.msk.f32.gmra.mxu0 %vm315_vm3, %v7258_v42  ;;  %v3040_v42 = vld [vmem:[#allocation2 + $0x159] sm:$0xff] }
 0x148   : > { %v6380_v27 = vadd.f32 %v4906_v58, %v1011_v51  ;;  %v1006_v46 = vadd.f32 %v1005_v33, %v6168_v29  ;;  %5210 = vmatprep.mubr.msk.f32.mxu0 %vm315_vm3, %v7259_v52  ;;  %v3041_v29 = vld [vmem:[#allocation2 + $0x169] sm:$0xff] }
 0x149   : > { %v4859_v53 = vpop.f32.mrf.mxu1  ;;  %5158 = vmatmul.mubr.msk.f32.gmra.mxu1 %vm315_vm3, %v3038_v60  ;;  %v1373_v21 = vpop.f32.mrf.mxu0  ;;  %v7270_v60 = vld [vmem:[#allocation9_spill] sm:$0xff] }
 0x14a   : > { %v6386_v30 = vadd.f32 %v1363_v10, %v1006_v46  ;;  %v1021_v43 = vadd.f32 %v4859_v53, %v6176_v19  ;;  %5160 = vmatprep.mubr.msk.f32.mxu1 %vm315_vm3, %v3039_v15  ;;  %v3436_v10 = vld [vmem:[#allocation2 + $0x1a2] sm:$0xff] }
 0x14b   : > { %v1015_v0 = vpop.f32.mrf.mxu1  ;;  %v4912_v31 = vpop.f32.mrf.mxu0  ;;  %5211 = vmatmul.mubr.msk.f32.gmra.mxu0 %vm315_vm3, %v3430_v61  ;;  %v3046_v46 = vld [vmem:[#allocation2 + $0x1a1] sm:$0xff] }
 0x14c   : > { %v6391_v22 = vadd.f32 %v4909_v38, %v1021_v43  ;;  %v1016_v52 = vadd.f32 %v1015_v0, %v6184_v47  ;;  %5213 = vmatprep.mubr.msk.f32.mxu0 %vm315_vm3, %v3431_v16  ;;  %v7271_v38 = vld [vmem:[#allocation11_spill] sm:$0xff]  ;;  %v7272_v16 = vld [vmem:[#allocation13_spill] sm:$0xff] }
 0x14d   : > { %v4862_v9 = vpop.f32.mrf.mxu1  ;;  %5161 = vmatmul.mubr.msk.f32.gmra.mxu1 %vm315_vm3, %v3040_v42  ;;  %v1383_v35 = vpop.f32.mrf.mxu0 }
 0x14e   : > { %v6396_v19 = vadd.f32 %v1373_v21, %v1016_v52  ;;  %v1031_v56 = vadd.f32 %v4862_v9, %v6192_v11  ;;  %5163 = vmatprep.mubr.msk.f32.mxu1 %vm315_vm3, %v3041_v29  ;;  %v7273_v29 = vld [vmem:[#allocation14_spill] sm:$0xff] }
 0x14f   : > { %v1025_v12 = vpop.f32.mrf.mxu1  ;;  %v4915_v49 = vpop.f32.mrf.mxu0  ;;  %5214 = vmatmul.mubr.msk.f32.gmra.mxu0 %vm315_vm3, %v3432_v1 }
 0x150   : > { %v6401_v18 = vadd.f32 %v4912_v31, %v1031_v56  ;;  %v1026_v47 = vadd.f32 %v1025_v12, %v6200_v54  ;;  %5216 = vmatprep.mubr.msk.f32.mxu0 %vm315_vm3, %v6222_v4  ;;  %v3045_v54 = vld [vmem:[#allocation2 + $0x199] sm:$0xff]  ;;  %v7274_v56 = vld [vmem:[#allocation15_spill] sm:$0xff] }
 0x151   : > { %v4865_v14 = vpop.f32.mrf.mxu1  ;;  %5164 = vmatmul.mubr.msk.f32.gmra.mxu1 %vm315_vm3, %v3042_v37  ;;  %v1393_v13 = vpop.f32.mrf.mxu0  ;;  %v7269_v4 = vld [vmem:[#allocation10_spill] sm:$0xff] }
 0x152   : > { %v6407_v11 = vadd.f32 %v1383_v35, %v1026_v47  ;;  %v1041_v48 = vadd.f32 %v4865_v14, %v6208_v7  ;;  %5166 = vmatprep.mubr.msk.f32.mxu1 %vm315_vm3, %v7267_v50 }
 0x153   : > { %v1035_v23 = vpop.f32.mrf.mxu1  ;;  %v4918_v58 = vpop.f32.mrf.mxu0  ;;  %5217 = vmatmul.mubr.msk.f32.gmra.mxu0 %vm315_vm3, %v7268_v2 }
 0x154   : > { %v6414_v26 = vadd.f32 %v4915_v49, %v1041_v48  ;;  %v1036_v3 = vadd.f32 %v1035_v23, %v7269_v4  ;;  %5219 = vmatprep.mubr.msk.f32.mxu0 %vm315_vm3, %v3435_v63 }
 0x155   : > { %v4868_v51 = vpop.f32.mrf.mxu1  ;;  %5167 = vmatmul.mubr.msk.f32.gmra.mxu1 %vm315_vm3, %v7270_v60  ;;  %v1403_v7 = vpop.f32.mrf.mxu0 }
 0x156   : > { %v6420_v33 = vadd.f32 %v1393_v13, %v1036_v3  ;;  %v1051_v15 = vadd.f32 %v4868_v51, %v7271_v38  ;;  %5169 = vmatprep.mubr.msk.f32.mxu1 %vm315_vm3, %v3045_v54 }
 0x157   : > { %v1045_v61 = vpop.f32.mrf.mxu1  ;;  %v4921_v53 = vpop.f32.mrf.mxu0  ;;  %5220 = vmatmul.mubr.msk.f32.gmra.mxu0 %vm315_vm3, %v3436_v10 }
 0x158   : > { %v6425_v21 = vadd.f32 %v4918_v58, %v1051_v15  ;;  %v1046_v43 = vadd.f32 %v1045_v61, %v7272_v16 }
 0x159   : > { %v4871_v42 = vpop.f32.mrf.mxu1  ;;  %5170 = vmatmul.mubr.msk.f32.gmra.mxu1 %vm315_vm3, %v3046_v46  ;;  %v1413_v0 = vpop.f32.mrf.mxu0 }
 0x15a   : > { %v6429_v31 = vadd.f32 %v1403_v7, %v1046_v43  ;;  %v1061_v52 = vadd.f32 %v4871_v42, %v7273_v29 }
 0x15b   : > { %v1055_v1 = vpop.f32.mrf.mxu1  ;;  %v4976_v9 = vpop.f32.mrf.mxu0 }
 0x15c   : > { %v6432_v35 = vadd.f32 %v4921_v53, %v1061_v52  ;;  %v1056_v37 = vadd.f32 %v1055_v1, %v7274_v56 }
 0x15d   : > { %v4926_v12 = vpop.f32.mrf.mxu1  ;;  %v2043_v49 = vpop.f32.mrf.mxu0 }
 0x15e   : > { %v6435_v47 = vadd.f32 %v1413_v0, %v1056_v37  ;;  %v1813_v14 = vadd.f32 %v4926_v12, %v6260_v39 }
 0x15f   : > { %v1653_v13 = vpop.f32.mrf.mxu1  ;;  %v4979_v63 = vpop.f32.mrf.mxu0 }
 0x160   : > { %v6438_v48 = vadd.f32 %v4976_v9, %v1813_v14  ;;  %v1812_v50 = vadd.f32 %v1653_v13, %v6266_v5 }
 0x161   : > { %v4929_v23 = vpop.f32.mrf.mxu1  ;;  %v2053_v58 = vpop.f32.mrf.mxu0 }
 0x162   : > { %v6441_v2 = vadd.f32 %v2043_v49, %v1812_v50  ;;  %v1815_v54 = vadd.f32 %v4929_v23, %v6272_v62 }
 0x163   : > { %v1663_v4 = vpop.f32.mrf.mxu1  ;;  %v4982_v3 = vpop.f32.mrf.mxu0 }
 0x164   : > { %v6444_v10 = vadd.f32 %v4979_v63, %v1815_v54  ;;  %v1814_v51 = vadd.f32 %v1663_v4, %v6278_v28 }
 0x165   : > { %v4932_v60 = vpop.f32.mrf.mxu1  ;;  %v2063_v39 = vpop.f32.mrf.mxu0 }
 0x166   : > { %v6447_v7 = vadd.f32 %v2053_v58, %v1814_v51  ;;  %v1817_v38 = vadd.f32 %v4932_v60, %v6284_v8 }
 0x167   : > { %v1673_v15 = vpop.f32.mrf.mxu1  ;;  %v4985_v5 = vpop.f32.mrf.mxu0 }
 0x168   : > { %v6450_v46 = vadd.f32 %v4982_v3, %v1817_v38  ;;  %v1816_v61 = vadd.f32 %v1673_v15, %v6290_v40 }
 0x169   : > { %v4935_v53 = vpop.f32.mrf.mxu1  ;;  %v2073_v62 = vpop.f32.mrf.mxu0 }
 0x16a   : > { %v6453_v16 = vadd.f32 %v2063_v39, %v1816_v61  ;;  %v1819_v43 = vadd.f32 %v4935_v53, %v6296_v24 }
 0x16b   : > { %v1683_v42 = vpop.f32.mrf.mxu1  ;;  %v4988_v28 = vpop.f32.mrf.mxu0 }
 0x16c   : > { %v6456_v0 = vadd.f32 %v4985_v5, %v1819_v43  ;;  %v1818_v29 = vadd.f32 %v1683_v42, %v6302_v34 }
 0x16d   : > { %v4938_v52 = vpop.f32.mrf.mxu1  ;;  %v2083_v8 = vpop.f32.mrf.mxu0 }
 0x16e   : > { %v6459_v1 = vadd.f32 %v2073_v62, %v1818_v29  ;;  %v1821_v9 = vadd.f32 %v4938_v52, %v6308_v32 }
 0x16f   : > { %v1693_v56 = vpop.f32.mrf.mxu1  ;;  %v4991_v40 = vpop.f32.mrf.mxu0 }
 0x170   : > { %v6462_v37 = vadd.f32 %v4988_v28, %v1821_v9  ;;  %v1820_v12 = vadd.f32 %v1693_v56, %v6314_v45 }
 0x171   : > { %v4941_v49 = vpop.f32.mrf.mxu1  ;;  %v2093_v24 = vpop.f32.mrf.mxu0 }
 0x172   : > { %v6465_v14 = vadd.f32 %v2083_v8, %v1820_v12  ;;  %v1823_v13 = vadd.f32 %v4941_v49, %v6320_v36 }
 0x173   : > { %v1703_v63 = vpop.f32.mrf.mxu1  ;;  %v4994_v34 = vpop.f32.mrf.mxu0 }
 0x174   : > { %v6468_v50 = vadd.f32 %v4991_v40, %v1823_v13  ;;  %v1822_v23 = vadd.f32 %v1703_v63, %v6326_v59 }
 0x175   : > { %v4944_v58 = vpop.f32.mrf.mxu1  ;;  %v2103_v32 = vpop.f32.mrf.mxu0 }
 0x176   : > { %v6471_v54 = vadd.f32 %v2093_v24, %v1822_v23  ;;  %v1825_v4 = vadd.f32 %v4944_v58, %v6332_v25 }
 0x177   : > { %v1713_v3 = vpop.f32.mrf.mxu1  ;;  %v4997_v45 = vpop.f32.mrf.mxu0 }
 0x178   : > { %v6474_v51 = vadd.f32 %v4994_v34, %v1825_v4  ;;  %v1824_v60 = vadd.f32 %v1713_v3, %v6338_v41 }
 0x179   : > { %v4947_v39 = vpop.f32.mrf.mxu1  ;;  %v2113_v36 = vpop.f32.mrf.mxu0 }
 0x17a   : > { %v6477_v38 = vadd.f32 %v2103_v32, %v1824_v60  ;;  %v1827_v15 = vadd.f32 %v4947_v39, %v6344_v55 }
 0x17b   : > { %v1723_v5 = vpop.f32.mrf.mxu1  ;;  %v5000_v59 = vpop.f32.mrf.mxu0 }
 0x17c   : > { %v6480_v61 = vadd.f32 %v4997_v45, %v1827_v15  ;;  %v1826_v53 = vadd.f32 %v1723_v5, %v6350_v44 }
 0x17d   : > { %v4950_v62 = vpop.f32.mrf.mxu1  ;;  %v2123_v25 = vpop.f32.mrf.mxu0 }
 0x17e   : > { %v6483_v43 = vadd.f32 %v2113_v36, %v1826_v53  ;;  %v1829_v42 = vadd.f32 %v4950_v62, %v6356_v6 }
 0x17f   : > { %v1733_v28 = vpop.f32.mrf.mxu1  ;;  %v5003_v41 = vpop.f32.mrf.mxu0 }
 0x180   : > { %v6486_v29 = vadd.f32 %v5000_v59, %v1829_v42  ;;  %v1828_v52 = vadd.f32 %v1733_v28, %v6362_v57 }
 0x181   : > { %v4953_v8 = vpop.f32.mrf.mxu1  ;;  %v2133_v55 = vpop.f32.mrf.mxu0 }
 0x182   : > { %v6489_v9 = vadd.f32 %v2123_v25, %v1828_v52  ;;  %v1831_v56 = vadd.f32 %v4953_v8, %v6368_v20 }
 0x183   : > { %v1743_v40 = vpop.f32.mrf.mxu1  ;;  %v5006_v44 = vpop.f32.mrf.mxu0 }
 0x184   : > { %v6492_v12 = vadd.f32 %v5003_v41, %v1831_v56  ;;  %v1830_v49 = vadd.f32 %v1743_v40, %v6374_v17 }
 0x185   : > { %v4956_v24 = vpop.f32.mrf.mxu1  ;;  %v2143_v6 = vpop.f32.mrf.mxu0 }
 0x186   : > { %7275 = vst [vmem:[#allocation16_spill] sm:$0xff] %v6492_v12  ;;  %v6495_v13 = vadd.f32 %v2133_v55, %v1830_v49  ;;  %v1833_v63 = vadd.f32 %v4956_v24, %v6380_v27 }
 0x187   : > { %v1753_v34 = vpop.f32.mrf.mxu1  ;;  %v5009_v57 = vpop.f32.mrf.mxu0 }
 0x188   : > { %7276 = vst [vmem:[#allocation17_spill] sm:$0xff] %v6495_v13  ;;  %v6498_v23 = vadd.f32 %v5006_v44, %v1833_v63  ;;  %v1832_v58 = vadd.f32 %v1753_v34, %v6386_v30 }
 0x189   : > { %v4959_v32 = vpop.f32.mrf.mxu1  ;;  %v2153_v20 = vpop.f32.mrf.mxu0 }
 0x18a   : > { %7277 = vst [vmem:[#allocation18_spill] sm:$0xff] %v6498_v23  ;;  %v6501_v4 = vadd.f32 %v2143_v6, %v1832_v58  ;;  %v1835_v3 = vadd.f32 %v4959_v32, %v6391_v22 }
 0x18b   : > { %v1763_v45 = vpop.f32.mrf.mxu1  ;;  %v5012_v17 = vpop.f32.mrf.mxu0 }
 0x18c   : > { %7278 = vst [vmem:[#allocation19_spill] sm:$0xff] %v6501_v4  ;;  %v6504_v60 = vadd.f32 %v5009_v57, %v1835_v3  ;;  %v1834_v39 = vadd.f32 %v1763_v45, %v6396_v19 }
 0x18d   : > { %v4962_v36 = vpop.f32.mrf.mxu1  ;;  %v2163_v27 = vpop.f32.mrf.mxu0 }
 0x18e   : > { %7279 = vst [vmem:[#allocation20_spill] sm:$0xff] %v6504_v60  ;;  %v6507_v15 = vadd.f32 %v2153_v20, %v1834_v39  ;;  %v1837_v5 = vadd.f32 %v4962_v36, %v6401_v18 }
 0x18f   : > { %v1773_v59 = vpop.f32.mrf.mxu1  ;;  %v5015_v30 = vpop.f32.mrf.mxu0 }
 0x190   : > { %7280 = vst [vmem:[#allocation21_spill] sm:$0xff] %v6507_v15  ;;  %v6510_v53 = vadd.f32 %v5012_v17, %v1837_v5  ;;  %v1836_v62 = vadd.f32 %v1773_v59, %v6407_v11 }
 0x191   : > { %v4965_v25 = vpop.f32.mrf.mxu1  ;;  %v2173_v22 = vpop.f32.mrf.mxu0 }
 0x192   : > { %7281 = vst [vmem:[#allocation22_spill] sm:$0xff] %v6510_v53  ;;  %v6513_v42 = vadd.f32 %v2163_v27, %v1836_v62  ;;  %v1839_v28 = vadd.f32 %v4965_v25, %v6414_v26 }
 0x193   : > { %v1783_v41 = vpop.f32.mrf.mxu1  ;;  %v5018_v19 = vpop.f32.mrf.mxu0 }
 0x194   : > { %7282 = vst [vmem:[#allocation23_spill] sm:$0xff] %v6513_v42  ;;  %v6516_v52 = vadd.f32 %v5015_v30, %v1839_v28  ;;  %v1838_v8 = vadd.f32 %v1783_v41, %v6420_v33 }
 0x195   : > { %v4968_v55 = vpop.f32.mrf.mxu1  ;;  %v2183_v18 = vpop.f32.mrf.mxu0 }
 0x196   : > { %7283 = vst [vmem:[#allocation24_spill] sm:$0xff] %v6516_v52  ;;  %v6519_v56 = vadd.f32 %v2173_v22, %v1838_v8  ;;  %v1841_v40 = vadd.f32 %v4968_v55, %v6425_v21 }
 0x197   : > { %v1793_v44 = vpop.f32.mrf.mxu1  ;;  %v5021_v11 = vpop.f32.mrf.mxu0 }
 0x198   : > { %7284 = vst [vmem:[#allocation25_spill] sm:$0xff] %v6519_v56  ;;  %v6522_v49 = vadd.f32 %v5018_v19, %v1841_v40  ;;  %v1840_v24 = vadd.f32 %v1793_v44, %v6429_v31 }
 0x199   : > { %v4971_v6 = vpop.f32.mrf.mxu1  ;;  %v2193_v26 = vpop.f32.mrf.mxu0 }
 0x19a   : > { %7285 = vst [vmem:[#allocation26_spill] sm:$0xff] %v6522_v49  ;;  %v6525_v63 = vadd.f32 %v2183_v18, %v1840_v24  ;;  %v1843_v34 = vadd.f32 %v4971_v6, %v6432_v35 }
 0x19b   : > { %v1803_v57 = vpop.f32.mrf.mxu1  ;;  %v6528_v33 = vpop.f32.mrf.mxu0 }
 0x19c   : > { %7286 = vst [vmem:[#allocation27_spill] sm:$0xff] %v6525_v63  ;;  %v6530_v58 = vadd.f32 %v5021_v11, %v1843_v34  ;;  %v1842_v32 = vadd.f32 %v1803_v57, %v6435_v47 }
 0x19d   : > { %v5026_v21 = vpop.f32.mrf.mxu1  ;;  %v6533_v20 = vpop.f32.mrf.mxu0 }
 0x19e   : > { %7287 = vst [vmem:[#allocation28_spill] sm:$0xff] %v6530_v58  ;;  %v6535_v3 = vadd.f32 %v2193_v26, %v1842_v32 }
 0x19f   : > { %v2433_v45 = vpop.f32.mrf.mxu1  ;;  %v6537_v31 = vpop.f32.mrf.mxu0 }
 0x1a0   : > { %7288 = vst [vmem:[#allocation29_spill] sm:$0xff] %v6535_v3 }
 0x1a1   : > { %v6539_v17 = vpop.f32.mrf.mxu1  ;;  %v6541_v39 = vpop.f32.mrf.mxu0 }
 0x1a3   : > { %v6543_v35 = vpop.f32.mrf.mxu1  ;;  %v6545_v36 = vpop.f32.mrf.mxu0 }
 0x1a5   : > { %v6547_v27 = vpop.f32.mrf.mxu1  ;;  %v6549_v5 = vpop.f32.mrf.mxu0 }
 0x1a7   : > { %v6551_v47 = vpop.f32.mrf.mxu1  ;;  %v6553_v59 = vpop.f32.mrf.mxu0 }
 0x1a9   : > { %v6555_v30 = vpop.f32.mrf.mxu1  ;;  %v6557_v62 = vpop.f32.mrf.mxu0 }
 0x1ab   : > { %v6559_v25 = vpop.f32.mrf.mxu1  ;;  %v6561_v22 = vpop.f32.mrf.mxu0 }
 0x1ad   : > { %v6563_v28 = vpop.f32.mrf.mxu1  ;;  %v6565_v41 = vpop.f32.mrf.mxu0 }
 0x1af   : > { %v6567_v19 = vpop.f32.mrf.mxu1  ;;  %v6569_v8 = vpop.f32.mrf.mxu0 }
 0x1b1   : > { %v6571_v55 = vpop.f32.mrf.mxu1  ;;  %v6573_v18 = vpop.f32.mrf.mxu0 }
 0x1b3   : > { %v6575_v40 = vpop.f32.mrf.mxu1  ;;  %v6577_v44 = vpop.f32.mrf.mxu0 }
 0x1b5   : > { %v6579_v11 = vpop.f32.mrf.mxu1  ;;  %v6581_v24 = vpop.f32.mrf.mxu0 }
 0x1b7   : > { %v6583_v6 = vpop.f32.mrf.mxu1  ;;  %v6585_v26 = vpop.f32.mrf.mxu0 }
 0x1b9   : > { %v6587_v34 = vpop.f32.mrf.mxu1  ;;  %v6589_v57 = vpop.f32.mrf.mxu0 }
 0x1bb   : > { %v6591_v32 = vpop.f32.mrf.mxu1  ;;  %v6593_v3 = vpop.f32.mrf.mxu0 }
 0x1bd   : > { %v6595_v58 = vpop.f32.mrf.mxu1  ;;  %v6597_v63 = vpop.f32.mrf.mxu0 }
 0x1be   : > { %7289 = vst [vmem:[#allocation30_spill] sm:$0xff] %v6597_v63 }
 0x1bf   : > { %v6599_v49 = vpop.f32.mrf.mxu1  ;;  %v6601_v56 = vpop.f32.mrf.mxu0 }
 0x1c0   : > { %7290 = vst [vmem:[#allocation31_spill] sm:$0xff] %v6601_v56 }
 0x1c1   : > { %v6603_v52 = vpop.f32.mrf.mxu1  ;;  %v6605_v42 = vpop.f32.mrf.mxu0 }
 0x1c2   : > { %7291 = vst [vmem:[#allocation32_spill] sm:$0xff] %v6603_v52  ;;  %7292 = vst [vmem:[#allocation33_spill] sm:$0xff] %v6605_v42 }
 0x1c3   : > { %v6607_v53 = vpop.f32.mrf.mxu1  ;;  %v6609_v15 = vpop.f32.mrf.mxu0 }
 0x1c4   : > { %7293 = vst [vmem:[#allocation34_spill] sm:$0xff] %v6607_v53  ;;  %7294 = vst [vmem:[#allocation35_spill] sm:$0xff] %v6609_v15 }
 0x1c5   : > { %v6611_v60 = vpop.f32.mrf.mxu1  ;;  %v6613_v4 = vpop.f32.mrf.mxu0 }
 0x1c6   : > { %7295 = vst [vmem:[#allocation36_spill] sm:$0xff] %v6611_v60  ;;  %7296 = vst [vmem:[#allocation37_spill] sm:$0xff] %v6613_v4 }
 0x1c7   : > { %v6615_v23 = vpop.f32.mrf.mxu1  ;;  %v6617_v13 = vpop.f32.mrf.mxu0 }
 0x1c8   : > { %7297 = vst [vmem:[#allocation38_spill] sm:$0xff] %v6615_v23  ;;  %7298 = vst [vmem:[#allocation12_spill] sm:$0xff] %v6617_v13 }
 0x1c9   : > { %v6619_v63 = vpop.f32.mrf.mxu1  ;;  %v6621_v12 = vpop.f32.mrf.mxu0 }
 0x1ca   : > { %7299 = vst [vmem:[#allocation10_spill] sm:$0xff] %v6619_v63  ;;  %7300 = vst [vmem:[#allocation9_spill] sm:$0xff] %v6621_v12 }
 0x1cb   : > { %v6623_v56 = vpop.f32.mrf.mxu1  ;;  %v6625_v52 = vpop.f32.mrf.mxu0 }
 0x1cc   : > { %7301 = vst [vmem:[#allocation11_spill] sm:$0xff] %v6623_v56  ;;  %7302 = vst [vmem:[#allocation13_spill] sm:$0xff] %v6625_v52 }
 0x1cd   : > { %v6627_v42 = vpop.f32.mrf.mxu1  ;;  %v6629_v53 = vpop.f32.mrf.mxu0 }
 0x1ce   : > { %7303 = vst [vmem:[#allocation14_spill] sm:$0xff] %v6627_v42  ;;  %7304 = vst [vmem:[#allocation15_spill] sm:$0xff] %v6629_v53  ;;  %v2593_v53 = vadd.f32 %v5026_v21, %v6438_v48  ;;  %v2594_v48 = vadd.f32 %v6543_v35, %v6447_v7 }
 0x1cf   : > { %v6631_v15 = vpop.f32.mrf.mxu1  ;;  %v6633_v60 = vpop.f32.mrf.mxu0 }
 0x1d0   : > { %7305 = vst [vmem:[#allocation39_spill] sm:$0xff] %v6631_v15  ;;  %7306 = vst [vmem:[#allocation40_spill] sm:$0xff] %v6633_v60 }
 0x1d1   : > { %v6635_v4 = vpop.f32.mrf.mxu1  ;;  %v6637_v23 = vpop.f32.mrf.mxu0 }
 0x1d2   : > { %7307 = vst [vmem:[#allocation41_spill] sm:$0xff] %v6635_v4  ;;  %7308 = vst [vmem:[#allocation42_spill] sm:$0xff] %v6637_v23  ;;  %v2592_v23 = vadd.f32 %v2433_v45, %v6441_v2  ;;  %v6670_v2 = vld [vmem:[%s7140_s2] ss:$0 sm:$0xff] }
 0x1d3   : > { %v6639_v13 = vpop.f32.mrf.mxu1  ;;  %v6641_v63 = vpop.f32.mrf.mxu0 }
 0x1d4   : > { %7309 = vst [vmem:[#allocation43_spill] sm:$0xff] %v6639_v13  ;;  %7310 = vst [vmem:[#allocation44_spill] sm:$0xff] %v6641_v63  ;;  %v2984_v63 = vadd.f32 %v6528_v33, %v2593_v53 }
 0x1d5   : > { %v6643_v12 = vpop.f32.mrf.mxu1  ;;  %v6645_v56 = vpop.f32.mrf.mxu0 }
 0x1d6   : > { %7311 = vst [vmem:[#allocation45_spill] sm:$0xff] %v6643_v12  ;;  %7312 = vst [vmem:[#allocation46_spill] sm:$0xff] %v6645_v56  ;;  %v2595_v56 = vadd.f32 %v6539_v17, %v6444_v10 }
 0x1d7   : > { %v6647_v52 = vpop.f32.mrf.mxu1  ;;  %v6649_v42 = vpop.f32.mrf.mxu0 }
 0x1d8   : > { %7313 = vst [vmem:[#allocation47_spill] sm:$0xff] %v6647_v52  ;;  %7314 = vst [vmem:[#allocation48_spill] sm:$0xff] %v6649_v42  ;;  %v2983_v42 = vadd.f32 %v6533_v20, %v2592_v23  ;;  %v2986_v10 = vadd.f32 %v6537_v31, %v2595_v56  ;;  %v2596_v23 = vadd.f32 %v6551_v47, %v6453_v16 }
 0x1d9   : > { %v6652_v15 = vpop.f32.mrf.mxu1  ;;  %v6654_v60 = vpop.f32.mrf.mxu0 }
 0x1da   : > { %7315 = vst [vmem:[#allocation49_spill] sm:$0xff] %v6652_v15  ;;  %7316 = vst [vmem:[#allocation50_spill] sm:$0xff] %v6654_v60  ;;  %v2597_v60 = vadd.f32 %v6547_v27, %v6450_v46  ;;  %v2987_v31 = vadd.f32 %v6549_v5, %v2596_v23 }
 0x1db   : > { %v6657_v4 = vpop.f32.mrf.mxu1  ;;  %v5176_v13 = vpop.f32.mrf.mxu0 }
 0x1dc   : > { %7317 = vst [vmem:[#allocation51_spill] sm:$0xff] %v6657_v4  ;;  %v2988_v27 = vadd.f32 %v6545_v36, %v2597_v60  ;;  %v2598_v60 = vadd.f32 %v6559_v25, %v6459_v1 }
 0x1dd   : > { %v5126_v12 = vpop.f32.mrf.mxu1  ;;  %v3604_v52 = vpop.f32.mrf.mxu0 }
 0x1de   : > { %v3374_v21 = vadd.f32 %v5126_v12, %v2984_v63  ;;  %v2985_v63 = vadd.f32 %v6541_v39, %v2594_v48 }
 0x1df   : > { %v3214_v53 = vpop.f32.mrf.mxu1  ;;  %v5179_v33 = vpop.f32.mrf.mxu0 }
 0x1e0   : > { %v3764_v45 = vadd.f32 %v5176_v13, %v3374_v21  ;;  %v3373_v17 = vadd.f32 %v3214_v53, %v2983_v42  ;;  %v2599_v13 = vadd.f32 %v6555_v30, %v6456_v0  ;;  %v2601_v30 = vadd.f32 %v6563_v28, %v6462_v37 }
 0x1e1   : > { %v5129_v7 = vpop.f32.mrf.mxu1  ;;  %v3614_v12 = vpop.f32.mrf.mxu0  ;;  %v2600_v53 = vadd.f32 %v6567_v19, %v6465_v14  ;;  %v2989_v37 = vadd.f32 %v6557_v62, %v2598_v60  ;;  %v2603_v14 = vadd.f32 %v6571_v55, %v6468_v50 }
 0x1e2   : > { %v6677_v46 = vadd.f32 %v6670_v2, %v3764_v45  ;;  %v3763_v20 = vadd.f32 %v3604_v52, %v3373_v17  ;;  %v3376_v35 = vadd.f32 %v5129_v7, %v2986_v10  ;;  %v2990_v5 = vadd.f32 %v6553_v59, %v2599_v13 }
 0x1e3   : > { %v3224_v4 = vpop.f32.mrf.mxu1  ;;  %v5182_v15 = vpop.f32.mrf.mxu0  ;;  %v2992_v17 = vadd.f32 %v6561_v22, %v2601_v30  ;;  %v2602_v22 = vadd.f32 %v6575_v40, %v6471_v54 }
 0x1e4   : > { %3835 = vst.msk [vmem:[%s5366_s27 + $0x8] sm:$0xff] %vm315_vm3, %v6677_v46  ;;  %v6686_v16 = vadd.f32 %v6670_v2, %v3763_v20  ;;  %v3766_v42 = vadd.f32 %v5179_v33, %v3376_v35  ;;  %v3375_v56 = vadd.f32 %v3224_v4, %v2985_v63 }
 0x1e5   : > { %v5132_v52 = vpop.f32.mrf.mxu1  ;;  %v3624_v39 = vpop.f32.mrf.mxu0 }
 0x1e6   : > { %3834 = vst.msk [vmem:[%s5366_s27] sm:$0xff] %vm315_vm3, %v6686_v16  ;;  %v6695_v0 = vadd.f32 %v6670_v2, %v3766_v42  ;;  %v3765_v36 = vadd.f32 %v3614_v12, %v3375_v56  ;;  %v3378_v47 = vadd.f32 %v5132_v52, %v2988_v27  ;;  %v2991_v12 = vadd.f32 %v6565_v41, %v2600_v53 }
 0x1e7   : > { %v3234_v4 = vpop.f32.mrf.mxu1  ;;  %v5185_v48 = vpop.f32.mrf.mxu0  ;;  %v2605_v27 = vadd.f32 %v6579_v11, %v6474_v51  ;;  %v2994_v41 = vadd.f32 %v6569_v8, %v2603_v14  ;;  %v2993_v51 = vadd.f32 %v6573_v18, %v2602_v22  ;;  %v2609_v53 = vadd.f32 %v6595_v58, %v6486_v29 }
 0x1e8   : > { %3837 = vst.msk [vmem:[%s5366_s27 + $0x18] sm:$0xff] %vm315_vm3, %v6695_v0  ;;  %v6704_v1 = vadd.f32 %v6670_v2, %v3765_v36  ;;  %v3768_v25 = vadd.f32 %v5182_v15, %v3378_v47  ;;  %v3377_v21 = vadd.f32 %v3234_v4, %v2987_v31  ;;  %v2604_v31 = vadd.f32 %v6583_v6, %v6477_v38 }
 0x1e9   : > { %v5135_v33 = vpop.f32.mrf.mxu1  ;;  %v3634_v10 = vpop.f32.mrf.mxu0  ;;  %v2996_v36 = vadd.f32 %v6577_v44, %v2605_v27  ;;  %v2607_v38 = vadd.f32 %v6587_v34, %v6480_v61  ;;  %v2606_v44 = vadd.f32 %v6591_v32, %v6483_v43  ;;  %v7321_v27 = vld [vmem:[#allocation17_spill] sm:$0xff] }
 0x1ea   : > { %3836 = vst.msk [vmem:[%s5366_s27 + $0x10] sm:$0xff] %vm315_vm3, %v6704_v1  ;;  %v6713_v59 = vadd.f32 %v6670_v2, %v3768_v25  ;;  %v3767_v28 = vadd.f32 %v3624_v39, %v3377_v21  ;;  %v3380_v45 = vadd.f32 %v5135_v33, %v2990_v5 }
 0x1eb   : > { %v3244_v15 = vpop.f32.mrf.mxu1  ;;  %v5188_v23 = vpop.f32.mrf.mxu0  ;;  %v2997_v29 = vadd.f32 %v6589_v57, %v2606_v44 }
 0x1ec   : > { %3839 = vst.msk [vmem:[%s5366_s27 + $0x28] sm:$0xff] %vm315_vm3, %v6713_v59  ;;  %v6722_v62 = vadd.f32 %v6670_v2, %v3767_v28  ;;  %v3770_v19 = vadd.f32 %v5185_v48, %v3380_v45  ;;  %v3379_v7 = vadd.f32 %v3244_v15, %v2989_v37  ;;  %v2995_v48 = vadd.f32 %v6581_v24, %v2604_v31  ;;  %v7324_v31 = vld [vmem:[#allocation36_spill] sm:$0xff] }
 0x1ed   : > { %v5138_v63 = vpop.f32.mrf.mxu1  ;;  %v3644_v20 = vpop.f32.mrf.mxu0  ;;  %v2998_v24 = vadd.f32 %v6585_v26, %v2607_v38  ;;  %v2608_v28 = vadd.f32 %v6599_v49, %v6489_v9  ;;  %v7326_v38 = vld [vmem:[#allocation19_spill] sm:$0xff] }
 0x1ee   : > { %3838 = vst.msk [vmem:[%s5366_s27 + $0x20] sm:$0xff] %vm315_vm3, %v6722_v62  ;;  %v6731_v50 = vadd.f32 %v6670_v2, %v3770_v19  ;;  %v3769_v55 = vadd.f32 %v3634_v10, %v3379_v7  ;;  %v3382_v35 = vadd.f32 %v5138_v63, %v2992_v17  ;;  %v7318_v7 = vld [vmem:[#allocation16_spill] sm:$0xff] }
 0x1ef   : > { %v3254_v13 = vpop.f32.mrf.mxu1  ;;  %v5191_v42 = vpop.f32.mrf.mxu0 }
 0x1f0   : > { %3841 = vst.msk [vmem:[%s5366_s27 + $0x38] sm:$0xff] %vm315_vm3, %v6731_v50  ;;  %v6740_v54 = vadd.f32 %v6670_v2, %v3769_v55  ;;  %v3772_v40 = vadd.f32 %v5188_v23, %v3382_v35  ;;  %v3381_v56 = vadd.f32 %v3254_v13, %v2991_v12  ;;  %v3000_v23 = vadd.f32 %v6593_v3, %v2609_v53  ;;  %v7319_v12 = vld [vmem:[#allocation32_spill] sm:$0xff]  ;;  %v7322_v3 = vld [vmem:[#allocation34_spill] sm:$0xff] }
 0x1f1   : > { %v5141_v52 = vpop.f32.mrf.mxu1  ;;  %v3654_v39 = vpop.f32.mrf.mxu0  ;;  %v2611_v9 = vadd.f32 %v7319_v12, %v7318_v7  ;;  %v2610_v13 = vadd.f32 %v7322_v3, %v7321_v27  ;;  %v7333_v7 = vld [vmem:[#allocation21_spill] sm:$0xff]  ;;  %v7334_v12 = vld [vmem:[#allocation11_spill] sm:$0xff] }
 0x1f2   : > { %3840 = vst.msk [vmem:[%s5366_s27 + $0x30] sm:$0xff] %vm315_vm3, %v6740_v54  ;;  %v6749_v8 = vadd.f32 %v6670_v2, %v3772_v40  ;;  %v3771_v11 = vadd.f32 %v3644_v20, %v3381_v56  ;;  %v3384_v60 = vadd.f32 %v5141_v52, %v2994_v41  ;;  %v7320_v20 = vld [vmem:[#allocation30_spill] sm:$0xff] }
 0x1f3   : > { %v3264_v47 = vpop.f32.mrf.mxu1  ;;  %v5194_v30 = vpop.f32.mrf.mxu0  ;;  %v2999_v22 = vadd.f32 %v7320_v20, %v2608_v28  ;;  %v7323_v56 = vld [vmem:[#allocation18_spill] sm:$0xff] }
 0x1f4   : > { %3843 = vst.msk [vmem:[%s5366_s27 + $0x48] sm:$0xff] %vm315_vm3, %v6749_v8  ;;  %v6758_v18 = vadd.f32 %v6670_v2, %v3771_v11  ;;  %v3774_v6 = vadd.f32 %v5191_v42, %v3384_v60  ;;  %v3383_v4 = vadd.f32 %v3264_v47, %v2993_v51  ;;  %v2613_v52 = vadd.f32 %v7324_v31, %v7323_v56  ;;  %v7325_v11 = vld [vmem:[#allocation31_spill] sm:$0xff]  ;;  %v7331_v28 = vld [vmem:[#allocation10_spill] sm:$0xff] }
 0x1f5   : > { %v5144_v5 = vpop.f32.mrf.mxu1  ;;  %v3664_v25 = vpop.f32.mrf.mxu0  ;;  %v3002_v60 = vadd.f32 %v7325_v11, %v2611_v9  ;;  %v2614_v9 = vadd.f32 %v7334_v12, %v7333_v7  ;;  %v7347_v12 = vld [vmem:[#allocation26_spill] sm:$0xff] }
 0x1f6   : > { %3842 = vst.msk [vmem:[%s5366_s27 + $0x40] sm:$0xff] %vm315_vm3, %v6758_v18  ;;  %v6767_v61 = vadd.f32 %v6670_v2, %v3774_v6  ;;  %v3773_v34 = vadd.f32 %v3654_v39, %v3383_v4  ;;  %v3386_v21 = vadd.f32 %v5144_v5, %v2996_v36  ;;  %v7327_v6 = vld [vmem:[#allocation38_spill] sm:$0xff] }
 0x1f7   : > { %v3274_v33 = vpop.f32.mrf.mxu1  ;;  %v5197_v10 = vpop.f32.mrf.mxu0  ;;  %v2612_v4 = vadd.f32 %v7327_v6, %v7326_v38 }
 0x1f8   : > { %3845 = vst.msk [vmem:[%s5366_s27 + $0x58] sm:$0xff] %vm315_vm3, %v6767_v61  ;;  %v6776_v43 = vadd.f32 %v6670_v2, %v3773_v34  ;;  %v3776_v32 = vadd.f32 %v5194_v30, %v3386_v21  ;;  %v3385_v37 = vadd.f32 %v3274_v33, %v2995_v48  ;;  %v7329_v33 = vld [vmem:[#allocation35_spill] sm:$0xff] }
 0x1f9   : > { %v5147_v45 = vpop.f32.mrf.mxu1  ;;  %v3674_v17 = vpop.f32.mrf.mxu0 }
 0x1fa   : > { %3844 = vst.msk [vmem:[%s5366_s27 + $0x50] sm:$0xff] %vm315_vm3, %v6776_v43  ;;  %v6785_v58 = vadd.f32 %v6670_v2, %v3776_v32  ;;  %v3775_v26 = vadd.f32 %v3664_v25, %v3385_v37  ;;  %v3388_v15 = vadd.f32 %v5147_v45, %v2998_v24  ;;  %v7328_v25 = vld [vmem:[#allocation33_spill] sm:$0xff]  ;;  %v7330_v37 = vld [vmem:[#allocation20_spill] sm:$0xff] }
 0x1fb   : > { %v3284_v14 = vpop.f32.mrf.mxu1  ;;  %v5200_v19 = vpop.f32.mrf.mxu0  ;;  %v3001_v44 = vadd.f32 %v7328_v25, %v2610_v13  ;;  %v2615_v45 = vadd.f32 %v7331_v28, %v7330_v37  ;;  %v7337_v13 = vld [vmem:[#allocation12_spill] sm:$0xff]  ;;  %v7344_v37 = vld [vmem:[#allocation15_spill] sm:$0xff] }
 0x1fc   : > { %3847 = vst.msk [vmem:[%s5366_s27 + $0x68] sm:$0xff] %vm315_vm3, %v6785_v58  ;;  %v6794_v49 = vadd.f32 %v6670_v2, %v3775_v26  ;;  %v3778_v57 = vadd.f32 %v5197_v10, %v3388_v15  ;;  %v3387_v63 = vadd.f32 %v3284_v14, %v2997_v29  ;;  %v3004_v10 = vadd.f32 %v7329_v33, %v2613_v52  ;;  %v7332_v15 = vld [vmem:[#allocation37_spill] sm:$0xff]  ;;  %v7338_v52 = vld [vmem:[#allocation23_spill] sm:$0xff] }
 0x1fd   : > { %v5150_v55 = vpop.f32.mrf.mxu1  ;;  %v3684_v35 = vpop.f32.mrf.mxu0 }
 0x1fe   : > { %3846 = vst.msk [vmem:[%s5366_s27 + $0x60] sm:$0xff] %vm315_vm3, %v6794_v49  ;;  %v6803_v42 = vadd.f32 %v6670_v2, %v3778_v57  ;;  %v3777_v41 = vadd.f32 %v3674_v17, %v3387_v63  ;;  %v3390_v40 = vadd.f32 %v5150_v55, %v3000_v23  ;;  %v3003_v23 = vadd.f32 %v7332_v15, %v2612_v4  ;;  %v7336_v55 = vld [vmem:[#allocation14_spill] sm:$0xff]  ;;  %v7346_v15 = vld [vmem:[#allocation43_spill] sm:$0xff] }
 0x1ff   : > { %v3294_v39 = vpop.f32.mrf.mxu1  ;;  %v5203_v51 = vpop.f32.mrf.mxu0 }
 0x200   : > { %3849 = vst.msk [vmem:[%s5366_s27 + $0x78] sm:$0xff] %vm315_vm3, %v6803_v42  ;;  %v6812_v36 = vadd.f32 %v6670_v2, %v3777_v41  ;;  %v3780_v47 = vadd.f32 %v5200_v19, %v3390_v40  ;;  %v3389_v30 = vadd.f32 %v3294_v39, %v2999_v22  ;;  %v7335_v22 = vld [vmem:[#allocation22_spill] sm:$0xff]  ;;  %v3006_v41 = vadd.f32 %v7337_v13, %v2615_v45  ;;  %v7339_v39 = vld [vmem:[#allocation39_spill] sm:$0xff] }
 0x201   : > { %v5153_v48 = vpop.f32.mrf.mxu1  ;;  %v3694_v5 = vpop.f32.mrf.mxu0 }
 0x202   : > { %3848 = vst.msk [vmem:[%s5366_s27 + $0x70] sm:$0xff] %vm315_vm3, %v6812_v36  ;;  %v6821_v34 = vadd.f32 %v6670_v2, %v3780_v47  ;;  %v3779_v21 = vadd.f32 %v3684_v35, %v3389_v30  ;;  %v3392_v53 = vadd.f32 %v5153_v48, %v3002_v60  ;;  %v2617_v35 = vadd.f32 %v7336_v55, %v7335_v22  ;;  %v7340_v47 = vld [vmem:[#allocation9_spill] sm:$0xff]  ;;  %v7349_v55 = vld [vmem:[#allocation40_spill] sm:$0xff] }
 0x203   : > { %v3304_v24 = vpop.f32.mrf.mxu1  ;;  %v5206_v32 = vpop.f32.mrf.mxu0  ;;  %v3005_v30 = vadd.f32 %v7340_v47, %v2614_v9  ;;  %v7341_v48 = vld [vmem:[#allocation13_spill] sm:$0xff] }
 0x204   : > { %3851 = vst.msk [vmem:[%s5366_s27 + $0x88] sm:$0xff] %vm315_vm3, %v6821_v34  ;;  %v6830_v17 = vadd.f32 %v6670_v2, %v3779_v21  ;;  %v3782_v29 = vadd.f32 %v5203_v51, %v3392_v53  ;;  %v3391_v26 = vadd.f32 %v3304_v24, %v3001_v44  ;;  %v2616_v51 = vadd.f32 %v7339_v39, %v7338_v52  ;;  %v7342_v21 = vld [vmem:[#allocation24_spill] sm:$0xff]  ;;  %v7343_v53 = vld [vmem:[#allocation41_spill] sm:$0xff] }
 0x205   : > { %v5156_v14 = vpop.f32.mrf.mxu1  ;;  %v3704_v19 = vpop.f32.mrf.mxu0  ;;  %v2619_v33 = vadd.f32 %v7343_v53, %v7342_v21  ;;  %v7348_v9 = vld [vmem:[#allocation45_spill] sm:$0xff] }
 0x206   : > { %3850 = vst.msk [vmem:[%s5366_s27 + $0x80] sm:$0xff] %vm315_vm3, %v6830_v17  ;;  %v6839_v57 = vadd.f32 %v6670_v2, %v3782_v29  ;;  %v3781_v63 = vadd.f32 %v3694_v5, %v3391_v26  ;;  %v3394_v20 = vadd.f32 %v5156_v14, %v3004_v10  ;;  %v3008_v5 = vadd.f32 %v7341_v48, %v2617_v35  ;;  %v7345_v26 = vld [vmem:[#allocation25_spill] sm:$0xff] }
 0x207   : > { %v3314_v27 = vpop.f32.mrf.mxu1  ;;  %v5209_v3 = vpop.f32.mrf.mxu0  ;;  %v3007_v28 = vadd.f32 %v7344_v37, %v2616_v51  ;;  %v3010_v35 = vadd.f32 %v7349_v55, %v2619_v33  ;;  %v7352_v51 = vld [vmem:[#allocation42_spill] sm:$0xff] }
 0x208   : > { %3853 = vst.msk [vmem:[%s5366_s27 + $0x98] sm:$0xff] %vm315_vm3, %v6839_v57  ;;  %v6848_v40 = vadd.f32 %v6670_v2, %v3781_v63  ;;  %v3784_v56 = vadd.f32 %v5206_v32, %v3394_v20  ;;  %v3393_v31 = vadd.f32 %v3314_v27, %v3003_v23  ;;  %v2618_v23 = vadd.f32 %v7346_v15, %v7345_v26  ;;  %v7358_v26 = vld [vmem:[#allocation51_spill] sm:$0xff] }
 0x209   : > { %v5159_v11 = vpop.f32.mrf.mxu1  ;;  %v3714_v60 = vpop.f32.mrf.mxu0  ;;  %v2621_v63 = vadd.f32 %v7348_v9, %v7347_v12  ;;  %v7359_v9 = vld [vmem:[#allocation48_spill] sm:$0xff] }
 0x20a   : > { %3852 = vst.msk [vmem:[%s5366_s27 + $0x90] sm:$0xff] %vm315_vm3, %v6848_v40  ;;  %v6857_v38 = vadd.f32 %v6670_v2, %v3784_v56  ;;  %v3783_v6 = vadd.f32 %v3704_v19, %v3393_v31  ;;  %v3396_v4 = vadd.f32 %v5159_v11, %v3006_v41  ;;  %v7350_v41 = vld [vmem:[#allocation27_spill] sm:$0xff]  ;;  %v3009_v11 = vadd.f32 %v7352_v51, %v2618_v23 }
 0x20b   : > { %v3324_v25 = vpop.f32.mrf.mxu1  ;;  %v5212_v44 = vpop.f32.mrf.mxu0  ;;  %v7351_v56 = vld [vmem:[#allocation47_spill] sm:$0xff] }
 0x20c   : > { %3855 = vst.msk [vmem:[%s5366_s27 + $0xa8] sm:$0xff] %vm315_vm3, %v6857_v38  ;;  %v6866_v10 = vadd.f32 %v6670_v2, %v3783_v6  ;;  %v3786_v24 = vadd.f32 %v5209_v3, %v3396_v4  ;;  %v3395_v32 = vadd.f32 %v3324_v25, %v3005_v30  ;;  %v2620_v31 = vadd.f32 %v7351_v56, %v7350_v41  ;;  %v7353_v6 = vld [vmem:[#allocation44_spill] sm:$0xff] }
 0x20d   : > { %v5162_v45 = vpop.f32.mrf.mxu1  ;;  %v3724_v29 = vpop.f32.mrf.mxu0  ;;  %v3012_v4 = vadd.f32 %v7353_v6, %v2621_v63  ;;  %v7354_v25 = vld [vmem:[#allocation28_spill] sm:$0xff] }
 0x20e   : > { %3854 = vst.msk [vmem:[%s5366_s27 + $0xa0] sm:$0xff] %vm315_vm3, %v6866_v10  ;;  %v6875_v14 = vadd.f32 %v6670_v2, %v3786_v24  ;;  %v3785_v19 = vadd.f32 %v3714_v60, %v3395_v32  ;;  %v3398_v7 = vadd.f32 %v5162_v45, %v3008_v5  ;;  %v7356_v32 = vld [vmem:[#allocation46_spill] sm:$0xff] }
 0x20f   : > { %v3334_v20 = vpop.f32.mrf.mxu1  ;;  %v5215_v22 = vpop.f32.mrf.mxu0  ;;  %v3011_v37 = vadd.f32 %v7356_v32, %v2620_v31 }
 0x210   : > { %3857 = vst.msk [vmem:[%s5366_s27 + $0xb8] sm:$0xff] %vm315_vm3, %v6875_v14  ;;  %v6884_v27 = vadd.f32 %v6670_v2, %v3785_v19  ;;  %v3788_v3 = vadd.f32 %v5212_v44, %v3398_v7  ;;  %v3397_v13 = vadd.f32 %v3334_v20, %v3007_v28  ;;  %v7355_v44 = vld [vmem:[#allocation49_spill] sm:$0xff] }
 0x211   : > { %v5165_v52 = vpop.f32.mrf.mxu1  ;;  %v3734_v39 = vpop.f32.mrf.mxu0  ;;  %v2623_v21 = vadd.f32 %v7355_v44, %v7354_v25 }
 0x212   : > { %3856 = vst.msk [vmem:[%s5366_s27 + $0xb0] sm:$0xff] %vm315_vm3, %v6884_v27  ;;  %v6893_v60 = vadd.f32 %v6670_v2, %v3788_v3  ;;  %v3787_v47 = vadd.f32 %v3724_v29, %v3397_v13  ;;  %v3400_v30 = vadd.f32 %v5165_v52, %v3010_v35  ;;  %v7357_v29 = vld [vmem:[#allocation29_spill] sm:$0xff]  ;;  %v7360_v13 = vld [vmem:[#allocation50_spill] sm:$0xff] }
 0x213   : > { %v3344_v48 = vpop.f32.mrf.mxu1  ;;  %v5218_v5 = vpop.f32.mrf.mxu0  ;;  %v2622_v15 = vadd.f32 %v7358_v26, %v7357_v29  ;;  %v3014_v63 = vadd.f32 %v7359_v9, %v2623_v21 }
 0x214   : > { %3859 = vst.msk [vmem:[%s5366_s27 + $0xc8] sm:$0xff] %vm315_vm3, %v6893_v60  ;;  %v6902_v53 = vadd.f32 %v6670_v2, %v3787_v47  ;;  %v3790_v33 = vadd.f32 %v5215_v22, %v3400_v30  ;;  %v3399_v24 = vadd.f32 %v3344_v48, %v3009_v11 }
 0x215   : > { %v5168_v28 = vpop.f32.mrf.mxu1  ;;  %v3744_v45 = vpop.f32.mrf.mxu0  ;;  %v3013_v41 = vadd.f32 %v7360_v13, %v2622_v15 }
 0x216   : > { %3858 = vst.msk [vmem:[%s5366_s27 + $0xc0] sm:$0xff] %vm315_vm3, %v6902_v53  ;;  %v6911_v23 = vadd.f32 %v6670_v2, %v3790_v33  ;;  %v3789_v19 = vadd.f32 %v3734_v39, %v3399_v24  ;;  %v3402_v7 = vadd.f32 %v5168_v28, %v3012_v4 }
 0x217   : > { %v3354_v12 = vpop.f32.mrf.mxu1  ;;  %v5221_v3 = vpop.f32.mrf.mxu0 }
 0x218   : > { %3861 = vst.msk [vmem:[%s5366_s27 + $0xd8] sm:$0xff] %vm315_vm3, %v6911_v23  ;;  %v6918_v20 = vadd.f32 %v6670_v2, %v3789_v19  ;;  %v3792_v22 = vadd.f32 %v5218_v5, %v3402_v7  ;;  %v3401_v55 = vadd.f32 %v3354_v12, %v3011_v37 }
 0x219   : > { %v5171_v35 = vpop.f32.mrf.mxu1  ;;  %v3754_v30 = vpop.f32.mrf.mxu0 }
 0x21a   : > { %3860 = vst.msk [vmem:[%s5366_s27 + $0xd0] sm:$0xff] %vm315_vm3, %v6918_v20  ;;  %v6925_v56 = vadd.f32 %v6670_v2, %v3792_v22  ;;  %v3791_v31 = vadd.f32 %v3744_v45, %v3401_v55  ;;  %v3404_v52 = vadd.f32 %v5171_v35, %v3014_v63 }
 0x21b   : > { %v3364_v39 = vpop.f32.mrf.mxu1 }
 0x21c   : > { %3863 = vst.msk [vmem:[%s5366_s27 + $0xe8] sm:$0xff] %vm315_vm3, %v6925_v56  ;;  %v6931_v51 = vadd.f32 %v6670_v2, %v3791_v31  ;;  %v3794_v11 = vadd.f32 %v5221_v3, %v3404_v52  ;;  %v3403_v47 = vadd.f32 %v3364_v39, %v3013_v41 }
 0x21e   : > { %3862 = vst.msk [vmem:[%s5366_s27 + $0xe0] sm:$0xff] %vm315_vm3, %v6931_v51  ;;  %v6937_v6 = vadd.f32 %v6670_v2, %v3794_v11  ;;  %v3793_v4 = vadd.f32 %v3754_v30, %v3403_v47  ;;  %3868 = sbr.rel (%p4159_p4) target bundleno = 549 (0x225), region = 40 }
 0x220   : > { %3865 = vst.msk [vmem:[%s5366_s27 + $0xf8] sm:$0xff] %vm315_vm3, %v6937_v6  ;;  %v6943_v48 = vadd.f32 %v6670_v2, %v3793_v4 }
 0x222   : > { %3864 = vst.msk [vmem:[%s5366_s27 + $0xf0] sm:$0xff] %vm315_vm3, %v6943_v48 }
 0x223   : > { %vm3869_vm4 = vcmask 24576   ;;  %v5313_v5 = vmov 0.0  }
 0x224   : > { %3870 = vst.msk [vmem:[#allocation3] sm:$0x1] %vm3869_vm4, %v5313_v5  ;;  %3871 = vst.msk [vmem:[#allocation5] sm:$0x1] %vm3869_vm4, %v5313_v5 }
 0x225 PF: > { %v3873_v25 = vsel %vm315_vm3, %v6686_v16, 0.0  ;;  %v3874_v44 = vsel %vm315_vm3, %v6677_v46, 0.0  ;;  %v3876_v2 = vsel %vm315_vm3, %v6704_v1, 0.0  ;;  %v3878_v33 = vsel %vm315_vm3, %v6695_v0, 0.0  ;;  %s5314_s25 = smov [#allocation3]   ;;  %p5232_p5 = scmp.eq.s32.totalorder %s5352_s19, 1 }
 0x226   : > { %v3875_v21 = vadd.f32 %v3874_v44, %v3873_v25  ;;  %v3880_v32 = vsel %vm315_vm3, %v6722_v62, 0.0  ;;  %v3882_v28 = vsel %vm315_vm3, %v6713_v59, 0.0  ;;  %v3884_v29 = vsel %vm315_vm3, %v6740_v54, 0.0  ;;  %s4064_s26 = sshll.u32 %s5314_s25, 4  ;;  %s4065_s26 = int_to_ptr.vmem [resolvable:$true] %s4064_s26 }
 0x227   : > { %v3886_v15 = vsel %vm315_vm3, %v6731_v50, 0.0  ;;  %v3888_v7 = vsel %vm315_vm3, %v6758_v18, 0.0  ;;  %v3890_v9 = vsel %vm315_vm3, %v6749_v8, 0.0  ;;  %v3946_v63 = vmul.f32 %v6686_v16, %v6686_v16  ;;  %s5248_s27 = scalar_lea.vmem %s4065_s26, 16  ;;  %s5254_s28 = scalar_lea.vmem %s4065_s26, 32 }
 0x228   : > { %v3877_v24 = vadd.f32 %v3876_v2, %v3875_v21  ;;  %v3947_v22 = vmul.f32 %v6677_v46, %v6677_v46  ;;  %v3948_v35 = vmul.f32 %v6704_v1, %v6704_v1  ;;  %v3892_v3 = vsel %vm315_vm3, %v6776_v43, 0.0  ;;  %p5249_p6 = scmp.ne.s32.totalorder %s4065_s26, %s5248_s27  ;;  %p5255_p9 = scmp.lt.s32.totalorder %s4065_s26, %s4065_s26 }
 0x229   : > { %v3949_v13 = vmul.f32 %v6695_v0, %v6695_v0  ;;  %v3894_v31 = vsel %vm315_vm3, %v6767_v61, 0.0  ;;  %v3950_v16 = vmul.f32 %v6722_v62, %v6722_v62  ;;  %v3978_v52 = vsel %vm315_vm3, %v3946_v63, 0.0  ;;  %p5256_p10 = scmp.lt.s32.totalorder %s5254_s28, %s5248_s27 }
 0x22a   : > { %v3879_v37 = vadd.f32 %v3878_v33, %v3877_v24  ;;  %v3979_v46 = vsel %vm315_vm3, %v3947_v22, 0.0  ;;  %v3981_v1 = vsel %vm315_vm3, %v3948_v35, 0.0  ;;  %v3896_v47 = vsel %vm315_vm3, %v6794_v49, 0.0  ;;  %p5250_p7 = pnand %p5249_p6, %p5232_p5 }
 0x22b   : > { %v3980_v11 = vadd.f32 %v3979_v46, %v3978_v52  ;;  %v3951_v0 = vmul.f32 %v6713_v59, %v6713_v59  ;;  %v3983_v30 = vsel %vm315_vm3, %v3949_v13, 0.0  ;;  %v3898_v62 = vsel %vm315_vm3, %v6785_v58, 0.0  ;;  %p5257_p11 = por %p5256_p10, %p5255_p9 }
 0x22c   : > { %v3881_v45 = vadd.f32 %v3880_v32, %v3879_v37  ;;  %v3952_v25 = vmul.f32 %v6740_v54, %v6740_v54  ;;  %v3985_v44 = vsel %vm315_vm3, %v3950_v16, 0.0  ;;  %v3900_v33 = vsel %vm315_vm3, %v6812_v36, 0.0  ;;  %p5251_p8 = pneg %p5250_p7 }
 0x22d   : > { %v3982_v5 = vadd.f32 %v3981_v1, %v3980_v11  ;;  %v3953_v59 = vmul.f32 %v6731_v50, %v6731_v50  ;;  %v3987_v24 = vsel %vm315_vm3, %v3951_v0, 0.0  ;;  %v3954_v54 = vmul.f32 %v6758_v18, %v6758_v18 }
 0x22e   : > { %v3883_v26 = vadd.f32 %v3882_v28, %v3881_v45  ;;  %v3902_v28 = vsel %vm315_vm3, %v6803_v42, 0.0  ;;  %v3989_v45 = vsel %vm315_vm3, %v3952_v25, 0.0  ;;  %v3955_v50 = vmul.f32 %v6749_v8, %v6749_v8  ;;  %p5258_p12 = pnand %p5257_p11, %p5251_p8 }
 0x22f   : > { %v3984_v21 = vadd.f32 %v3983_v30, %v3982_v5  ;;  %v3956_v18 = vmul.f32 %v6776_v43, %v6776_v43  ;;  %v3993_v63 = vsel %vm315_vm3, %v3954_v54, 0.0  ;;  %v3908_v35 = vsel %vm315_vm3, %v6848_v40, 0.0 }
 0x230   : > { %v3885_v19 = vadd.f32 %v3884_v29, %v3883_v26  ;;  %v3957_v8 = vmul.f32 %v6767_v61, %v6767_v61  ;;  %v3958_v43 = vmul.f32 %v6794_v49, %v6794_v49  ;;  %v3959_v61 = vmul.f32 %v6785_v58, %v6785_v58 }
 0x231   : > { %v3986_v37 = vadd.f32 %v3985_v44, %v3984_v21  ;;  %v3997_v16 = vsel %vm315_vm3, %v3956_v18, 0.0  ;;  %v3914_v0 = vsel %vm315_vm3, %v6857_v38, 0.0  ;;  %v3960_v49 = vmul.f32 %v6812_v36, %v6812_v36 }
 0x232   : > { %v3887_v12 = vadd.f32 %v3886_v15, %v3885_v19  ;;  %v3904_v15 = vsel %vm315_vm3, %v6830_v17, 0.0  ;;  %v3991_v19 = vsel %vm315_vm3, %v3953_v59, 0.0  ;;  %v3999_v11 = vsel %vm315_vm3, %v3957_v8, 0.0 }
 0x233   : > { %v3988_v26 = vadd.f32 %v3987_v24, %v3986_v37  ;;  %v4001_v30 = vsel %vm315_vm3, %v3958_v43, 0.0  ;;  %v3961_v58 = vmul.f32 %v6803_v42, %v6803_v42  ;;  %v4003_v25 = vsel %vm315_vm3, %v3959_v61, 0.0 }
 0x234   : > { %v3889_v55 = vadd.f32 %v3888_v7, %v3887_v12  ;;  %v3918_v21 = vsel %vm315_vm3, %v6875_v14, 0.0  ;;  %v3962_v36 = vmul.f32 %v6830_v17, %v6830_v17  ;;  %v3963_v42 = vmul.f32 %v6821_v34, %v6821_v34 }
 0x235   : > { %v3990_v12 = vadd.f32 %v3989_v45, %v3988_v26  ;;  %v4007_v37 = vsel %vm315_vm3, %v3961_v58, 0.0  ;;  %v3922_v45 = vsel %vm315_vm3, %v6893_v60, 0.0  ;;  %v3964_v17 = vmul.f32 %v6848_v40, %v6848_v40 }
 0x236   : > { %v3891_v41 = vadd.f32 %v3890_v9, %v3889_v55  ;;  %v3906_v9 = vsel %vm315_vm3, %v6821_v34, 0.0  ;;  %v3965_v34 = vmul.f32 %v6839_v57, %v6839_v57  ;;  %v3966_v40 = vmul.f32 %v6866_v10, %v6866_v10 }
 0x237   : > { %v3992_v55 = vadd.f32 %v3991_v19, %v3990_v12  ;;  %v4011_v19 = vsel %vm315_vm3, %v3963_v42, 0.0  ;;  %v4013_v18 = vsel %vm315_vm3, %v3964_v17, 0.0  ;;  %v3934_v61 = vsel %vm315_vm3, %v6937_v6, 0.0 }
 0x238   : > { %v3893_v39 = vadd.f32 %v3892_v3, %v3891_v41  ;;  %v3995_v3 = vsel %vm315_vm3, %v3955_v50, 0.0  ;;  %v3924_v50 = vsel %vm315_vm3, %v6918_v20, 0.0  ;;  %vm3943_vm5 = vcmask 24576  }
 0x239   : > { %v3994_v41 = vadd.f32 %v3993_v63, %v3992_v55  ;;  %v3928_v55 = vsel %vm315_vm3, %v6931_v51, 0.0 }
 0x23a   : > { %v3895_v4 = vadd.f32 %v3894_v31, %v3893_v39  ;;  %v3910_v31 = vsel %vm315_vm3, %v6839_v57, 0.0  ;;  %v3912_v39 = vsel %vm315_vm3, %v6866_v10, 0.0  ;;  %v3967_v57 = vmul.f32 %v6857_v38, %v6857_v38 }
 0x23b   : > { %v3996_v46 = vadd.f32 %v3995_v3, %v3994_v41  ;;  %v3968_v10 = vmul.f32 %v6884_v27, %v6884_v27  ;;  %v4017_v41 = vsel %vm315_vm3, %v3966_v40, 0.0  ;;  %v3969_v38 = vmul.f32 %v6875_v14, %v6875_v14 }
 0x23c   : > { %v3897_v2 = vadd.f32 %v3896_v47, %v3895_v4 }
 0x23d   : > { %v3998_v47 = vadd.f32 %v3997_v16, %v3996_v46  ;;  %v3932_v16 = vsel %vm315_vm3, %v6943_v48, 0.0 }
 0x23e   : > { %v3899_v32 = vadd.f32 %v3898_v62, %v3897_v2  ;;  %v3916_v62 = vsel %vm315_vm3, %v6884_v27, 0.0  ;;  %v3970_v27 = vmul.f32 %v6902_v53, %v6902_v53 }
 0x23f   : > { %v4000_v5 = vadd.f32 %v3999_v11, %v3998_v47  ;;  %v4021_v11 = vsel %vm315_vm3, %v3968_v10, 0.0 }
 0x240   : > { %v3901_v29 = vadd.f32 %v3900_v33, %v3899_v32  ;;  %v4005_v33 = vsel %vm315_vm3, %v3960_v49, 0.0  ;;  %v3920_v32 = vsel %vm315_vm3, %v6902_v53, 0.0  ;;  %v4023_v49 = vsel %vm315_vm3, %v3969_v38, 0.0 }
 0x241   : > { %v4002_v2 = vadd.f32 %v4001_v30, %v4000_v5  ;;  %v4025_v5 = vsel %vm315_vm3, %v3970_v27, 0.0  ;;  %v3973_v53 = vmul.f32 %v6911_v23, %v6911_v23 }
 0x242   : > { %v3903_v7 = vadd.f32 %v3902_v28, %v3901_v29  ;;  %v4009_v29 = vsel %vm315_vm3, %v3962_v36, 0.0 }
 0x243   : > { %v4004_v24 = vadd.f32 %v4003_v25, %v4002_v2 }
 0x244   : > { %v3905_v22 = vadd.f32 %v3904_v15, %v3903_v7 }
 0x245   : > { %v4006_v54 = vadd.f32 %v4005_v33, %v4004_v24 }
 0x246   : > { %v3907_v13 = vadd.f32 %v3906_v9, %v3905_v22  ;;  %v3926_v9 = vsel %vm315_vm3, %v6911_v23, 0.0  ;;  %v3976_v23 = vmul.f32 %v6943_v48, %v6943_v48 }
 0x247   : > { %v4008_v15 = vadd.f32 %v4007_v37, %v4006_v54  ;;  %v3977_v54 = vmul.f32 %v6937_v6, %v6937_v6 }
 0x248   : > { %v3909_v52 = vadd.f32 %v3908_v35, %v3907_v13  ;;  %v4015_v35 = vsel %vm315_vm3, %v3965_v34, 0.0  ;;  %v3930_v13 = vsel %vm315_vm3, %v6925_v56, 0.0 }
 0x249   : > { %v4010_v12 = vadd.f32 %v4009_v29, %v4008_v15  ;;  %v4037_v29 = vsel %vm315_vm3, %v3976_v23, 0.0  ;;  %v4039_v15 = vsel %vm315_vm3, %v3977_v54, 0.0 }
 0x24a   : > { %v3911_v1 = vadd.f32 %v3910_v31, %v3909_v52  ;;  %v4019_v52 = vsel %vm315_vm3, %v3967_v57, 0.0 }
 0x24b   : > { %v4012_v22 = vadd.f32 %v4011_v19, %v4010_v12 }
 0x24c   : > { %v3913_v4 = vadd.f32 %v3912_v39, %v3911_v1 }
 0x24d   : > { %v4014_v3 = vadd.f32 %v4013_v18, %v4012_v22 }
 0x24e   : > { %v3915_v44 = vadd.f32 %v3914_v0, %v3913_v4  ;;  %v3971_v0 = vmul.f32 %v6893_v60, %v6893_v60  ;;  %v3972_v4 = vmul.f32 %v6918_v20, %v6918_v20  ;;  %v3974_v60 = vmul.f32 %v6931_v51, %v6931_v51  ;;  %v3872_v51 = vld [vmem:[#allocation3] sm:$0x1] }
 0x24f   : > { %v4016_v43 = vadd.f32 %v4015_v35, %v4014_v3  ;;  %v3975_v20 = vmul.f32 %v6925_v56, %v6925_v56 }
 0x250   : > { %v3917_v59 = vadd.f32 %v3916_v62, %v3915_v44  ;;  %v4027_v25 = vsel %vm315_vm3, %v3971_v0, 0.0  ;;  %v4033_v42 = vsel %vm315_vm3, %v3974_v60, 0.0 }
 0x251   : > { %v4018_v39 = vadd.f32 %v4017_v41, %v4016_v43 }
 0x252   : > { %v3919_v28 = vadd.f32 %v3918_v21, %v3917_v59  ;;  %v4029_v21 = vsel %vm315_vm3, %v3972_v4, 0.0  ;;  %v4031_v59 = vsel %vm315_vm3, %v3973_v53, 0.0 }
 0x253   : > { %v4020_v47 = vadd.f32 %v4019_v52, %v4018_v39 }
 0x254   : > { %v3921_v26 = vadd.f32 %v3920_v32, %v3919_v28 }
 0x255   : > { %v4022_v30 = vadd.f32 %v4021_v11, %v4020_v47 }
 0x256   : > { %v3923_v7 = vadd.f32 %v3922_v45, %v3921_v26  ;;  %v4035_v45 = vsel %vm315_vm3, %v3975_v20, 0.0 }
 0x257   : > { %v4024_v58 = vadd.f32 %v4023_v49, %v4022_v30 }
 0x258   : > { %v3925_v63 = vadd.f32 %v3924_v50, %v3923_v7 }
 0x259   : > { %v4026_v2 = vadd.f32 %v4025_v5, %v4024_v58 }
 0x25a   : > { %v3927_v8 = vadd.f32 %v3926_v9, %v3925_v63 }
 0x25b   : > { %v4028_v33 = vadd.f32 %v4027_v25, %v4026_v2 }
 0x25c   : > { %v3929_v31 = vadd.f32 %v3928_v55, %v3927_v8 }
 0x25d   : > { %v4030_v32 = vadd.f32 %v4029_v21, %v4028_v33 }
 0x25e   : > { %v3931_v46 = vadd.f32 %v3930_v13, %v3929_v31 }
 0x25f   : > { %v4032_v28 = vadd.f32 %v4031_v59, %v4030_v32 }
 0x260   : > { %v3933_v1 = vadd.f32 %v3932_v16, %v3931_v46 }
 0x261   : > { %v4034_v17 = vadd.f32 %v4033_v42, %v4032_v28 }
 0x262   : > { %v3935_v14 = vadd.f32 %v3934_v61, %v3933_v1 }
 0x263   : > { %v4036_v26 = vadd.f32 %v4035_v45, %v4034_v17 }
 0x264   : > { %v3936_v62 = vrot.slane %v3935_v14, 4 }
 0x265   : > { %v4038_v50 = vadd.f32 %v4037_v29, %v4036_v26 }
 0x266   : > { %v3937_v44 = vadd.f32 %v3936_v62, %v3935_v14 }
 0x268   : > { %v3938_v36 = vrot.slane %v3937_v44, 2 }
 0x26a   : > { %v3939_v24 = vadd.f32 %v3938_v36, %v3937_v44 }
 0x26c   : > { %v3940_v37 = vrot.slane %v3939_v24, 1 }
 0x26e   : > { %v3941_v56 = vadd.f32 %v3940_v37, %v3939_v24 }
 0x270   : > { %v3942_v48 = vadd.f32 %v3941_v56, %v3872_v51 }
 0x272   : > { %3944 = vst.msk [vmem:[#allocation3] sm:$0x1] %vm3943_vm5, %v3942_v48 }
 0x273   : > { %5261 = shalt.err (!%p5258_p12)
}
 0x274   : > { %5225 = dma.vmem_to_hbm [thread:$0]  (%p5232_p5), %s4065_s26, 16, %s7142_s4, [#allocation4]   ;;  %v4040_v6 = vadd.f32 %v4039_v15, %v4038_v50  ;;  %v3945_v40 = vld [vmem:[#allocation5] sm:$0x1] }
 0x275   : > { %s5315_s6 = smov [#allocation5]  }
 0x276   : > { %v4041_v34 = vrot.slane %v4040_v6, 4  ;;  %s4075_s7 = sshll.u32 %s5315_s6, 4  ;;  %s4076_s7 = int_to_ptr.vmem [resolvable:$true] %s4075_s7 }
 0x277   : > { %s5272_s8 = scalar_lea.vmem %s4076_s7, 16  ;;  %s5278_s9 = scalar_lea.vmem %s4076_s7, 32 }
 0x278   : > { %v4042_v19 = vadd.f32 %v4041_v34, %v4040_v6  ;;  %p5273_p13 = scmp.ne.s32.totalorder %s4076_s7, %s5272_s8  ;;  %p5279_p2 = scmp.lt.s32.totalorder %s4076_s7, %s4076_s7 }
 0x279   : > { %p5280_p3 = scmp.lt.s32.totalorder %s5278_s9, %s5272_s8 }
 0x27a   : > { %v4043_v7 = vrot.slane %v4042_v19, 2  ;;  %p5274_p0 = pnand %p5273_p13, %p5232_p5 }
 0x27b   : > { %p5281_p4 = por %p5280_p3, %p5279_p2 }
 0x27c   : > { %v4044_v12 = vadd.f32 %v4043_v7, %v4042_v19  ;;  %p5275_p1 = pneg %p5274_p0 }
 0x27e   : > { %v4045_v9 = vrot.slane %v4044_v12, 1  ;;  %p5282_p6 = pnand %p5281_p4, %p5275_p1 }
 0x280   : > { %v4046_v18 = vadd.f32 %v4045_v9, %v4044_v12 }
 0x282   : > { %v4047_v63 = vadd.f32 %v4046_v18, %v3945_v40 }
 0x284   : > { %4048 = vst.msk [vmem:[#allocation5] sm:$0x1] %vm3943_vm5, %v4047_v63 }
 0x285   : > { %5285 = shalt.err (!%p5282_p6)
}
 0x286   : > { %5227 = dma.vmem_to_hbm [thread:$0]  (%p5232_p5), %s4076_s7, 16, %s7143_s5, [#allocation6]  }
 0x287   : > { %5301 = dma.done.wait (%p5232_p5), [#allocation4], 16  }
 0x288   : > { %5303 = vsyncadd (%p5232_p5), [#allocation4], 4294967280 }
 0x289   : > { %5305 = dma.done.wait (%p5232_p5), [#allocation6], 16  }
 0x28a   : > { %5307 = vsyncadd (%p5232_p5), [#allocation6], 4294967280 }
 0x28b PF: > { %s18_s18 = sadd.s32 1, %s5310_s18  }
 0x28c   : > { %p15_p7 = scmp.ge.s32.totalorder %s18_s18, 4  }
 0x28e   :  { %17 = sbr.rel (!%p15_p7) target bundleno = 2 (0x2), region = 97 }
 0x293   :  { %4100 = vsyncpa [#allocation4], 1 }
 0x294   :  { %4102 = vsyncpa [#allocation4 + $0x1], 1 }
 0x295   :  { %4103 = vsyncpa [#allocation6], 1 }

</bundles_post_ra>
